<compile_context>
chip_gen: v5e
topology: v5e:2x2
jax: 0.10.0
libtpu: 0.0.40
codegen_flags: <defaults>
</compile_context>

<pallas_src>
import functools

import jax
import jax.numpy as jnp
from jax import lax
from jax.experimental import pallas as pl
from jax.experimental.pallas import tpu as pltpu


_VMEM_SPEC = pl.BlockSpec(memory_space=pltpu.MemorySpace.VMEM)


def _round_up(x, m):
    return ((x + m - 1) // m) * m


# -----------------------------------------------------------------------------
# Fused kernel: full GRU stack (all layers, both directions) + Linear head
# -----------------------------------------------------------------------------
def gru_stack_kernel(*refs, n_layers, T, Bp, GW, unroll):
    """Ref layout (everything whole-array VMEM resident, no grid):

      inputs : x (T*Bp, E_p) bf16,
               [w_same, w_cross, gi_b, b_hn, w_hh] * n_layers,
               fc_w (GW, Op) bf16, fc_b (1, Op) f32
      outputs: out (Bp, Op) f32, hid (Bp, GW) f32
      scratch: gi_same (T*Bp, 3*GW) f32, gi_cross (T*Bp, 3*GW) f32,
               seq (T*Bp, GW) bf16

    Lane layout: gate block = GW lanes, fwd dir in [0:H], bwd dir in [H:2H];
    hidden state h is one (Bp, GW) block in the same layout.
    Scan runs t = 0..T-1; fwd consumes original time t, bwd consumes T-1-t.
    Gate preactivation(t) = gi_same[t] + gi_cross[T-1-t]  (the add does not
    depend on h, so it overlaps the MXU/EUP latency of the step).
    seq row t stores [h_fwd(t) | h_bwd(T-1-t)]; the next layer's packed weights
    account for this "aligned-to-scan" layout.
    """
    n_in = 3 + 5 * n_layers
    x_ref = refs[0]
    layer_refs = [refs[1 + 5 * l: 1 + 5 * (l + 1)] for l in range(n_layers)]
    fc_w_ref, fc_b_ref = refs[n_in - 2], refs[n_in - 1]
    out_ref, hid_ref = refs[n_in], refs[n_in + 1]
    gi_same_ref, gi_cross_ref, seq_ref = refs[n_in + 2: n_in + 5]

    def run_layer(w_same_ref, w_cross_ref, gi_b_ref, b_hn_ref, w_hh_ref,
                  src, write_seq):
        # Hoisted input->hidden projection: one big MXU pass over the whole
        # sequence for each block.  b_ih (all gates) + b_hh (r,z gates) are
        # pre-merged into gi_b and land in the "same" block only.
        gi_same_ref[...] = (
            jnp.dot(src, w_same_ref[...], preferred_element_type=jnp.float32)
            + gi_b_ref[...])
        gi_cross_ref[...] = jnp.dot(
            src, w_cross_ref[...], preferred_element_type=jnp.float32)

        w_hh = w_hh_ref[...]          # (GW, 3*GW) bf16, loop invariant
        b_hn = b_hn_ref[...]          # (1, GW) f32, n-gate hidden bias

        def step(t, h):               # h: (Bp, GW) bf16, [fwd | bwd] lanes
            row_f = pl.multiple_of(t * Bp, Bp)
            row_b = pl.multiple_of((T - 1 - t) * Bp, Bp)
            g = (gi_same_ref[pl.ds(row_f, Bp), :]
                 + gi_cross_ref[pl.ds(row_b, Bp), :])            # (Bp, 3*GW) f32
            gh = jnp.dot(h, w_hh, preferred_element_type=jnp.float32)
            r = jax.nn.sigmoid(g[:, 0:GW] + gh[:, 0:GW])
            z = jax.nn.sigmoid(g[:, GW:2 * GW] + gh[:, GW:2 * GW])
            n = jnp.tanh(g[:, 2 * GW:3 * GW] + r * (gh[:, 2 * GW:3 * GW] + b_hn))
            # single bf16 cast per step, reused by the store and the next matmul
            h_new = ((1.0 - z) * n + z * h).astype(jnp.bfloat16)
            if write_seq:
                seq_ref[pl.ds(row_f, Bp), :] = h_new
            return h_new

        h0 = jnp.zeros((Bp, GW), jnp.bfloat16)
        return lax.fori_loop(0, T, step, h0, unroll=unroll)

    h = None
    for layer in range(n_layers):
        src = x_ref[...] if layer == 0 else seq_ref[...]
        h = run_layer(*layer_refs[layer], src=src,
                      write_seq=(layer < n_layers - 1))

    hid_ref[...] = h.astype(jnp.float32)
    out_ref[...] = (
        jnp.dot(h, fc_w_ref[...], preferred_element_type=jnp.float32)
        + fc_b_ref[...])


# -----------------------------------------------------------------------------
# One-time weight packing (hoisted out of the forward path)
# -----------------------------------------------------------------------------
def pack_params(params, *, n_layers, hidden_dim):
    """Repack PyTorch-layout GRU/Linear weights into the kernel layout.

    NOTE: padded weight/bias lanes must stay exactly zero; together with
    tanh(0)=0 this keeps the padded lanes of h at 0 for every step.
    """
    H = hidden_dim
    GW = _round_up(2 * H, 128)
    NG = 3 * GW
    E = params["embedding"].shape[1]
    E_p = _round_up(E, 128)
    O = params["fc_w"].shape[1]
    Op = _round_up(O, 128)

    layers = []
    for layer in range(n_layers):
        lp = params["gru"][layer]
        w_ih_f, w_hh_f, b_ih_f, b_hh_f = lp["fwd"]
        w_ih_b, w_hh_b, b_ih_b, b_hh_b = lp["bwd"]
        d_in = w_ih_f.shape[0]
        d_in_p = E_p if layer == 0 else GW

        w_same = jnp.zeros((d_in_p, NG), jnp.float32)
        w_cross = jnp.zeros((d_in_p, NG), jnp.float32)
        w_hh = jnp.zeros((GW, NG), jnp.float32)
        gi_b = jnp.zeros((1, NG), jnp.float32)
        b_hn = jnp.zeros((1, GW), jnp.float32)

        for g in range(3):                       # gates r, z, n
            col = g * GW
            src = slice(g * H, (g + 1) * H)
            if layer == 0:
                # raw features: fwd dir reads scan row t ("same"), bwd dir
                # reads row T-1-t ("cross").
                w_same = w_same.at[0:d_in, col:col + H].set(w_ih_f[:, src])
                w_cross = w_cross.at[0:d_in, col + H:col + 2 * H].set(w_ih_b[:, src])
            else:
                # layer input rows (= prev seq row t) hold [h_fwd(t) | h_bwd(T-1-t)]:
                # the fwd half is "same" for the fwd direction / "cross" for bwd,
                # and vice versa for the bwd half.
                w_same = w_same.at[0:H, col:col + H].set(w_ih_f[0:H, src])
                w_same = w_same.at[H:2 * H, col + H:col + 2 * H].set(w_ih_b[H:2 * H, src])
                w_cross = w_cross.at[0:H, col + H:col + 2 * H].set(w_ih_b[0:H, src])
                w_cross = w_cross.at[H:2 * H, col:col + H].set(w_ih_f[H:2 * H, src])
            w_hh = w_hh.at[0:H, col:col + H].set(w_hh_f[:, src])
            w_hh = w_hh.at[H:2 * H, col + H:col + 2 * H].set(w_hh_b[:, src])
            bias_f, bias_b = b_ih_f[src], b_ih_b[src]
            if g < 2:                            # pre-merge b_hh for r, z
                bias_f = bias_f + b_hh_f[src]
                bias_b = bias_b + b_hh_b[src]
            gi_b = gi_b.at[0, col:col + H].set(bias_f)
            gi_b = gi_b.at[0, col + H:col + 2 * H].set(bias_b)
        b_hn = b_hn.at[0, 0:H].set(b_hh_f[2 * H:3 * H])
        b_hn = b_hn.at[0, H:2 * H].set(b_hh_b[2 * H:3 * H])

        layers.append({
            "w_same": w_same.astype(jnp.bfloat16),
            "w_cross": w_cross.astype(jnp.bfloat16),
            "gi_b": gi_b,
            "b_hn": b_hn,
            "w_hh": w_hh.astype(jnp.bfloat16),
        })

    fc_w = jnp.zeros((GW, Op), jnp.float32).at[0:2 * H, 0:O].set(params["fc_w"])
    fc_b = jnp.zeros((1, Op), jnp.float32).at[0, 0:O].set(params["fc_b"])

    return {
        "embedding": params["embedding"].astype(jnp.bfloat16),
        "layers": layers,
        "fc_w": fc_w.astype(jnp.bfloat16),
        "fc_b": fc_b,
    }


# -----------------------------------------------------------------------------
# Forward wrapper
# -----------------------------------------------------------------------------
def gru_model_forward(text, packed, *, n_layers, hidden_dim, output_dim):
    """Mirrors GRUModel.forward (eval mode: dropout = identity).

    text: (B, T) int32 token ids.
    Returns (output (B, output_dim), hidden (B, 2*hidden_dim)).
    """
    B, T = text.shape
    H = hidden_dim
    GW = _round_up(2 * H, 128)
    NG = 3 * GW
    E = packed["embedding"].shape[1]
    E_p = _round_up(E, 128)
    O = output_dim
    Op = packed["fc_w"].shape[1]
    Bp = _round_up(B, 8)

    # embedding gather + batch/feature pad + time-major flatten (plain-JAX glue)
    emb = packed["embedding"][text]                              # (B, T, E) bf16
    emb = jnp.pad(emb, ((0, Bp - B), (0, 0), (0, E_p - E)))      # (Bp, T, E_p)
    x = jnp.transpose(emb, (1, 0, 2)).reshape(T * Bp, E_p)       # time-major

    args = [x]
    for lyr in packed["layers"]:
        args += [lyr["w_same"], lyr["w_cross"], lyr["gi_b"], lyr["b_hn"], lyr["w_hh"]]
    args += [packed["fc_w"], packed["fc_b"]]

    # VMEM budget: inputs + outputs + scratch, with 2x headroom, v7x-safe cap.
    scratch_bytes = T * Bp * (2 * NG * 4 + GW * 2)
    out_bytes = Bp * (Op + GW) * 4
    in_bytes = sum(int(a.size) * a.dtype.itemsize for a in args)
    vmem_bytes = int(min(max(2 * (in_bytes + scratch_bytes + out_bytes),
                             32 * 1024 * 1024), 64 * 1024 * 1024))

    kernel = functools.partial(
        gru_stack_kernel, n_layers=n_layers, T=T, Bp=Bp, GW=GW,
        unroll=min(8, T))

    out_pad, hid_pad = pl.pallas_call(
        kernel,
        out_shape=(jax.ShapeDtypeStruct((Bp, Op), jnp.float32),
                   jax.ShapeDtypeStruct((Bp, GW), jnp.float32)),
        in_specs=[_VMEM_SPEC] * len(args),
        out_specs=(_VMEM_SPEC, _VMEM_SPEC),
        scratch_shapes=[pltpu.VMEM((T * Bp, NG), jnp.float32),
                        pltpu.VMEM((T * Bp, NG), jnp.float32),
                        pltpu.VMEM((T * Bp, GW), jnp.bfloat16)],
        compiler_params=pltpu.CompilerParams(vmem_limit_bytes=vmem_bytes),
    )(*args)

    # hidden = cat(hidden[-2], hidden[-1]) = [fwd_final | bwd_final]
    hidden = hid_pad[:B, 0:2 * H]
    output = out_pad[:B, 0:O]
    return output, hidden


# -----------------------------------------------------------------------------
# Deterministic parameter initialization (matches nn.GRU / nn.Linear shapes)
# -----------------------------------------------------------------------------
def init_params(key, *, input_dim, embedding_dim, hidden_dim, output_dim,
                n_layers, bidirectional):
    assert bidirectional, "this synthetic setup uses bidirectional=True"
    k_emb, k_gru, k_fc = jax.random.split(key, 3)

    def uni(k, shape, bound):
        return jax.random.uniform(k, shape, jnp.float32, -bound, bound)

    params = {}
    params["embedding"] = jax.random.normal(
        k_emb, (input_dim, embedding_dim), jnp.float32)

    bound = 1.0 / jnp.sqrt(jnp.float32(hidden_dim))
    gru_layers = []
    kk = k_gru
    for layer in range(n_layers):
        d_in = embedding_dim if layer == 0 else 2 * hidden_dim
        layer_params = {}
        for dname in ("fwd", "bwd"):
            kk, k1, k2, k3, k4 = jax.random.split(kk, 5)
            w_ih = uni(k1, (d_in, 3 * hidden_dim), bound)      # stored transposed
            w_hh = uni(k2, (hidden_dim, 3 * hidden_dim), bound)
            b_ih = uni(k3, (3 * hidden_dim,), bound)
            b_hh = uni(k4, (3 * hidden_dim,), bound)
            layer_params[dname] = (w_ih, w_hh, b_ih, b_hh)
        gru_layers.append(layer_params)
    params["gru"] = gru_layers

    k_fc1, k_fc2 = jax.random.split(k_fc)
    fc_in = 2 * hidden_dim
    fb = 1.0 / jnp.sqrt(jnp.float32(fc_in))
    params["fc_w"] = uni(k_fc1, (fc_in, output_dim), fb)       # stored transposed
    params["fc_b"] = uni(k_fc2, (output_dim,), fb)
    return params


# -----------------------------------------------------------------------------
if __name__ == "__main__":
    INPUT_DIM = 50        # vocab size
    EMBEDDING_DIM = 32
    HIDDEN_DIM = 32
    OUTPUT_DIM = 4
    N_LAYERS = 2
    BIDIRECTIONAL = True
    BATCH = 2
    SEQ = 8

    key = jax.random.PRNGKey(0)
    k_params, k_text = jax.random.split(key)
    params = init_params(
        k_params,
        input_dim=INPUT_DIM, embedding_dim=EMBEDDING_DIM,
        hidden_dim=HIDDEN_DIM, output_dim=OUTPUT_DIM,
        n_layers=N_LAYERS, bidirectional=BIDIRECTIONAL,
    )
    text = jax.random.randint(k_text, (BATCH, SEQ), 0, INPUT_DIM, dtype=jnp.int32)

    # weight packing runs once, outside the forward path
    packed = pack_params(params, n_layers=N_LAYERS, hidden_dim=HIDDEN_DIM)

    fwd = jax.jit(functools.partial(
        gru_model_forward, n_layers=N_LAYERS, hidden_dim=HIDDEN_DIM,
        output_dim=OUTPUT_DIM))
    output, hidden = fwd(text, packed)
    jax.block_until_ready((output, hidden))

    assert output.shape == (BATCH, OUTPUT_DIM)
    assert hidden.shape == (BATCH, 2 * HIDDEN_DIM)
    print("KERNEL_OK")
</pallas_src>

<mosaic_0001>
module attributes {stable_mosaic.version = 11 : i64} {
  func.func @gru_stack_kernel(%arg0: memref<64x128xbf16, #tpu.memory_space<vmem>>, %arg1: memref<128x384xbf16, #tpu.memory_space<vmem>>, %arg2: memref<128x384xbf16, #tpu.memory_space<vmem>>, %arg3: memref<1x384xf32, #tpu.memory_space<vmem>>, %arg4: memref<1x128xf32, #tpu.memory_space<vmem>>, %arg5: memref<128x384xbf16, #tpu.memory_space<vmem>>, %arg6: memref<128x384xbf16, #tpu.memory_space<vmem>>, %arg7: memref<128x384xbf16, #tpu.memory_space<vmem>>, %arg8: memref<1x384xf32, #tpu.memory_space<vmem>>, %arg9: memref<1x128xf32, #tpu.memory_space<vmem>>, %arg10: memref<128x384xbf16, #tpu.memory_space<vmem>>, %arg11: memref<128x128xbf16, #tpu.memory_space<vmem>>, %arg12: memref<1x128xf32, #tpu.memory_space<vmem>>, %arg13: memref<8x128xf32, #tpu.memory_space<vmem>>, %arg14: memref<8x128xf32, #tpu.memory_space<vmem>>, %arg15: memref<64x384xf32, #tpu.memory_space<vmem>>, %arg16: memref<64x384xf32, #tpu.memory_space<vmem>>, %arg17: memref<64x128xbf16, #tpu.memory_space<vmem>>) attributes {dimension_semantics = [], scalar_prefetch = 0 : i64, scratch_operands = 3 : i64, tpu.core_type = #tpu.core_type<tc>} {
    %c0 = arith.constant 0 : index
    %c0_0 = arith.constant 0 : index
    %0 = vector.load %arg0[%c0, %c0_0] : memref<64x128xbf16, #tpu.memory_space<vmem>>, vector<64x128xbf16>
    %c0_1 = arith.constant 0 : index
    %c0_2 = arith.constant 0 : index
    %1 = vector.load %arg1[%c0_1, %c0_2] : memref<128x384xbf16, #tpu.memory_space<vmem>>, vector<128x384xbf16>
    %cst = arith.constant dense<0.000000e+00> : vector<64x384xf32>
    %2 = tpu.matmul %0, %1, %cst {dimension_numbers = #tpu.dot_dimension_numbers<[1], [0], [0], [1], [0, 0, 1, 1], [], []>} : vector<64x128xbf16>, vector<128x384xbf16>, vector<64x384xf32> -> vector<64x384xf32>
    %c0_3 = arith.constant 0 : index
    %c0_4 = arith.constant 0 : index
    %3 = vector.load %arg3[%c0_3, %c0_4] : memref<1x384xf32, #tpu.memory_space<vmem>>, vector<1x384xf32>
    %4 = vector.broadcast %3 : vector<1x384xf32> to vector<64x384xf32>
    %5 = arith.addf %2, %4 : vector<64x384xf32>
    %c0_5 = arith.constant 0 : index
    %c0_6 = arith.constant 0 : index
    %6 = vector.load %arg15[%c0_5, %c0_6] : memref<64x384xf32, #tpu.memory_space<vmem>>, vector<64x384xf32>
    tpu.vector_store %arg15[%c0_5, %c0_6], %5 {strides = array<i32>} : memref<64x384xf32, #tpu.memory_space<vmem>>, vector<64x384xf32>,
    %c0_7 = arith.constant 0 : index
    %c0_8 = arith.constant 0 : index
    %7 = vector.load %arg2[%c0_7, %c0_8] : memref<128x384xbf16, #tpu.memory_space<vmem>>, vector<128x384xbf16>
    %cst_9 = arith.constant dense<0.000000e+00> : vector<64x384xf32>
    %8 = tpu.matmul %0, %7, %cst_9 {dimension_numbers = #tpu.dot_dimension_numbers<[1], [0], [0], [1], [0, 0, 1, 1], [], []>} : vector<64x128xbf16>, vector<128x384xbf16>, vector<64x384xf32> -> vector<64x384xf32>
    %c0_10 = arith.constant 0 : index
    %c0_11 = arith.constant 0 : index
    %9 = vector.load %arg16[%c0_10, %c0_11] : memref<64x384xf32, #tpu.memory_space<vmem>>, vector<64x384xf32>
    tpu.vector_store %arg16[%c0_10, %c0_11], %8 {strides = array<i32>} : memref<64x384xf32, #tpu.memory_space<vmem>>, vector<64x384xf32>,
    %c0_12 = arith.constant 0 : index
    %c0_13 = arith.constant 0 : index
    %10 = vector.load %arg5[%c0_12, %c0_13] : memref<128x384xbf16, #tpu.memory_space<vmem>>, vector<128x384xbf16>
    %c0_14 = arith.constant 0 : index
    %c0_15 = arith.constant 0 : index
    %11 = vector.load %arg4[%c0_14, %c0_15] : memref<1x128xf32, #tpu.memory_space<vmem>>, vector<1x128xf32>
    %cst_16 = arith.constant 0.000000e+00 : bf16
    %12 = vector.broadcast %cst_16 : bf16 to vector<8x128xbf16>
    %c0_i32 = arith.constant 0 : i32
    %c8_i32 = arith.constant 8 : i32
    %13 = arith.muli %c0_i32, %c8_i32 : i32
    %14 = tpu.assume_multiple %13, 8 : i32
    %c7_i32 = arith.constant 7 : i32
    %15 = arith.subi %c7_i32, %c0_i32 : i32
    %c8_i32_17 = arith.constant 8 : i32
    %16 = arith.muli %15, %c8_i32_17 : i32
    %17 = tpu.assume_multiple %16, 8 : i32
    %18 = arith.index_cast %14 : i32 to index
    %c0_18 = arith.constant 0 : index
    %19 = vector.load %arg15[%18, %c0_18] : memref<64x384xf32, #tpu.memory_space<vmem>>, vector<8x384xf32>
    %20 = arith.index_cast %17 : i32 to index
    %c0_19 = arith.constant 0 : index
    %21 = vector.load %arg16[%20, %c0_19] : memref<64x384xf32, #tpu.memory_space<vmem>>, vector<8x384xf32>
    %22 = arith.addf %19, %21 : vector<8x384xf32>
    %cst_20 = arith.constant dense<0.000000e+00> : vector<8x384xf32>
    %23 = tpu.matmul %12, %10, %cst_20 {dimension_numbers = #tpu.dot_dimension_numbers<[1], [0], [0], [1], [0, 0, 1, 1], [], []>} : vector<8x128xbf16>, vector<128x384xbf16>, vector<8x384xf32> -> vector<8x384xf32>
    %24 = vector.extract_strided_slice %22 {offsets = [0, 0], sizes = [8, 128], strides = [1, 1]} : vector<8x384xf32> to vector<8x128xf32>
    %25 = vector.extract_strided_slice %23 {offsets = [0, 0], sizes = [8, 128], strides = [1, 1]} : vector<8x384xf32> to vector<8x128xf32>
    %26 = arith.addf %24, %25 : vector<8x128xf32>
    %27 = arith.negf %26 : vector<8x128xf32>
    %28 = math.exp %27 : vector<8x128xf32>
    %cst_21 = arith.constant 1.000000e+00 : f32
    %29 = vector.broadcast %cst_21 : f32 to vector<8x128xf32>
    %30 = arith.addf %29, %28 : vector<8x128xf32>
    %31 = arith.divf %29, %30 : vector<8x128xf32>
    %32 = vector.extract_strided_slice %22 {offsets = [0, 128], sizes = [8, 128], strides = [1, 1]} : vector<8x384xf32> to vector<8x128xf32>
    %33 = vector.extract_strided_slice %23 {offsets = [0, 128], sizes = [8, 128], strides = [1, 1]} : vector<8x384xf32> to vector<8x128xf32>
    %34 = arith.addf %32, %33 : vector<8x128xf32>
    %35 = arith.negf %34 : vector<8x128xf32>
    %36 = math.exp %35 : vector<8x128xf32>
    %cst_22 = arith.constant 1.000000e+00 : f32
    %37 = vector.broadcast %cst_22 : f32 to vector<8x128xf32>
    %38 = arith.addf %37, %36 : vector<8x128xf32>
    %39 = arith.divf %37, %38 : vector<8x128xf32>
    %40 = vector.extract_strided_slice %22 {offsets = [0, 256], sizes = [8, 128], strides = [1, 1]} : vector<8x384xf32> to vector<8x128xf32>
    %41 = vector.extract_strided_slice %23 {offsets = [0, 256], sizes = [8, 128], strides = [1, 1]} : vector<8x384xf32> to vector<8x128xf32>
    %42 = vector.broadcast %11 : vector<1x128xf32> to vector<8x128xf32>
    %43 = arith.addf %41, %42 : vector<8x128xf32>
    %44 = arith.mulf %31, %43 : vector<8x128xf32>
    %45 = arith.addf %40, %44 : vector<8x128xf32>
    %46 = math.tanh %45 : vector<8x128xf32>
    %cst_23 = arith.constant 1.000000e+00 : f32
    %47 = vector.broadcast %cst_23 : f32 to vector<8x128xf32>
    %48 = arith.subf %47, %39 : vector<8x128xf32>
    %49 = arith.mulf %48, %46 : vector<8x128xf32>
    %50 = arith.extf %12 : vector<8x128xbf16> to vector<8x128xf32>
    %51 = arith.mulf %39, %50 : vector<8x128xf32>
    %52 = arith.addf %49, %51 : vector<8x128xf32>
    %53 = arith.truncf %52 : vector<8x128xf32> to vector<8x128xbf16>
    %54 = arith.index_cast %14 : i32 to index
    %c0_24 = arith.constant 0 : index
    %55 = vector.load %arg17[%54, %c0_24] : memref<64x128xbf16, #tpu.memory_space<vmem>>, vector<8x128xbf16>
    tpu.vector_store %arg17[%54, %c0_24], %53 {strides = array<i32>} : memref<64x128xbf16, #tpu.memory_space<vmem>>, vector<8x128xbf16>,
    %c1_i32 = arith.constant 1 : i32
    %c8_i32_25 = arith.constant 8 : i32
    %56 = arith.muli %c1_i32, %c8_i32_25 : i32
    %57 = tpu.assume_multiple %56, 8 : i32
    %c7_i32_26 = arith.constant 7 : i32
    %58 = arith.subi %c7_i32_26, %c1_i32 : i32
    %c8_i32_27 = arith.constant 8 : i32
    %59 = arith.muli %58, %c8_i32_27 : i32
    %60 = tpu.assume_multiple %59, 8 : i32
    %61 = arith.index_cast %57 : i32 to index
    %c0_28 = arith.constant 0 : index
    %62 = vector.load %arg15[%61, %c0_28] : memref<64x384xf32, #tpu.memory_space<vmem>>, vector<8x384xf32>
    %63 = arith.index_cast %60 : i32 to index
    %c0_29 = arith.constant 0 : index
    %64 = vector.load %arg16[%63, %c0_29] : memref<64x384xf32, #tpu.memory_space<vmem>>, vector<8x384xf32>
    %65 = arith.addf %62, %64 : vector<8x384xf32>
    %cst_30 = arith.constant dense<0.000000e+00> : vector<8x384xf32>
    %66 = tpu.matmul %53, %10, %cst_30 {dimension_numbers = #tpu.dot_dimension_numbers<[1], [0], [0], [1], [0, 0, 1, 1], [], []>} : vector<8x128xbf16>, vector<128x384xbf16>, vector<8x384xf32> -> vector<8x384xf32>
    %67 = vector.extract_strided_slice %65 {offsets = [0, 0], sizes = [8, 128], strides = [1, 1]} : vector<8x384xf32> to vector<8x128xf32>
    %68 = vector.extract_strided_slice %66 {offsets = [0, 0], sizes = [8, 128], strides = [1, 1]} : vector<8x384xf32> to vector<8x128xf32>
    %69 = arith.addf %67, %68 : vector<8x128xf32>
    %70 = arith.negf %69 : vector<8x128xf32>
    %71 = math.exp %70 : vector<8x128xf32>
    %cst_31 = arith.constant 1.000000e+00 : f32
    %72 = vector.broadcast %cst_31 : f32 to vector<8x128xf32>
    %73 = arith.addf %72, %71 : vector<8x128xf32>
    %74 = arith.divf %72, %73 : vector<8x128xf32>
    %75 = vector.extract_strided_slice %65 {offsets = [0, 128], sizes = [8, 128], strides = [1, 1]} : vector<8x384xf32> to vector<8x128xf32>
    %76 = vector.extract_strided_slice %66 {offsets = [0, 128], sizes = [8, 128], strides = [1, 1]} : vector<8x384xf32> to vector<8x128xf32>
    %77 = arith.addf %75, %76 : vector<8x128xf32>
    %78 = arith.negf %77 : vector<8x128xf32>
    %79 = math.exp %78 : vector<8x128xf32>
    %cst_32 = arith.constant 1.000000e+00 : f32
    %80 = vector.broadcast %cst_32 : f32 to vector<8x128xf32>
    %81 = arith.addf %80, %79 : vector<8x128xf32>
    %82 = arith.divf %80, %81 : vector<8x128xf32>
    %83 = vector.extract_strided_slice %65 {offsets = [0, 256], sizes = [8, 128], strides = [1, 1]} : vector<8x384xf32> to vector<8x128xf32>
    %84 = vector.extract_strided_slice %66 {offsets = [0, 256], sizes = [8, 128], strides = [1, 1]} : vector<8x384xf32> to vector<8x128xf32>
    %85 = vector.broadcast %11 : vector<1x128xf32> to vector<8x128xf32>
    %86 = arith.addf %84, %85 : vector<8x128xf32>
    %87 = arith.mulf %74, %86 : vector<8x128xf32>
    %88 = arith.addf %83, %87 : vector<8x128xf32>
    %89 = math.tanh %88 : vector<8x128xf32>
    %cst_33 = arith.constant 1.000000e+00 : f32
    %90 = vector.broadcast %cst_33 : f32 to vector<8x128xf32>
    %91 = arith.subf %90, %82 : vector<8x128xf32>
    %92 = arith.mulf %91, %89 : vector<8x128xf32>
    %93 = arith.extf %53 : vector<8x128xbf16> to vector<8x128xf32>
    %94 = arith.mulf %82, %93 : vector<8x128xf32>
    %95 = arith.addf %92, %94 : vector<8x128xf32>
    %96 = arith.truncf %95 : vector<8x128xf32> to vector<8x128xbf16>
    %97 = arith.index_cast %57 : i32 to index
    %c0_34 = arith.constant 0 : index
    %98 = vector.load %arg17[%97, %c0_34] : memref<64x128xbf16, #tpu.memory_space<vmem>>, vector<8x128xbf16>
    tpu.vector_store %arg17[%97, %c0_34], %96 {strides = array<i32>} : memref<64x128xbf16, #tpu.memory_space<vmem>>, vector<8x128xbf16>,
    %c2_i32 = arith.constant 2 : i32
    %c8_i32_35 = arith.constant 8 : i32
    %99 = arith.muli %c2_i32, %c8_i32_35 : i32
    %100 = tpu.assume_multiple %99, 8 : i32
    %c7_i32_36 = arith.constant 7 : i32
    %101 = arith.subi %c7_i32_36, %c2_i32 : i32
    %c8_i32_37 = arith.constant 8 : i32
    %102 = arith.muli %101, %c8_i32_37 : i32
    %103 = tpu.assume_multiple %102, 8 : i32
    %104 = arith.index_cast %100 : i32 to index
    %c0_38 = arith.constant 0 : index
    %105 = vector.load %arg15[%104, %c0_38] : memref<64x384xf32, #tpu.memory_space<vmem>>, vector<8x384xf32>
    %106 = arith.index_cast %103 : i32 to index
    %c0_39 = arith.constant 0 : index
    %107 = vector.load %arg16[%106, %c0_39] : memref<64x384xf32, #tpu.memory_space<vmem>>, vector<8x384xf32>
    %108 = arith.addf %105, %107 : vector<8x384xf32>
    %cst_40 = arith.constant dense<0.000000e+00> : vector<8x384xf32>
    %109 = tpu.matmul %96, %10, %cst_40 {dimension_numbers = #tpu.dot_dimension_numbers<[1], [0], [0], [1], [0, 0, 1, 1], [], []>} : vector<8x128xbf16>, vector<128x384xbf16>, vector<8x384xf32> -> vector<8x384xf32>
    %110 = vector.extract_strided_slice %108 {offsets = [0, 0], sizes = [8, 128], strides = [1, 1]} : vector<8x384xf32> to vector<8x128xf32>
    %111 = vector.extract_strided_slice %109 {offsets = [0, 0], sizes = [8, 128], strides = [1, 1]} : vector<8x384xf32> to vector<8x128xf32>
    %112 = arith.addf %110, %111 : vector<8x128xf32>
    %113 = arith.negf %112 : vector<8x128xf32>
    %114 = math.exp %113 : vector<8x128xf32>
    %cst_41 = arith.constant 1.000000e+00 : f32
    %115 = vector.broadcast %cst_41 : f32 to vector<8x128xf32>
    %116 = arith.addf %115, %114 : vector<8x128xf32>
    %117 = arith.divf %115, %116 : vector<8x128xf32>
    %118 = vector.extract_strided_slice %108 {offsets = [0, 128], sizes = [8, 128], strides = [1, 1]} : vector<8x384xf32> to vector<8x128xf32>
    %119 = vector.extract_strided_slice %109 {offsets = [0, 128], sizes = [8, 128], strides = [1, 1]} : vector<8x384xf32> to vector<8x128xf32>
    %120 = arith.addf %118, %119 : vector<8x128xf32>
    %121 = arith.negf %120 : vector<8x128xf32>
    %122 = math.exp %121 : vector<8x128xf32>
    %cst_42 = arith.constant 1.000000e+00 : f32
    %123 = vector.broadcast %cst_42 : f32 to vector<8x128xf32>
    %124 = arith.addf %123, %122 : vector<8x128xf32>
    %125 = arith.divf %123, %124 : vector<8x128xf32>
    %126 = vector.extract_strided_slice %108 {offsets = [0, 256], sizes = [8, 128], strides = [1, 1]} : vector<8x384xf32> to vector<8x128xf32>
    %127 = vector.extract_strided_slice %109 {offsets = [0, 256], sizes = [8, 128], strides = [1, 1]} : vector<8x384xf32> to vector<8x128xf32>
    %128 = vector.broadcast %11 : vector<1x128xf32> to vector<8x128xf32>
    %129 = arith.addf %127, %128 : vector<8x128xf32>
    %130 = arith.mulf %117, %129 : vector<8x128xf32>
    %131 = arith.addf %126, %130 : vector<8x128xf32>
    %132 = math.tanh %131 : vector<8x128xf32>
    %cst_43 = arith.constant 1.000000e+00 : f32
    %133 = vector.broadcast %cst_43 : f32 to vector<8x128xf32>
    %134 = arith.subf %133, %125 : vector<8x128xf32>
    %135 = arith.mulf %134, %132 : vector<8x128xf32>
    %136 = arith.extf %96 : vector<8x128xbf16> to vector<8x128xf32>
    %137 = arith.mulf %125, %136 : vector<8x128xf32>
    %138 = arith.addf %135, %137 : vector<8x128xf32>
    %139 = arith.truncf %138 : vector<8x128xf32> to vector<8x128xbf16>
    %140 = arith.index_cast %100 : i32 to index
    %c0_44 = arith.constant 0 : index
    %141 = vector.load %arg17[%140, %c0_44] : memref<64x128xbf16, #tpu.memory_space<vmem>>, vector<8x128xbf16>
    tpu.vector_store %arg17[%140, %c0_44], %139 {strides = array<i32>} : memref<64x128xbf16, #tpu.memory_space<vmem>>, vector<8x128xbf16>,
    %c3_i32 = arith.constant 3 : i32
    %c8_i32_45 = arith.constant 8 : i32
    %142 = arith.muli %c3_i32, %c8_i32_45 : i32
    %143 = tpu.assume_multiple %142, 8 : i32
    %c7_i32_46 = arith.constant 7 : i32
    %144 = arith.subi %c7_i32_46, %c3_i32 : i32
    %c8_i32_47 = arith.constant 8 : i32
    %145 = arith.muli %144, %c8_i32_47 : i32
    %146 = tpu.assume_multiple %145, 8 : i32
    %147 = arith.index_cast %143 : i32 to index
    %c0_48 = arith.constant 0 : index
    %148 = vector.load %arg15[%147, %c0_48] : memref<64x384xf32, #tpu.memory_space<vmem>>, vector<8x384xf32>
    %149 = arith.index_cast %146 : i32 to index
    %c0_49 = arith.constant 0 : index
    %150 = vector.load %arg16[%149, %c0_49] : memref<64x384xf32, #tpu.memory_space<vmem>>, vector<8x384xf32>
    %151 = arith.addf %148, %150 : vector<8x384xf32>
    %cst_50 = arith.constant dense<0.000000e+00> : vector<8x384xf32>
    %152 = tpu.matmul %139, %10, %cst_50 {dimension_numbers = #tpu.dot_dimension_numbers<[1], [0], [0], [1], [0, 0, 1, 1], [], []>} : vector<8x128xbf16>, vector<128x384xbf16>, vector<8x384xf32> -> vector<8x384xf32>
    %153 = vector.extract_strided_slice %151 {offsets = [0, 0], sizes = [8, 128], strides = [1, 1]} : vector<8x384xf32> to vector<8x128xf32>
    %154 = vector.extract_strided_slice %152 {offsets = [0, 0], sizes = [8, 128], strides = [1, 1]} : vector<8x384xf32> to vector<8x128xf32>
    %155 = arith.addf %153, %154 : vector<8x128xf32>
    %156 = arith.negf %155 : vector<8x128xf32>
    %157 = math.exp %156 : vector<8x128xf32>
    %cst_51 = arith.constant 1.000000e+00 : f32
    %158 = vector.broadcast %cst_51 : f32 to vector<8x128xf32>
    %159 = arith.addf %158, %157 : vector<8x128xf32>
    %160 = arith.divf %158, %159 : vector<8x128xf32>
    %161 = vector.extract_strided_slice %151 {offsets = [0, 128], sizes = [8, 128], strides = [1, 1]} : vector<8x384xf32> to vector<8x128xf32>
    %162 = vector.extract_strided_slice %152 {offsets = [0, 128], sizes = [8, 128], strides = [1, 1]} : vector<8x384xf32> to vector<8x128xf32>
    %163 = arith.addf %161, %162 : vector<8x128xf32>
    %164 = arith.negf %163 : vector<8x128xf32>
    %165 = math.exp %164 : vector<8x128xf32>
    %cst_52 = arith.constant 1.000000e+00 : f32
    %166 = vector.broadcast %cst_52 : f32 to vector<8x128xf32>
    %167 = arith.addf %166, %165 : vector<8x128xf32>
    %168 = arith.divf %166, %167 : vector<8x128xf32>
    %169 = vector.extract_strided_slice %151 {offsets = [0, 256], sizes = [8, 128], strides = [1, 1]} : vector<8x384xf32> to vector<8x128xf32>
    %170 = vector.extract_strided_slice %152 {offsets = [0, 256], sizes = [8, 128], strides = [1, 1]} : vector<8x384xf32> to vector<8x128xf32>
    %171 = vector.broadcast %11 : vector<1x128xf32> to vector<8x128xf32>
    %172 = arith.addf %170, %171 : vector<8x128xf32>
    %173 = arith.mulf %160, %172 : vector<8x128xf32>
    %174 = arith.addf %169, %173 : vector<8x128xf32>
    %175 = math.tanh %174 : vector<8x128xf32>
    %cst_53 = arith.constant 1.000000e+00 : f32
    %176 = vector.broadcast %cst_53 : f32 to vector<8x128xf32>
    %177 = arith.subf %176, %168 : vector<8x128xf32>
    %178 = arith.mulf %177, %175 : vector<8x128xf32>
    %179 = arith.extf %139 : vector<8x128xbf16> to vector<8x128xf32>
    %180 = arith.mulf %168, %179 : vector<8x128xf32>
    %181 = arith.addf %178, %180 : vector<8x128xf32>
    %182 = arith.truncf %181 : vector<8x128xf32> to vector<8x128xbf16>
    %183 = arith.index_cast %143 : i32 to index
    %c0_54 = arith.constant 0 : index
    %184 = vector.load %arg17[%183, %c0_54] : memref<64x128xbf16, #tpu.memory_space<vmem>>, vector<8x128xbf16>
    tpu.vector_store %arg17[%183, %c0_54], %182 {strides = array<i32>} : memref<64x128xbf16, #tpu.memory_space<vmem>>, vector<8x128xbf16>,
    %c4_i32 = arith.constant 4 : i32
    %c8_i32_55 = arith.constant 8 : i32
    %185 = arith.muli %c4_i32, %c8_i32_55 : i32
    %186 = tpu.assume_multiple %185, 8 : i32
    %c7_i32_56 = arith.constant 7 : i32
    %187 = arith.subi %c7_i32_56, %c4_i32 : i32
    %c8_i32_57 = arith.constant 8 : i32
    %188 = arith.muli %187, %c8_i32_57 : i32
    %189 = tpu.assume_multiple %188, 8 : i32
    %190 = arith.index_cast %186 : i32 to index
    %c0_58 = arith.constant 0 : index
    %191 = vector.load %arg15[%190, %c0_58] : memref<64x384xf32, #tpu.memory_space<vmem>>, vector<8x384xf32>
    %192 = arith.index_cast %189 : i32 to index
    %c0_59 = arith.constant 0 : index
    %193 = vector.load %arg16[%192, %c0_59] : memref<64x384xf32, #tpu.memory_space<vmem>>, vector<8x384xf32>
    %194 = arith.addf %191, %193 : vector<8x384xf32>
    %cst_60 = arith.constant dense<0.000000e+00> : vector<8x384xf32>
    %195 = tpu.matmul %182, %10, %cst_60 {dimension_numbers = #tpu.dot_dimension_numbers<[1], [0], [0], [1], [0, 0, 1, 1], [], []>} : vector<8x128xbf16>, vector<128x384xbf16>, vector<8x384xf32> -> vector<8x384xf32>
    %196 = vector.extract_strided_slice %194 {offsets = [0, 0], sizes = [8, 128], strides = [1, 1]} : vector<8x384xf32> to vector<8x128xf32>
    %197 = vector.extract_strided_slice %195 {offsets = [0, 0], sizes = [8, 128], strides = [1, 1]} : vector<8x384xf32> to vector<8x128xf32>
    %198 = arith.addf %196, %197 : vector<8x128xf32>
    %199 = arith.negf %198 : vector<8x128xf32>
    %200 = math.exp %199 : vector<8x128xf32>
    %cst_61 = arith.constant 1.000000e+00 : f32
    %201 = vector.broadcast %cst_61 : f32 to vector<8x128xf32>
    %202 = arith.addf %201, %200 : vector<8x128xf32>
    %203 = arith.divf %201, %202 : vector<8x128xf32>
    %204 = vector.extract_strided_slice %194 {offsets = [0, 128], sizes = [8, 128], strides = [1, 1]} : vector<8x384xf32> to vector<8x128xf32>
    %205 = vector.extract_strided_slice %195 {offsets = [0, 128], sizes = [8, 128], strides = [1, 1]} : vector<8x384xf32> to vector<8x128xf32>
    %206 = arith.addf %204, %205 : vector<8x128xf32>
    %207 = arith.negf %206 : vector<8x128xf32>
    %208 = math.exp %207 : vector<8x128xf32>
    %cst_62 = arith.constant 1.000000e+00 : f32
    %209 = vector.broadcast %cst_62 : f32 to vector<8x128xf32>
    %210 = arith.addf %209, %208 : vector<8x128xf32>
    %211 = arith.divf %209, %210 : vector<8x128xf32>
    %212 = vector.extract_strided_slice %194 {offsets = [0, 256], sizes = [8, 128], strides = [1, 1]} : vector<8x384xf32> to vector<8x128xf32>
    %213 = vector.extract_strided_slice %195 {offsets = [0, 256], sizes = [8, 128], strides = [1, 1]} : vector<8x384xf32> to vector<8x128xf32>
    %214 = vector.broadcast %11 : vector<1x128xf32> to vector<8x128xf32>
    %215 = arith.addf %213, %214 : vector<8x128xf32>
    %216 = arith.mulf %203, %215 : vector<8x128xf32>
    %217 = arith.addf %212, %216 : vector<8x128xf32>
    %218 = math.tanh %217 : vector<8x128xf32>
    %cst_63 = arith.constant 1.000000e+00 : f32
    %219 = vector.broadcast %cst_63 : f32 to vector<8x128xf32>
    %220 = arith.subf %219, %211 : vector<8x128xf32>
    %221 = arith.mulf %220, %218 : vector<8x128xf32>
    %222 = arith.extf %182 : vector<8x128xbf16> to vector<8x128xf32>
    %223 = arith.mulf %211, %222 : vector<8x128xf32>
    %224 = arith.addf %221, %223 : vector<8x128xf32>
    %225 = arith.truncf %224 : vector<8x128xf32> to vector<8x128xbf16>
    %226 = arith.index_cast %186 : i32 to index
    %c0_64 = arith.constant 0 : index
    %227 = vector.load %arg17[%226, %c0_64] : memref<64x128xbf16, #tpu.memory_space<vmem>>, vector<8x128xbf16>
    tpu.vector_store %arg17[%226, %c0_64], %225 {strides = array<i32>} : memref<64x128xbf16, #tpu.memory_space<vmem>>, vector<8x128xbf16>,
    %c5_i32 = arith.constant 5 : i32
    %c8_i32_65 = arith.constant 8 : i32
    %228 = arith.muli %c5_i32, %c8_i32_65 : i32
    %229 = tpu.assume_multiple %228, 8 : i32
    %c7_i32_66 = arith.constant 7 : i32
    %230 = arith.subi %c7_i32_66, %c5_i32 : i32
    %c8_i32_67 = arith.constant 8 : i32
    %231 = arith.muli %230, %c8_i32_67 : i32
    %232 = tpu.assume_multiple %231, 8 : i32
    %233 = arith.index_cast %229 : i32 to index
    %c0_68 = arith.constant 0 : index
    %234 = vector.load %arg15[%233, %c0_68] : memref<64x384xf32, #tpu.memory_space<vmem>>, vector<8x384xf32>
    %235 = arith.index_cast %232 : i32 to index
    %c0_69 = arith.constant 0 : index
    %236 = vector.load %arg16[%235, %c0_69] : memref<64x384xf32, #tpu.memory_space<vmem>>, vector<8x384xf32>
    %237 = arith.addf %234, %236 : vector<8x384xf32>
    %cst_70 = arith.constant dense<0.000000e+00> : vector<8x384xf32>
    %238 = tpu.matmul %225, %10, %cst_70 {dimension_numbers = #tpu.dot_dimension_numbers<[1], [0], [0], [1], [0, 0, 1, 1], [], []>} : vector<8x128xbf16>, vector<128x384xbf16>, vector<8x384xf32> -> vector<8x384xf32>
    %239 = vector.extract_strided_slice %237 {offsets = [0, 0], sizes = [8, 128], strides = [1, 1]} : vector<8x384xf32> to vector<8x128xf32>
    %240 = vector.extract_strided_slice %238 {offsets = [0, 0], sizes = [8, 128], strides = [1, 1]} : vector<8x384xf32> to vector<8x128xf32>
    %241 = arith.addf %239, %240 : vector<8x128xf32>
    %242 = arith.negf %241 : vector<8x128xf32>
    %243 = math.exp %242 : vector<8x128xf32>
    %cst_71 = arith.constant 1.000000e+00 : f32
    %244 = vector.broadcast %cst_71 : f32 to vector<8x128xf32>
    %245 = arith.addf %244, %243 : vector<8x128xf32>
    %246 = arith.divf %244, %245 : vector<8x128xf32>
    %247 = vector.extract_strided_slice %237 {offsets = [0, 128], sizes = [8, 128], strides = [1, 1]} : vector<8x384xf32> to vector<8x128xf32>
    %248 = vector.extract_strided_slice %238 {offsets = [0, 128], sizes = [8, 128], strides = [1, 1]} : vector<8x384xf32> to vector<8x128xf32>
    %249 = arith.addf %247, %248 : vector<8x128xf32>
    %250 = arith.negf %249 : vector<8x128xf32>
    %251 = math.exp %250 : vector<8x128xf32>
    %cst_72 = arith.constant 1.000000e+00 : f32
    %252 = vector.broadcast %cst_72 : f32 to vector<8x128xf32>
    %253 = arith.addf %252, %251 : vector<8x128xf32>
    %254 = arith.divf %252, %253 : vector<8x128xf32>
    %255 = vector.extract_strided_slice %237 {offsets = [0, 256], sizes = [8, 128], strides = [1, 1]} : vector<8x384xf32> to vector<8x128xf32>
    %256 = vector.extract_strided_slice %238 {offsets = [0, 256], sizes = [8, 128], strides = [1, 1]} : vector<8x384xf32> to vector<8x128xf32>
    %257 = vector.broadcast %11 : vector<1x128xf32> to vector<8x128xf32>
    %258 = arith.addf %256, %257 : vector<8x128xf32>
    %259 = arith.mulf %246, %258 : vector<8x128xf32>
    %260 = arith.addf %255, %259 : vector<8x128xf32>
    %261 = math.tanh %260 : vector<8x128xf32>
    %cst_73 = arith.constant 1.000000e+00 : f32
    %262 = vector.broadcast %cst_73 : f32 to vector<8x128xf32>
    %263 = arith.subf %262, %254 : vector<8x128xf32>
    %264 = arith.mulf %263, %261 : vector<8x128xf32>
    %265 = arith.extf %225 : vector<8x128xbf16> to vector<8x128xf32>
    %266 = arith.mulf %254, %265 : vector<8x128xf32>
    %267 = arith.addf %264, %266 : vector<8x128xf32>
    %268 = arith.truncf %267 : vector<8x128xf32> to vector<8x128xbf16>
    %269 = arith.index_cast %229 : i32 to index
    %c0_74 = arith.constant 0 : index
    %270 = vector.load %arg17[%269, %c0_74] : memref<64x128xbf16, #tpu.memory_space<vmem>>, vector<8x128xbf16>
    tpu.vector_store %arg17[%269, %c0_74], %268 {strides = array<i32>} : memref<64x128xbf16, #tpu.memory_space<vmem>>, vector<8x128xbf16>,
    %c6_i32 = arith.constant 6 : i32
    %c8_i32_75 = arith.constant 8 : i32
    %271 = arith.muli %c6_i32, %c8_i32_75 : i32
    %272 = tpu.assume_multiple %271, 8 : i32
    %c7_i32_76 = arith.constant 7 : i32
    %273 = arith.subi %c7_i32_76, %c6_i32 : i32
    %c8_i32_77 = arith.constant 8 : i32
    %274 = arith.muli %273, %c8_i32_77 : i32
    %275 = tpu.assume_multiple %274, 8 : i32
    %276 = arith.index_cast %272 : i32 to index
    %c0_78 = arith.constant 0 : index
    %277 = vector.load %arg15[%276, %c0_78] : memref<64x384xf32, #tpu.memory_space<vmem>>, vector<8x384xf32>
    %278 = arith.index_cast %275 : i32 to index
    %c0_79 = arith.constant 0 : index
    %279 = vector.load %arg16[%278, %c0_79] : memref<64x384xf32, #tpu.memory_space<vmem>>, vector<8x384xf32>
    %280 = arith.addf %277, %279 : vector<8x384xf32>
    %cst_80 = arith.constant dense<0.000000e+00> : vector<8x384xf32>
    %281 = tpu.matmul %268, %10, %cst_80 {dimension_numbers = #tpu.dot_dimension_numbers<[1], [0], [0], [1], [0, 0, 1, 1], [], []>} : vector<8x128xbf16>, vector<128x384xbf16>, vector<8x384xf32> -> vector<8x384xf32>
    %282 = vector.extract_strided_slice %280 {offsets = [0, 0], sizes = [8, 128], strides = [1, 1]} : vector<8x384xf32> to vector<8x128xf32>
    %283 = vector.extract_strided_slice %281 {offsets = [0, 0], sizes = [8, 128], strides = [1, 1]} : vector<8x384xf32> to vector<8x128xf32>
    %284 = arith.addf %282, %283 : vector<8x128xf32>
    %285 = arith.negf %284 : vector<8x128xf32>
    %286 = math.exp %285 : vector<8x128xf32>
    %cst_81 = arith.constant 1.000000e+00 : f32
    %287 = vector.broadcast %cst_81 : f32 to vector<8x128xf32>
    %288 = arith.addf %287, %286 : vector<8x128xf32>
    %289 = arith.divf %287, %288 : vector<8x128xf32>
    %290 = vector.extract_strided_slice %280 {offsets = [0, 128], sizes = [8, 128], strides = [1, 1]} : vector<8x384xf32> to vector<8x128xf32>
    %291 = vector.extract_strided_slice %281 {offsets = [0, 128], sizes = [8, 128], strides = [1, 1]} : vector<8x384xf32> to vector<8x128xf32>
    %292 = arith.addf %290, %291 : vector<8x128xf32>
    %293 = arith.negf %292 : vector<8x128xf32>
    %294 = math.exp %293 : vector<8x128xf32>
    %cst_82 = arith.constant 1.000000e+00 : f32
    %295 = vector.broadcast %cst_82 : f32 to vector<8x128xf32>
    %296 = arith.addf %295, %294 : vector<8x128xf32>
    %297 = arith.divf %295, %296 : vector<8x128xf32>
    %298 = vector.extract_strided_slice %280 {offsets = [0, 256], sizes = [8, 128], strides = [1, 1]} : vector<8x384xf32> to vector<8x128xf32>
    %299 = vector.extract_strided_slice %281 {offsets = [0, 256], sizes = [8, 128], strides = [1, 1]} : vector<8x384xf32> to vector<8x128xf32>
    %300 = vector.broadcast %11 : vector<1x128xf32> to vector<8x128xf32>
    %301 = arith.addf %299, %300 : vector<8x128xf32>
    %302 = arith.mulf %289, %301 : vector<8x128xf32>
    %303 = arith.addf %298, %302 : vector<8x128xf32>
    %304 = math.tanh %303 : vector<8x128xf32>
    %cst_83 = arith.constant 1.000000e+00 : f32
    %305 = vector.broadcast %cst_83 : f32 to vector<8x128xf32>
    %306 = arith.subf %305, %297 : vector<8x128xf32>
    %307 = arith.mulf %306, %304 : vector<8x128xf32>
    %308 = arith.extf %268 : vector<8x128xbf16> to vector<8x128xf32>
    %309 = arith.mulf %297, %308 : vector<8x128xf32>
    %310 = arith.addf %307, %309 : vector<8x128xf32>
    %311 = arith.truncf %310 : vector<8x128xf32> to vector<8x128xbf16>
    %312 = arith.index_cast %272 : i32 to index
    %c0_84 = arith.constant 0 : index
    %313 = vector.load %arg17[%312, %c0_84] : memref<64x128xbf16, #tpu.memory_space<vmem>>, vector<8x128xbf16>
    tpu.vector_store %arg17[%312, %c0_84], %311 {strides = array<i32>} : memref<64x128xbf16, #tpu.memory_space<vmem>>, vector<8x128xbf16>,
    %c7_i32_85 = arith.constant 7 : i32
    %c8_i32_86 = arith.constant 8 : i32
    %314 = arith.muli %c7_i32_85, %c8_i32_86 : i32
    %315 = tpu.assume_multiple %314, 8 : i32
    %c7_i32_87 = arith.constant 7 : i32
    %316 = arith.subi %c7_i32_87, %c7_i32_85 : i32
    %c8_i32_88 = arith.constant 8 : i32
    %317 = arith.muli %316, %c8_i32_88 : i32
    %318 = tpu.assume_multiple %317, 8 : i32
    %319 = arith.index_cast %315 : i32 to index
    %c0_89 = arith.constant 0 : index
    %320 = vector.load %arg15[%319, %c0_89] : memref<64x384xf32, #tpu.memory_space<vmem>>, vector<8x384xf32>
    %321 = arith.index_cast %318 : i32 to index
    %c0_90 = arith.constant 0 : index
    %322 = vector.load %arg16[%321, %c0_90] : memref<64x384xf32, #tpu.memory_space<vmem>>, vector<8x384xf32>
    %323 = arith.addf %320, %322 : vector<8x384xf32>
    %cst_91 = arith.constant dense<0.000000e+00> : vector<8x384xf32>
    %324 = tpu.matmul %311, %10, %cst_91 {dimension_numbers = #tpu.dot_dimension_numbers<[1], [0], [0], [1], [0, 0, 1, 1], [], []>} : vector<8x128xbf16>, vector<128x384xbf16>, vector<8x384xf32> -> vector<8x384xf32>
    %325 = vector.extract_strided_slice %323 {offsets = [0, 0], sizes = [8, 128], strides = [1, 1]} : vector<8x384xf32> to vector<8x128xf32>
    %326 = vector.extract_strided_slice %324 {offsets = [0, 0], sizes = [8, 128], strides = [1, 1]} : vector<8x384xf32> to vector<8x128xf32>
    %327 = arith.addf %325, %326 : vector<8x128xf32>
    %328 = arith.negf %327 : vector<8x128xf32>
    %329 = math.exp %328 : vector<8x128xf32>
    %cst_92 = arith.constant 1.000000e+00 : f32
    %330 = vector.broadcast %cst_92 : f32 to vector<8x128xf32>
    %331 = arith.addf %330, %329 : vector<8x128xf32>
    %332 = arith.divf %330, %331 : vector<8x128xf32>
    %333 = vector.extract_strided_slice %323 {offsets = [0, 128], sizes = [8, 128], strides = [1, 1]} : vector<8x384xf32> to vector<8x128xf32>
    %334 = vector.extract_strided_slice %324 {offsets = [0, 128], sizes = [8, 128], strides = [1, 1]} : vector<8x384xf32> to vector<8x128xf32>
    %335 = arith.addf %333, %334 : vector<8x128xf32>
    %336 = arith.negf %335 : vector<8x128xf32>
    %337 = math.exp %336 : vector<8x128xf32>
    %cst_93 = arith.constant 1.000000e+00 : f32
    %338 = vector.broadcast %cst_93 : f32 to vector<8x128xf32>
    %339 = arith.addf %338, %337 : vector<8x128xf32>
    %340 = arith.divf %338, %339 : vector<8x128xf32>
    %341 = vector.extract_strided_slice %323 {offsets = [0, 256], sizes = [8, 128], strides = [1, 1]} : vector<8x384xf32> to vector<8x128xf32>
    %342 = vector.extract_strided_slice %324 {offsets = [0, 256], sizes = [8, 128], strides = [1, 1]} : vector<8x384xf32> to vector<8x128xf32>
    %343 = vector.broadcast %11 : vector<1x128xf32> to vector<8x128xf32>
    %344 = arith.addf %342, %343 : vector<8x128xf32>
    %345 = arith.mulf %332, %344 : vector<8x128xf32>
    %346 = arith.addf %341, %345 : vector<8x128xf32>
    %347 = math.tanh %346 : vector<8x128xf32>
    %cst_94 = arith.constant 1.000000e+00 : f32
    %348 = vector.broadcast %cst_94 : f32 to vector<8x128xf32>
    %349 = arith.subf %348, %340 : vector<8x128xf32>
    %350 = arith.mulf %349, %347 : vector<8x128xf32>
    %351 = arith.extf %311 : vector<8x128xbf16> to vector<8x128xf32>
    %352 = arith.mulf %340, %351 : vector<8x128xf32>
    %353 = arith.addf %350, %352 : vector<8x128xf32>
    %354 = arith.truncf %353 : vector<8x128xf32> to vector<8x128xbf16>
    %355 = arith.index_cast %315 : i32 to index
    %c0_95 = arith.constant 0 : index
    %356 = vector.load %arg17[%355, %c0_95] : memref<64x128xbf16, #tpu.memory_space<vmem>>, vector<8x128xbf16>
    tpu.vector_store %arg17[%355, %c0_95], %354 {strides = array<i32>} : memref<64x128xbf16, #tpu.memory_space<vmem>>, vector<8x128xbf16>,
    %c8_i32_96 = arith.constant 8 : i32
    %c0_97 = arith.constant 0 : index
    %c0_98 = arith.constant 0 : index
    %357 = vector.load %arg17[%c0_97, %c0_98] : memref<64x128xbf16, #tpu.memory_space<vmem>>, vector<64x128xbf16>
    %c0_99 = arith.constant 0 : index
    %c0_100 = arith.constant 0 : index
    %358 = vector.load %arg6[%c0_99, %c0_100] : memref<128x384xbf16, #tpu.memory_space<vmem>>, vector<128x384xbf16>
    %cst_101 = arith.constant dense<0.000000e+00> : vector<64x384xf32>
    %359 = tpu.matmul %357, %358, %cst_101 {dimension_numbers = #tpu.dot_dimension_numbers<[1], [0], [0], [1], [0, 0, 1, 1], [], []>} : vector<64x128xbf16>, vector<128x384xbf16>, vector<64x384xf32> -> vector<64x384xf32>
    %c0_102 = arith.constant 0 : index
    %c0_103 = arith.constant 0 : index
    %360 = vector.load %arg8[%c0_102, %c0_103] : memref<1x384xf32, #tpu.memory_space<vmem>>, vector<1x384xf32>
    %361 = vector.broadcast %360 : vector<1x384xf32> to vector<64x384xf32>
    %362 = arith.addf %359, %361 : vector<64x384xf32>
    %c0_104 = arith.constant 0 : index
    %c0_105 = arith.constant 0 : index
    %363 = vector.load %arg15[%c0_104, %c0_105] : memref<64x384xf32, #tpu.memory_space<vmem>>, vector<64x384xf32>
    tpu.vector_store %arg15[%c0_104, %c0_105], %362 {strides = array<i32>} : memref<64x384xf32, #tpu.memory_space<vmem>>, vector<64x384xf32>,
    %c0_106 = arith.constant 0 : index
    %c0_107 = arith.constant 0 : index
    %364 = vector.load %arg7[%c0_106, %c0_107] : memref<128x384xbf16, #tpu.memory_space<vmem>>, vector<128x384xbf16>
    %cst_108 = arith.constant dense<0.000000e+00> : vector<64x384xf32>
    %365 = tpu.matmul %357, %364, %cst_108 {dimension_numbers = #tpu.dot_dimension_numbers<[1], [0], [0], [1], [0, 0, 1, 1], [], []>} : vector<64x128xbf16>, vector<128x384xbf16>, vector<64x384xf32> -> vector<64x384xf32>
    %c0_109 = arith.constant 0 : index
    %c0_110 = arith.constant 0 : index
    %366 = vector.load %arg16[%c0_109, %c0_110] : memref<64x384xf32, #tpu.memory_space<vmem>>, vector<64x384xf32>
    tpu.vector_store %arg16[%c0_109, %c0_110], %365 {strides = array<i32>} : memref<64x384xf32, #tpu.memory_space<vmem>>, vector<64x384xf32>,
    %c0_111 = arith.constant 0 : index
    %c0_112 = arith.constant 0 : index
    %367 = vector.load %arg10[%c0_111, %c0_112] : memref<128x384xbf16, #tpu.memory_space<vmem>>, vector<128x384xbf16>
    %c0_113 = arith.constant 0 : index
    %c0_114 = arith.constant 0 : index
    %368 = vector.load %arg9[%c0_113, %c0_114] : memref<1x128xf32, #tpu.memory_space<vmem>>, vector<1x128xf32>
    %cst_115 = arith.constant 0.000000e+00 : bf16
    %369 = vector.broadcast %cst_115 : bf16 to vector<8x128xbf16>
    %c0_i32_116 = arith.constant 0 : i32
    %c8_i32_117 = arith.constant 8 : i32
    %370 = arith.muli %c0_i32_116, %c8_i32_117 : i32
    %371 = tpu.assume_multiple %370, 8 : i32
    %c7_i32_118 = arith.constant 7 : i32
    %372 = arith.subi %c7_i32_118, %c0_i32_116 : i32
    %c8_i32_119 = arith.constant 8 : i32
    %373 = arith.muli %372, %c8_i32_119 : i32
    %374 = tpu.assume_multiple %373, 8 : i32
    %375 = arith.index_cast %371 : i32 to index
    %c0_120 = arith.constant 0 : index
    %376 = vector.load %arg15[%375, %c0_120] : memref<64x384xf32, #tpu.memory_space<vmem>>, vector<8x384xf32>
    %377 = arith.index_cast %374 : i32 to index
    %c0_121 = arith.constant 0 : index
    %378 = vector.load %arg16[%377, %c0_121] : memref<64x384xf32, #tpu.memory_space<vmem>>, vector<8x384xf32>
    %379 = arith.addf %376, %378 : vector<8x384xf32>
    %cst_122 = arith.constant dense<0.000000e+00> : vector<8x384xf32>
    %380 = tpu.matmul %369, %367, %cst_122 {dimension_numbers = #tpu.dot_dimension_numbers<[1], [0], [0], [1], [0, 0, 1, 1], [], []>} : vector<8x128xbf16>, vector<128x384xbf16>, vector<8x384xf32> -> vector<8x384xf32>
    %381 = vector.extract_strided_slice %379 {offsets = [0, 0], sizes = [8, 128], strides = [1, 1]} : vector<8x384xf32> to vector<8x128xf32>
    %382 = vector.extract_strided_slice %380 {offsets = [0, 0], sizes = [8, 128], strides = [1, 1]} : vector<8x384xf32> to vector<8x128xf32>
    %383 = arith.addf %381, %382 : vector<8x128xf32>
    %384 = arith.negf %383 : vector<8x128xf32>
    %385 = math.exp %384 : vector<8x128xf32>
    %cst_123 = arith.constant 1.000000e+00 : f32
    %386 = vector.broadcast %cst_123 : f32 to vector<8x128xf32>
    %387 = arith.addf %386, %385 : vector<8x128xf32>
    %388 = arith.divf %386, %387 : vector<8x128xf32>
    %389 = vector.extract_strided_slice %379 {offsets = [0, 128], sizes = [8, 128], strides = [1, 1]} : vector<8x384xf32> to vector<8x128xf32>
    %390 = vector.extract_strided_slice %380 {offsets = [0, 128], sizes = [8, 128], strides = [1, 1]} : vector<8x384xf32> to vector<8x128xf32>
    %391 = arith.addf %389, %390 : vector<8x128xf32>
    %392 = arith.negf %391 : vector<8x128xf32>
    %393 = math.exp %392 : vector<8x128xf32>
    %cst_124 = arith.constant 1.000000e+00 : f32
    %394 = vector.broadcast %cst_124 : f32 to vector<8x128xf32>
    %395 = arith.addf %394, %393 : vector<8x128xf32>
    %396 = arith.divf %394, %395 : vector<8x128xf32>
    %397 = vector.extract_strided_slice %379 {offsets = [0, 256], sizes = [8, 128], strides = [1, 1]} : vector<8x384xf32> to vector<8x128xf32>
    %398 = vector.extract_strided_slice %380 {offsets = [0, 256], sizes = [8, 128], strides = [1, 1]} : vector<8x384xf32> to vector<8x128xf32>
    %399 = vector.broadcast %368 : vector<1x128xf32> to vector<8x128xf32>
    %400 = arith.addf %398, %399 : vector<8x128xf32>
    %401 = arith.mulf %388, %400 : vector<8x128xf32>
    %402 = arith.addf %397, %401 : vector<8x128xf32>
    %403 = math.tanh %402 : vector<8x128xf32>
    %cst_125 = arith.constant 1.000000e+00 : f32
    %404 = vector.broadcast %cst_125 : f32 to vector<8x128xf32>
    %405 = arith.subf %404, %396 : vector<8x128xf32>
    %406 = arith.mulf %405, %403 : vector<8x128xf32>
    %407 = arith.extf %369 : vector<8x128xbf16> to vector<8x128xf32>
    %408 = arith.mulf %396, %407 : vector<8x128xf32>
    %409 = arith.addf %406, %408 : vector<8x128xf32>
    %410 = arith.truncf %409 : vector<8x128xf32> to vector<8x128xbf16>
    %c1_i32_126 = arith.constant 1 : i32
    %c8_i32_127 = arith.constant 8 : i32
    %411 = arith.muli %c1_i32_126, %c8_i32_127 : i32
    %412 = tpu.assume_multiple %411, 8 : i32
    %c7_i32_128 = arith.constant 7 : i32
    %413 = arith.subi %c7_i32_128, %c1_i32_126 : i32
    %c8_i32_129 = arith.constant 8 : i32
    %414 = arith.muli %413, %c8_i32_129 : i32
    %415 = tpu.assume_multiple %414, 8 : i32
    %416 = arith.index_cast %412 : i32 to index
    %c0_130 = arith.constant 0 : index
    %417 = vector.load %arg15[%416, %c0_130] : memref<64x384xf32, #tpu.memory_space<vmem>>, vector<8x384xf32>
    %418 = arith.index_cast %415 : i32 to index
    %c0_131 = arith.constant 0 : index
    %419 = vector.load %arg16[%418, %c0_131] : memref<64x384xf32, #tpu.memory_space<vmem>>, vector<8x384xf32>
    %420 = arith.addf %417, %419 : vector<8x384xf32>
    %cst_132 = arith.constant dense<0.000000e+00> : vector<8x384xf32>
    %421 = tpu.matmul %410, %367, %cst_132 {dimension_numbers = #tpu.dot_dimension_numbers<[1], [0], [0], [1], [0, 0, 1, 1], [], []>} : vector<8x128xbf16>, vector<128x384xbf16>, vector<8x384xf32> -> vector<8x384xf32>
    %422 = vector.extract_strided_slice %420 {offsets = [0, 0], sizes = [8, 128], strides = [1, 1]} : vector<8x384xf32> to vector<8x128xf32>
    %423 = vector.extract_strided_slice %421 {offsets = [0, 0], sizes = [8, 128], strides = [1, 1]} : vector<8x384xf32> to vector<8x128xf32>
    %424 = arith.addf %422, %423 : vector<8x128xf32>
    %425 = arith.negf %424 : vector<8x128xf32>
    %426 = math.exp %425 : vector<8x128xf32>
    %cst_133 = arith.constant 1.000000e+00 : f32
    %427 = vector.broadcast %cst_133 : f32 to vector<8x128xf32>
    %428 = arith.addf %427, %426 : vector<8x128xf32>
    %429 = arith.divf %427, %428 : vector<8x128xf32>
    %430 = vector.extract_strided_slice %420 {offsets = [0, 128], sizes = [8, 128], strides = [1, 1]} : vector<8x384xf32> to vector<8x128xf32>
    %431 = vector.extract_strided_slice %421 {offsets = [0, 128], sizes = [8, 128], strides = [1, 1]} : vector<8x384xf32> to vector<8x128xf32>
    %432 = arith.addf %430, %431 : vector<8x128xf32>
    %433 = arith.negf %432 : vector<8x128xf32>
    %434 = math.exp %433 : vector<8x128xf32>
    %cst_134 = arith.constant 1.000000e+00 : f32
    %435 = vector.broadcast %cst_134 : f32 to vector<8x128xf32>
    %436 = arith.addf %435, %434 : vector<8x128xf32>
    %437 = arith.divf %435, %436 : vector<8x128xf32>
    %438 = vector.extract_strided_slice %420 {offsets = [0, 256], sizes = [8, 128], strides = [1, 1]} : vector<8x384xf32> to vector<8x128xf32>
    %439 = vector.extract_strided_slice %421 {offsets = [0, 256], sizes = [8, 128], strides = [1, 1]} : vector<8x384xf32> to vector<8x128xf32>
    %440 = vector.broadcast %368 : vector<1x128xf32> to vector<8x128xf32>
    %441 = arith.addf %439, %440 : vector<8x128xf32>
    %442 = arith.mulf %429, %441 : vector<8x128xf32>
    %443 = arith.addf %438, %442 : vector<8x128xf32>
    %444 = math.tanh %443 : vector<8x128xf32>
    %cst_135 = arith.constant 1.000000e+00 : f32
    %445 = vector.broadcast %cst_135 : f32 to vector<8x128xf32>
    %446 = arith.subf %445, %437 : vector<8x128xf32>
    %447 = arith.mulf %446, %444 : vector<8x128xf32>
    %448 = arith.extf %410 : vector<8x128xbf16> to vector<8x128xf32>
    %449 = arith.mulf %437, %448 : vector<8x128xf32>
    %450 = arith.addf %447, %449 : vector<8x128xf32>
    %451 = arith.truncf %450 : vector<8x128xf32> to vector<8x128xbf16>
    %c2_i32_136 = arith.constant 2 : i32
    %c8_i32_137 = arith.constant 8 : i32
    %452 = arith.muli %c2_i32_136, %c8_i32_137 : i32
    %453 = tpu.assume_multiple %452, 8 : i32
    %c7_i32_138 = arith.constant 7 : i32
    %454 = arith.subi %c7_i32_138, %c2_i32_136 : i32
    %c8_i32_139 = arith.constant 8 : i32
    %455 = arith.muli %454, %c8_i32_139 : i32
    %456 = tpu.assume_multiple %455, 8 : i32
    %457 = arith.index_cast %453 : i32 to index
    %c0_140 = arith.constant 0 : index
    %458 = vector.load %arg15[%457, %c0_140] : memref<64x384xf32, #tpu.memory_space<vmem>>, vector<8x384xf32>
    %459 = arith.index_cast %456 : i32 to index
    %c0_141 = arith.constant 0 : index
    %460 = vector.load %arg16[%459, %c0_141] : memref<64x384xf32, #tpu.memory_space<vmem>>, vector<8x384xf32>
    %461 = arith.addf %458, %460 : vector<8x384xf32>
    %cst_142 = arith.constant dense<0.000000e+00> : vector<8x384xf32>
    %462 = tpu.matmul %451, %367, %cst_142 {dimension_numbers = #tpu.dot_dimension_numbers<[1], [0], [0], [1], [0, 0, 1, 1], [], []>} : vector<8x128xbf16>, vector<128x384xbf16>, vector<8x384xf32> -> vector<8x384xf32>
    %463 = vector.extract_strided_slice %461 {offsets = [0, 0], sizes = [8, 128], strides = [1, 1]} : vector<8x384xf32> to vector<8x128xf32>
    %464 = vector.extract_strided_slice %462 {offsets = [0, 0], sizes = [8, 128], strides = [1, 1]} : vector<8x384xf32> to vector<8x128xf32>
    %465 = arith.addf %463, %464 : vector<8x128xf32>
    %466 = arith.negf %465 : vector<8x128xf32>
    %467 = math.exp %466 : vector<8x128xf32>
    %cst_143 = arith.constant 1.000000e+00 : f32
    %468 = vector.broadcast %cst_143 : f32 to vector<8x128xf32>
    %469 = arith.addf %468, %467 : vector<8x128xf32>
    %470 = arith.divf %468, %469 : vector<8x128xf32>
    %471 = vector.extract_strided_slice %461 {offsets = [0, 128], sizes = [8, 128], strides = [1, 1]} : vector<8x384xf32> to vector<8x128xf32>
    %472 = vector.extract_strided_slice %462 {offsets = [0, 128], sizes = [8, 128], strides = [1, 1]} : vector<8x384xf32> to vector<8x128xf32>
    %473 = arith.addf %471, %472 : vector<8x128xf32>
    %474 = arith.negf %473 : vector<8x128xf32>
    %475 = math.exp %474 : vector<8x128xf32>
    %cst_144 = arith.constant 1.000000e+00 : f32
    %476 = vector.broadcast %cst_144 : f32 to vector<8x128xf32>
    %477 = arith.addf %476, %475 : vector<8x128xf32>
    %478 = arith.divf %476, %477 : vector<8x128xf32>
    %479 = vector.extract_strided_slice %461 {offsets = [0, 256], sizes = [8, 128], strides = [1, 1]} : vector<8x384xf32> to vector<8x128xf32>
    %480 = vector.extract_strided_slice %462 {offsets = [0, 256], sizes = [8, 128], strides = [1, 1]} : vector<8x384xf32> to vector<8x128xf32>
    %481 = vector.broadcast %368 : vector<1x128xf32> to vector<8x128xf32>
    %482 = arith.addf %480, %481 : vector<8x128xf32>
    %483 = arith.mulf %470, %482 : vector<8x128xf32>
    %484 = arith.addf %479, %483 : vector<8x128xf32>
    %485 = math.tanh %484 : vector<8x128xf32>
    %cst_145 = arith.constant 1.000000e+00 : f32
    %486 = vector.broadcast %cst_145 : f32 to vector<8x128xf32>
    %487 = arith.subf %486, %478 : vector<8x128xf32>
    %488 = arith.mulf %487, %485 : vector<8x128xf32>
    %489 = arith.extf %451 : vector<8x128xbf16> to vector<8x128xf32>
    %490 = arith.mulf %478, %489 : vector<8x128xf32>
    %491 = arith.addf %488, %490 : vector<8x128xf32>
    %492 = arith.truncf %491 : vector<8x128xf32> to vector<8x128xbf16>
    %c3_i32_146 = arith.constant 3 : i32
    %c8_i32_147 = arith.constant 8 : i32
    %493 = arith.muli %c3_i32_146, %c8_i32_147 : i32
    %494 = tpu.assume_multiple %493, 8 : i32
    %c7_i32_148 = arith.constant 7 : i32
    %495 = arith.subi %c7_i32_148, %c3_i32_146 : i32
    %c8_i32_149 = arith.constant 8 : i32
    %496 = arith.muli %495, %c8_i32_149 : i32
    %497 = tpu.assume_multiple %496, 8 : i32
    %498 = arith.index_cast %494 : i32 to index
    %c0_150 = arith.constant 0 : index
    %499 = vector.load %arg15[%498, %c0_150] : memref<64x384xf32, #tpu.memory_space<vmem>>, vector<8x384xf32>
    %500 = arith.index_cast %497 : i32 to index
    %c0_151 = arith.constant 0 : index
    %501 = vector.load %arg16[%500, %c0_151] : memref<64x384xf32, #tpu.memory_space<vmem>>, vector<8x384xf32>
    %502 = arith.addf %499, %501 : vector<8x384xf32>
    %cst_152 = arith.constant dense<0.000000e+00> : vector<8x384xf32>
    %503 = tpu.matmul %492, %367, %cst_152 {dimension_numbers = #tpu.dot_dimension_numbers<[1], [0], [0], [1], [0, 0, 1, 1], [], []>} : vector<8x128xbf16>, vector<128x384xbf16>, vector<8x384xf32> -> vector<8x384xf32>
    %504 = vector.extract_strided_slice %502 {offsets = [0, 0], sizes = [8, 128], strides = [1, 1]} : vector<8x384xf32> to vector<8x128xf32>
    %505 = vector.extract_strided_slice %503 {offsets = [0, 0], sizes = [8, 128], strides = [1, 1]} : vector<8x384xf32> to vector<8x128xf32>
    %506 = arith.addf %504, %505 : vector<8x128xf32>
    %507 = arith.negf %506 : vector<8x128xf32>
    %508 = math.exp %507 : vector<8x128xf32>
    %cst_153 = arith.constant 1.000000e+00 : f32
    %509 = vector.broadcast %cst_153 : f32 to vector<8x128xf32>
    %510 = arith.addf %509, %508 : vector<8x128xf32>
    %511 = arith.divf %509, %510 : vector<8x128xf32>
    %512 = vector.extract_strided_slice %502 {offsets = [0, 128], sizes = [8, 128], strides = [1, 1]} : vector<8x384xf32> to vector<8x128xf32>
    %513 = vector.extract_strided_slice %503 {offsets = [0, 128], sizes = [8, 128], strides = [1, 1]} : vector<8x384xf32> to vector<8x128xf32>
    %514 = arith.addf %512, %513 : vector<8x128xf32>
    %515 = arith.negf %514 : vector<8x128xf32>
    %516 = math.exp %515 : vector<8x128xf32>
    %cst_154 = arith.constant 1.000000e+00 : f32
    %517 = vector.broadcast %cst_154 : f32 to vector<8x128xf32>
    %518 = arith.addf %517, %516 : vector<8x128xf32>
    %519 = arith.divf %517, %518 : vector<8x128xf32>
    %520 = vector.extract_strided_slice %502 {offsets = [0, 256], sizes = [8, 128], strides = [1, 1]} : vector<8x384xf32> to vector<8x128xf32>
    %521 = vector.extract_strided_slice %503 {offsets = [0, 256], sizes = [8, 128], strides = [1, 1]} : vector<8x384xf32> to vector<8x128xf32>
    %522 = vector.broadcast %368 : vector<1x128xf32> to vector<8x128xf32>
    %523 = arith.addf %521, %522 : vector<8x128xf32>
    %524 = arith.mulf %511, %523 : vector<8x128xf32>
    %525 = arith.addf %520, %524 : vector<8x128xf32>
    %526 = math.tanh %525 : vector<8x128xf32>
    %cst_155 = arith.constant 1.000000e+00 : f32
    %527 = vector.broadcast %cst_155 : f32 to vector<8x128xf32>
    %528 = arith.subf %527, %519 : vector<8x128xf32>
    %529 = arith.mulf %528, %526 : vector<8x128xf32>
    %530 = arith.extf %492 : vector<8x128xbf16> to vector<8x128xf32>
    %531 = arith.mulf %519, %530 : vector<8x128xf32>
    %532 = arith.addf %529, %531 : vector<8x128xf32>
    %533 = arith.truncf %532 : vector<8x128xf32> to vector<8x128xbf16>
    %c4_i32_156 = arith.constant 4 : i32
    %c8_i32_157 = arith.constant 8 : i32
    %534 = arith.muli %c4_i32_156, %c8_i32_157 : i32
    %535 = tpu.assume_multiple %534, 8 : i32
    %c7_i32_158 = arith.constant 7 : i32
    %536 = arith.subi %c7_i32_158, %c4_i32_156 : i32
    %c8_i32_159 = arith.constant 8 : i32
    %537 = arith.muli %536, %c8_i32_159 : i32
    %538 = tpu.assume_multiple %537, 8 : i32
    %539 = arith.index_cast %535 : i32 to index
    %c0_160 = arith.constant 0 : index
    %540 = vector.load %arg15[%539, %c0_160] : memref<64x384xf32, #tpu.memory_space<vmem>>, vector<8x384xf32>
    %541 = arith.index_cast %538 : i32 to index
    %c0_161 = arith.constant 0 : index
    %542 = vector.load %arg16[%541, %c0_161] : memref<64x384xf32, #tpu.memory_space<vmem>>, vector<8x384xf32>
    %543 = arith.addf %540, %542 : vector<8x384xf32>
    %cst_162 = arith.constant dense<0.000000e+00> : vector<8x384xf32>
    %544 = tpu.matmul %533, %367, %cst_162 {dimension_numbers = #tpu.dot_dimension_numbers<[1], [0], [0], [1], [0, 0, 1, 1], [], []>} : vector<8x128xbf16>, vector<128x384xbf16>, vector<8x384xf32> -> vector<8x384xf32>
    %545 = vector.extract_strided_slice %543 {offsets = [0, 0], sizes = [8, 128], strides = [1, 1]} : vector<8x384xf32> to vector<8x128xf32>
    %546 = vector.extract_strided_slice %544 {offsets = [0, 0], sizes = [8, 128], strides = [1, 1]} : vector<8x384xf32> to vector<8x128xf32>
    %547 = arith.addf %545, %546 : vector<8x128xf32>
    %548 = arith.negf %547 : vector<8x128xf32>
    %549 = math.exp %548 : vector<8x128xf32>
    %cst_163 = arith.constant 1.000000e+00 : f32
    %550 = vector.broadcast %cst_163 : f32 to vector<8x128xf32>
    %551 = arith.addf %550, %549 : vector<8x128xf32>
    %552 = arith.divf %550, %551 : vector<8x128xf32>
    %553 = vector.extract_strided_slice %543 {offsets = [0, 128], sizes = [8, 128], strides = [1, 1]} : vector<8x384xf32> to vector<8x128xf32>
    %554 = vector.extract_strided_slice %544 {offsets = [0, 128], sizes = [8, 128], strides = [1, 1]} : vector<8x384xf32> to vector<8x128xf32>
    %555 = arith.addf %553, %554 : vector<8x128xf32>
    %556 = arith.negf %555 : vector<8x128xf32>
    %557 = math.exp %556 : vector<8x128xf32>
    %cst_164 = arith.constant 1.000000e+00 : f32
    %558 = vector.broadcast %cst_164 : f32 to vector<8x128xf32>
    %559 = arith.addf %558, %557 : vector<8x128xf32>
    %560 = arith.divf %558, %559 : vector<8x128xf32>
    %561 = vector.extract_strided_slice %543 {offsets = [0, 256], sizes = [8, 128], strides = [1, 1]} : vector<8x384xf32> to vector<8x128xf32>
    %562 = vector.extract_strided_slice %544 {offsets = [0, 256], sizes = [8, 128], strides = [1, 1]} : vector<8x384xf32> to vector<8x128xf32>
    %563 = vector.broadcast %368 : vector<1x128xf32> to vector<8x128xf32>
    %564 = arith.addf %562, %563 : vector<8x128xf32>
    %565 = arith.mulf %552, %564 : vector<8x128xf32>
    %566 = arith.addf %561, %565 : vector<8x128xf32>
    %567 = math.tanh %566 : vector<8x128xf32>
    %cst_165 = arith.constant 1.000000e+00 : f32
    %568 = vector.broadcast %cst_165 : f32 to vector<8x128xf32>
    %569 = arith.subf %568, %560 : vector<8x128xf32>
    %570 = arith.mulf %569, %567 : vector<8x128xf32>
    %571 = arith.extf %533 : vector<8x128xbf16> to vector<8x128xf32>
    %572 = arith.mulf %560, %571 : vector<8x128xf32>
    %573 = arith.addf %570, %572 : vector<8x128xf32>
    %574 = arith.truncf %573 : vector<8x128xf32> to vector<8x128xbf16>
    %c5_i32_166 = arith.constant 5 : i32
    %c8_i32_167 = arith.constant 8 : i32
    %575 = arith.muli %c5_i32_166, %c8_i32_167 : i32
    %576 = tpu.assume_multiple %575, 8 : i32
    %c7_i32_168 = arith.constant 7 : i32
    %577 = arith.subi %c7_i32_168, %c5_i32_166 : i32
    %c8_i32_169 = arith.constant 8 : i32
    %578 = arith.muli %577, %c8_i32_169 : i32
    %579 = tpu.assume_multiple %578, 8 : i32
    %580 = arith.index_cast %576 : i32 to index
    %c0_170 = arith.constant 0 : index
    %581 = vector.load %arg15[%580, %c0_170] : memref<64x384xf32, #tpu.memory_space<vmem>>, vector<8x384xf32>
    %582 = arith.index_cast %579 : i32 to index
    %c0_171 = arith.constant 0 : index
    %583 = vector.load %arg16[%582, %c0_171] : memref<64x384xf32, #tpu.memory_space<vmem>>, vector<8x384xf32>
    %584 = arith.addf %581, %583 : vector<8x384xf32>
    %cst_172 = arith.constant dense<0.000000e+00> : vector<8x384xf32>
    %585 = tpu.matmul %574, %367, %cst_172 {dimension_numbers = #tpu.dot_dimension_numbers<[1], [0], [0], [1], [0, 0, 1, 1], [], []>} : vector<8x128xbf16>, vector<128x384xbf16>, vector<8x384xf32> -> vector<8x384xf32>
    %586 = vector.extract_strided_slice %584 {offsets = [0, 0], sizes = [8, 128], strides = [1, 1]} : vector<8x384xf32> to vector<8x128xf32>
    %587 = vector.extract_strided_slice %585 {offsets = [0, 0], sizes = [8, 128], strides = [1, 1]} : vector<8x384xf32> to vector<8x128xf32>
    %588 = arith.addf %586, %587 : vector<8x128xf32>
    %589 = arith.negf %588 : vector<8x128xf32>
    %590 = math.exp %589 : vector<8x128xf32>
    %cst_173 = arith.constant 1.000000e+00 : f32
    %591 = vector.broadcast %cst_173 : f32 to vector<8x128xf32>
    %592 = arith.addf %591, %590 : vector<8x128xf32>
    %593 = arith.divf %591, %592 : vector<8x128xf32>
    %594 = vector.extract_strided_slice %584 {offsets = [0, 128], sizes = [8, 128], strides = [1, 1]} : vector<8x384xf32> to vector<8x128xf32>
    %595 = vector.extract_strided_slice %585 {offsets = [0, 128], sizes = [8, 128], strides = [1, 1]} : vector<8x384xf32> to vector<8x128xf32>
    %596 = arith.addf %594, %595 : vector<8x128xf32>
    %597 = arith.negf %596 : vector<8x128xf32>
    %598 = math.exp %597 : vector<8x128xf32>
    %cst_174 = arith.constant 1.000000e+00 : f32
    %599 = vector.broadcast %cst_174 : f32 to vector<8x128xf32>
    %600 = arith.addf %599, %598 : vector<8x128xf32>
    %601 = arith.divf %599, %600 : vector<8x128xf32>
    %602 = vector.extract_strided_slice %584 {offsets = [0, 256], sizes = [8, 128], strides = [1, 1]} : vector<8x384xf32> to vector<8x128xf32>
    %603 = vector.extract_strided_slice %585 {offsets = [0, 256], sizes = [8, 128], strides = [1, 1]} : vector<8x384xf32> to vector<8x128xf32>
    %604 = vector.broadcast %368 : vector<1x128xf32> to vector<8x128xf32>
    %605 = arith.addf %603, %604 : vector<8x128xf32>
    %606 = arith.mulf %593, %605 : vector<8x128xf32>
    %607 = arith.addf %602, %606 : vector<8x128xf32>
    %608 = math.tanh %607 : vector<8x128xf32>
    %cst_175 = arith.constant 1.000000e+00 : f32
    %609 = vector.broadcast %cst_175 : f32 to vector<8x128xf32>
    %610 = arith.subf %609, %601 : vector<8x128xf32>
    %611 = arith.mulf %610, %608 : vector<8x128xf32>
    %612 = arith.extf %574 : vector<8x128xbf16> to vector<8x128xf32>
    %613 = arith.mulf %601, %612 : vector<8x128xf32>
    %614 = arith.addf %611, %613 : vector<8x128xf32>
    %615 = arith.truncf %614 : vector<8x128xf32> to vector<8x128xbf16>
    %c6_i32_176 = arith.constant 6 : i32
    %c8_i32_177 = arith.constant 8 : i32
    %616 = arith.muli %c6_i32_176, %c8_i32_177 : i32
    %617 = tpu.assume_multiple %616, 8 : i32
    %c7_i32_178 = arith.constant 7 : i32
    %618 = arith.subi %c7_i32_178, %c6_i32_176 : i32
    %c8_i32_179 = arith.constant 8 : i32
    %619 = arith.muli %618, %c8_i32_179 : i32
    %620 = tpu.assume_multiple %619, 8 : i32
    %621 = arith.index_cast %617 : i32 to index
    %c0_180 = arith.constant 0 : index
    %622 = vector.load %arg15[%621, %c0_180] : memref<64x384xf32, #tpu.memory_space<vmem>>, vector<8x384xf32>
    %623 = arith.index_cast %620 : i32 to index
    %c0_181 = arith.constant 0 : index
    %624 = vector.load %arg16[%623, %c0_181] : memref<64x384xf32, #tpu.memory_space<vmem>>, vector<8x384xf32>
    %625 = arith.addf %622, %624 : vector<8x384xf32>
    %cst_182 = arith.constant dense<0.000000e+00> : vector<8x384xf32>
    %626 = tpu.matmul %615, %367, %cst_182 {dimension_numbers = #tpu.dot_dimension_numbers<[1], [0], [0], [1], [0, 0, 1, 1], [], []>} : vector<8x128xbf16>, vector<128x384xbf16>, vector<8x384xf32> -> vector<8x384xf32>
    %627 = vector.extract_strided_slice %625 {offsets = [0, 0], sizes = [8, 128], strides = [1, 1]} : vector<8x384xf32> to vector<8x128xf32>
    %628 = vector.extract_strided_slice %626 {offsets = [0, 0], sizes = [8, 128], strides = [1, 1]} : vector<8x384xf32> to vector<8x128xf32>
    %629 = arith.addf %627, %628 : vector<8x128xf32>
    %630 = arith.negf %629 : vector<8x128xf32>
    %631 = math.exp %630 : vector<8x128xf32>
    %cst_183 = arith.constant 1.000000e+00 : f32
    %632 = vector.broadcast %cst_183 : f32 to vector<8x128xf32>
    %633 = arith.addf %632, %631 : vector<8x128xf32>
    %634 = arith.divf %632, %633 : vector<8x128xf32>
    %635 = vector.extract_strided_slice %625 {offsets = [0, 128], sizes = [8, 128], strides = [1, 1]} : vector<8x384xf32> to vector<8x128xf32>
    %636 = vector.extract_strided_slice %626 {offsets = [0, 128], sizes = [8, 128], strides = [1, 1]} : vector<8x384xf32> to vector<8x128xf32>
    %637 = arith.addf %635, %636 : vector<8x128xf32>
    %638 = arith.negf %637 : vector<8x128xf32>
    %639 = math.exp %638 : vector<8x128xf32>
    %cst_184 = arith.constant 1.000000e+00 : f32
    %640 = vector.broadcast %cst_184 : f32 to vector<8x128xf32>
    %641 = arith.addf %640, %639 : vector<8x128xf32>
    %642 = arith.divf %640, %641 : vector<8x128xf32>
    %643 = vector.extract_strided_slice %625 {offsets = [0, 256], sizes = [8, 128], strides = [1, 1]} : vector<8x384xf32> to vector<8x128xf32>
    %644 = vector.extract_strided_slice %626 {offsets = [0, 256], sizes = [8, 128], strides = [1, 1]} : vector<8x384xf32> to vector<8x128xf32>
    %645 = vector.broadcast %368 : vector<1x128xf32> to vector<8x128xf32>
    %646 = arith.addf %644, %645 : vector<8x128xf32>
    %647 = arith.mulf %634, %646 : vector<8x128xf32>
    %648 = arith.addf %643, %647 : vector<8x128xf32>
    %649 = math.tanh %648 : vector<8x128xf32>
    %cst_185 = arith.constant 1.000000e+00 : f32
    %650 = vector.broadcast %cst_185 : f32 to vector<8x128xf32>
    %651 = arith.subf %650, %642 : vector<8x128xf32>
    %652 = arith.mulf %651, %649 : vector<8x128xf32>
    %653 = arith.extf %615 : vector<8x128xbf16> to vector<8x128xf32>
    %654 = arith.mulf %642, %653 : vector<8x128xf32>
    %655 = arith.addf %652, %654 : vector<8x128xf32>
    %656 = arith.truncf %655 : vector<8x128xf32> to vector<8x128xbf16>
    %c7_i32_186 = arith.constant 7 : i32
    %c8_i32_187 = arith.constant 8 : i32
    %657 = arith.muli %c7_i32_186, %c8_i32_187 : i32
    %658 = tpu.assume_multiple %657, 8 : i32
    %c7_i32_188 = arith.constant 7 : i32
    %659 = arith.subi %c7_i32_188, %c7_i32_186 : i32
    %c8_i32_189 = arith.constant 8 : i32
    %660 = arith.muli %659, %c8_i32_189 : i32
    %661 = tpu.assume_multiple %660, 8 : i32
    %662 = arith.index_cast %658 : i32 to index
    %c0_190 = arith.constant 0 : index
    %663 = vector.load %arg15[%662, %c0_190] : memref<64x384xf32, #tpu.memory_space<vmem>>, vector<8x384xf32>
    %664 = arith.index_cast %661 : i32 to index
    %c0_191 = arith.constant 0 : index
    %665 = vector.load %arg16[%664, %c0_191] : memref<64x384xf32, #tpu.memory_space<vmem>>, vector<8x384xf32>
    %666 = arith.addf %663, %665 : vector<8x384xf32>
    %cst_192 = arith.constant dense<0.000000e+00> : vector<8x384xf32>
    %667 = tpu.matmul %656, %367, %cst_192 {dimension_numbers = #tpu.dot_dimension_numbers<[1], [0], [0], [1], [0, 0, 1, 1], [], []>} : vector<8x128xbf16>, vector<128x384xbf16>, vector<8x384xf32> -> vector<8x384xf32>
    %668 = vector.extract_strided_slice %666 {offsets = [0, 0], sizes = [8, 128], strides = [1, 1]} : vector<8x384xf32> to vector<8x128xf32>
    %669 = vector.extract_strided_slice %667 {offsets = [0, 0], sizes = [8, 128], strides = [1, 1]} : vector<8x384xf32> to vector<8x128xf32>
    %670 = arith.addf %668, %669 : vector<8x128xf32>
    %671 = arith.negf %670 : vector<8x128xf32>
    %672 = math.exp %671 : vector<8x128xf32>
    %cst_193 = arith.constant 1.000000e+00 : f32
    %673 = vector.broadcast %cst_193 : f32 to vector<8x128xf32>
    %674 = arith.addf %673, %672 : vector<8x128xf32>
    %675 = arith.divf %673, %674 : vector<8x128xf32>
    %676 = vector.extract_strided_slice %666 {offsets = [0, 128], sizes = [8, 128], strides = [1, 1]} : vector<8x384xf32> to vector<8x128xf32>
    %677 = vector.extract_strided_slice %667 {offsets = [0, 128], sizes = [8, 128], strides = [1, 1]} : vector<8x384xf32> to vector<8x128xf32>
    %678 = arith.addf %676, %677 : vector<8x128xf32>
    %679 = arith.negf %678 : vector<8x128xf32>
    %680 = math.exp %679 : vector<8x128xf32>
    %cst_194 = arith.constant 1.000000e+00 : f32
    %681 = vector.broadcast %cst_194 : f32 to vector<8x128xf32>
    %682 = arith.addf %681, %680 : vector<8x128xf32>
    %683 = arith.divf %681, %682 : vector<8x128xf32>
    %684 = vector.extract_strided_slice %666 {offsets = [0, 256], sizes = [8, 128], strides = [1, 1]} : vector<8x384xf32> to vector<8x128xf32>
    %685 = vector.extract_strided_slice %667 {offsets = [0, 256], sizes = [8, 128], strides = [1, 1]} : vector<8x384xf32> to vector<8x128xf32>
    %686 = vector.broadcast %368 : vector<1x128xf32> to vector<8x128xf32>
    %687 = arith.addf %685, %686 : vector<8x128xf32>
    %688 = arith.mulf %675, %687 : vector<8x128xf32>
    %689 = arith.addf %684, %688 : vector<8x128xf32>
    %690 = math.tanh %689 : vector<8x128xf32>
    %cst_195 = arith.constant 1.000000e+00 : f32
    %691 = vector.broadcast %cst_195 : f32 to vector<8x128xf32>
    %692 = arith.subf %691, %683 : vector<8x128xf32>
    %693 = arith.mulf %692, %690 : vector<8x128xf32>
    %694 = arith.extf %656 : vector<8x128xbf16> to vector<8x128xf32>
    %695 = arith.mulf %683, %694 : vector<8x128xf32>
    %696 = arith.addf %693, %695 : vector<8x128xf32>
    %697 = arith.truncf %696 : vector<8x128xf32> to vector<8x128xbf16>
    %c8_i32_196 = arith.constant 8 : i32
    %698 = arith.extf %697 : vector<8x128xbf16> to vector<8x128xf32>
    %c0_197 = arith.constant 0 : index
    %c0_198 = arith.constant 0 : index
    %699 = vector.load %arg14[%c0_197, %c0_198] : memref<8x128xf32, #tpu.memory_space<vmem>>, vector<8x128xf32>
    tpu.vector_store %arg14[%c0_197, %c0_198], %698 {strides = array<i32>} : memref<8x128xf32, #tpu.memory_space<vmem>>, vector<8x128xf32>,
    %c0_199 = arith.constant 0 : index
    %c0_200 = arith.constant 0 : index
    %700 = vector.load %arg11[%c0_199, %c0_200] : memref<128x128xbf16, #tpu.memory_space<vmem>>, vector<128x128xbf16>
    %cst_201 = arith.constant dense<0.000000e+00> : vector<8x128xf32>
    %701 = tpu.matmul %697, %700, %cst_201 {dimension_numbers = #tpu.dot_dimension_numbers<[1], [0], [0], [1], [0, 0, 1, 1], [], []>} : vector<8x128xbf16>, vector<128x128xbf16>, vector<8x128xf32> -> vector<8x128xf32>
    %c0_202 = arith.constant 0 : index
    %c0_203 = arith.constant 0 : index
    %702 = vector.load %arg12[%c0_202, %c0_203] : memref<1x128xf32, #tpu.memory_space<vmem>>, vector<1x128xf32>
    %703 = vector.broadcast %702 : vector<1x128xf32> to vector<8x128xf32>
    %704 = arith.addf %701, %703 : vector<8x128xf32>
    %c0_204 = arith.constant 0 : index
    %c0_205 = arith.constant 0 : index
    %705 = vector.load %arg13[%c0_204, %c0_205] : memref<8x128xf32, #tpu.memory_space<vmem>>, vector<8x128xf32>
    tpu.vector_store %arg13[%c0_204, %c0_205], %704 {strides = array<i32>} : memref<8x128xf32, #tpu.memory_space<vmem>>, vector<8x128xf32>,
    return
  }
}

</mosaic_0001>

<bundles_post_ra>
// kernel: gru_model_forward.1
= control target key start
LH: loop header
LB: loop body
LE: loop exit
PB: predicated region body
PF: predicated region fallthrough
CT: control target
= control target key end

     0   :  { %20 = vsyncpa [#allocation6], 0  ;;  %s5698_s0 = inlined_call_operand.vmem [shape: bf16[64,128], index: 0, kind: input, shape index: {}]   ;;  %s5699_s1 = inlined_call_operand.hbm [shape: bf16[128,384], index: 1, kind: input, shape index: {}]   ;;  %s5700_s2 = inlined_call_operand.hbm [shape: bf16[128,384], index: 2, kind: input, shape index: {}]   ;;  %s5701_s3 = inlined_call_operand.vmem [shape: f32[1,384], index: 3, kind: input, shape index: {}]   ;;  %s5702_s4 = inlined_call_operand.vmem [shape: f32[1,128], index: 4, kind: input, shape index: {}]   ;;  %s5703_s5 = inlined_call_operand.hbm [shape: bf16[128,384], index: 5, kind: input, shape index: {}]   ;;  %s5704_s6 = inlined_call_operand.hbm [shape: bf16[128,384], index: 6, kind: input, shape index: {}]   ;;  %s5705_s7 = inlined_call_operand.hbm [shape: bf16[128,384], index: 7, kind: input, shape index: {}]   ;;  %s5706_s8 = inlined_call_operand.vmem [shape: f32[1,384], index: 8, kind: input, shape index: {}]   ;;  %s5707_s9 = inlined_call_operand.vmem [shape: f32[1,128], index: 9, kind: input, shape index: {}]   ;;  %s5708_s10 = inlined_call_operand.hbm [shape: bf16[128,384], index: 10, kind: input, shape index: {}]   ;;  %s5709_s11 = inlined_call_operand.vmem [shape: bf16[128,128], index: 11, kind: input, shape index: {}]   ;;  %s5710_s12 = inlined_call_operand.vmem [shape: f32[1,128], index: 12, kind: input, shape index: {}]   ;;  %s5711_s13 = inlined_call_operand.vmem [shape: f32[8,128], index: 13, kind: output, shape index: {0}]   ;;  %s5712_s14 = inlined_call_operand.vmem [shape: f32[8,128], index: 14, kind: output, shape index: {1}]  }
   0x1   :  { %21 = vsyncpa [#allocation8], 0 }
   0x2   :  { %22 = vsyncpa [#allocation11], 0 }
   0x3   :  { %23 = vsyncpa [#allocation14], 0  ;;  %s43_s15 = sshll.u32 %s5700_s2, 4  ;;  %s4522_s16 = smov [#allocation7]   ;;  %s44_s15 = int_to_ptr.hbm [resolvable:$true] %s43_s15 }
   0x4   :  { %s45_s17 = sshll.u32 %s4522_s16, 4  ;;  %s73_s20 = sshll.u32 %s5704_s6, 4  ;;  %s46_s17 = int_to_ptr.vmem [resolvable:$true] %s45_s17  ;;  %s74_s20 = int_to_ptr.hbm [resolvable:$true] %s73_s20 }
   0x5   :  { %s4523_s21 = smov 192   ;;  %s4524_s22 = smov 12  }
   0x6   :  { %51 = dma.hbm_to_vmem [thread:$0]  %s44_s15, 3072, %s46_s17, [#allocation8], %s4523_s21, %s4523_s21, %s4524_s22  }
   0x7   :  { %s4525_s23 = smov [#allocation10]   ;;  %s30_s2 = sshll.u32 %s5699_s1, 4  ;;  %s31_s2 = int_to_ptr.hbm [resolvable:$true] %s30_s2 }
   0x8   :  { %s75_s24 = sshll.u32 %s4525_s23, 4  ;;  %s60_s28 = sshll.u32 %s5703_s5, 4  ;;  %s76_s24 = int_to_ptr.vmem [resolvable:$true] %s75_s24  ;;  %s61_s28 = int_to_ptr.hbm [resolvable:$true] %s60_s28 }
   0x9   :  { %81 = dma.hbm_to_vmem [thread:$0]  %s74_s20, 3072, %s76_s24, [#allocation11], %s4523_s21, %s4523_s21, %s4524_s22  }
   0xa   :  { %s4526_s29 = smov [#allocation5]   ;;  %s4527_s15 = smov [#allocation9]  }
   0xb   :  { %s32_s30 = sshll.u32 %s4526_s29, 4  ;;  %s62_s1 = sshll.u32 %s4527_s15, 4  ;;  %s33_s30 = int_to_ptr.vmem [resolvable:$true] %s32_s30  ;;  %s63_s1 = int_to_ptr.vmem [resolvable:$true] %s62_s1 }
   0xc   :  { %38 = dma.hbm_to_vmem [thread:$0]  %s31_s2, 3072, %s33_s30, [#allocation6], %s4523_s21, %s4523_s21, %s4524_s22  }
   0xd   :  { %s86_s18 = sshll.u32 %s5705_s7, 4  ;;  %s103_s20 = sshll.u32 %s5708_s10, 4  ;;  %s87_s18 = int_to_ptr.hbm [resolvable:$true] %s86_s18  ;;  %s104_s20 = int_to_ptr.hbm [resolvable:$true] %s103_s20 }
   0xe   :  { %68 = dma.hbm_to_vmem [thread:$0]  %s61_s28, 3072, %s63_s1, [#allocation8], %s4523_s21, %s4523_s21, %s4524_s22  }
   0xf   :  { %s4528_s23 = smov [#allocation12]   ;;  %s4529_s25 = smov [#allocation13]  }
  0x10   :  { %s88_s24 = sshll.u32 %s4528_s23, 4  ;;  %s105_s7 = sshll.u32 %s4529_s25, 4  ;;  %s89_s24 = int_to_ptr.vmem [resolvable:$true] %s88_s24  ;;  %s106_s7 = int_to_ptr.vmem [resolvable:$true] %s105_s7 }
  0x11   :  { %94 = dma.hbm_to_vmem [thread:$0]  %s87_s18, 3072, %s89_s24, [#allocation11], %s4523_s21, %s4523_s21, %s4524_s22  }
  0x12   :  { %111 = dma.hbm_to_vmem [thread:$0]  %s104_s20, 3072, %s106_s7, [#allocation14], %s4523_s21, %s4523_s21, %s4524_s22  }
  0x13   :  { %4514 = dma.done.wait [#allocation6], 3072  }
  0x14   :  { %4515 = vsyncadd [#allocation6], 4294964224 }
  0x15   :  { %4516 = dma.done.wait [#allocation8], 6144  }
  0x16   :  { %4517 = vsyncadd [#allocation8], 4294961152 }
  0x17   :  { %4518 = dma.done.wait [#allocation11], 6144  }
  0x18   :  { %4519 = vsyncadd [#allocation11], 4294961152 }
  0x19   :  { %4520 = dma.done.wait [#allocation14], 3072  }
  0x1a   :  { %4521 = vsyncadd [#allocation14], 4294964224  ;;  %v3466_v0 = vld [vmem:[#allocation5 + $0xa8] sm:$0xf]  ;;  %v4062_v1 = vld [vmem:[#allocation5 + $0xb0] sm:$0xf0] }
  0x1b   :  { %v4061_v2 = vld [vmem:[#allocation5 + $0xac] sm:$0xf]  ;;  %v3467_v3 = vor.u32 %v4062_v1, %v3466_v0  ;;  %v3468_v4 = vld [vmem:[#allocation5 + $0xb4] sm:$0xf0]  ;;  %v3474_v5 = vld [vmem:[#allocation5 + $0xb0] sm:$0xf] }
  0x1c   :  { %v4063_v6 = vld [vmem:[#allocation5 + $0xb8] sm:$0xf0]  ;;  %v3471_v7 = vor.u32 %v4061_v2, %v3468_v4  ;;  %v3562_v9 = vld [vmem:[#allocation7 + $0xa8] sm:$0xf]  ;;  %v4086_v10 = vld [vmem:[#allocation7 + $0xb0] sm:$0xf0] }
  0x1d   :  { %v3475_v8 = vor.u32 %v4063_v6, %v3474_v5  ;;  %v3454_v11 = vld [vmem:[#allocation5 + $0x90] sm:$0xf]  ;;  %341 = vmatpush.bf16.msra.mxu0 %v3467_v3  ;;  %v3563_v12 = vor.u32 %v4086_v10, %v3562_v9  ;;  %v4059_v13 = vld [vmem:[#allocation5 + $0x98] sm:$0xf0]  ;;  %v4058_v14 = vld [vmem:[#allocation5 + $0x94] sm:$0xf] }
  0x1e   :  { %v3456_v15 = vld [vmem:[#allocation5 + $0x9c] sm:$0xf0]  ;;  %370 = vmatpush.bf16.msra.mxu1 %v3471_v7  ;;  %v3455_v16 = vor.u32 %v4059_v13, %v3454_v11  ;;  %v3462_v18 = vld [vmem:[#allocation5 + $0x98] sm:$0xf]  ;;  %v4060_v19 = vld [vmem:[#allocation5 + $0xa0] sm:$0xf0] }
  0x1f   :  { %399 = vmatpush.bf16.msra.mxu2 %v3475_v8  ;;  %v3459_v17 = vor.u32 %v4058_v14, %v3456_v15  ;;  %v3550_v20 = vld [vmem:[#allocation7 + $0x90] sm:$0xf]  ;;  %612 = vmatpush.bf16.msra.mxu3 %v3563_v12  ;;  %v3463_v21 = vor.u32 %v4060_v19, %v3462_v18  ;;  %v4083_v22 = vld [vmem:[#allocation7 + $0x98] sm:$0xf0]  ;;  %v3442_v23 = vld [vmem:[#allocation5 + $0x78] sm:$0xf] }
  0x20   :  { %v4056_v24 = vld [vmem:[#allocation5 + $0x80] sm:$0xf0]  ;;  %v3551_v25 = vor.u32 %v4083_v22, %v3550_v20  ;;  %v4055_v26 = vld [vmem:[#allocation5 + $0x7c] sm:$0xf]  ;;  %v3444_v27 = vld [vmem:[#allocation5 + $0x84] sm:$0xf0] }
  0x21   :  { %v3450_v28 = vld [vmem:[#allocation5 + $0x80] sm:$0xf]  ;;  %342 = vmatpush.bf16.msra.mxu0 %v3455_v16  ;;  %v3443_v29 = vor.u32 %v4056_v24, %v3442_v23  ;;  %v4057_v30 = vld [vmem:[#allocation5 + $0x88] sm:$0xf0]  ;;  %v3538_v31 = vld [vmem:[#allocation7 + $0x78] sm:$0xf]  ;;  %v3447_v33 = vor.u32 %v4055_v26, %v3444_v27 }
  0x22   :  { %v4080_v32 = vld [vmem:[#allocation7 + $0x80] sm:$0xf0]  ;;  %371 = vmatpush.bf16.msra.mxu1 %v3459_v17  ;;  %v3451_v34 = vor.u32 %v4057_v30, %v3450_v28  ;;  %v3430_v35 = vld [vmem:[#allocation5 + $0x60] sm:$0xf]  ;;  %v4053_v36 = vld [vmem:[#allocation5 + $0x68] sm:$0xf0] }
  0x23   :  { %400 = vmatpush.bf16.msra.mxu2 %v3463_v21  ;;  %v4052_v37 = vld [vmem:[#allocation5 + $0x64] sm:$0xf]  ;;  %613 = vmatpush.bf16.msra.mxu3 %v3551_v25  ;;  %v3539_v38 = vor.u32 %v4080_v32, %v3538_v31  ;;  %v3432_v39 = vld [vmem:[#allocation5 + $0x6c] sm:$0xf0]  ;;  %v3438_v40 = vld [vmem:[#allocation5 + $0x68] sm:$0xf]  ;;  %v3431_v44 = vor.u32 %v4053_v36, %v3430_v35 }
  0x24   :  { %v4054_v41 = vld [vmem:[#allocation5 + $0x70] sm:$0xf0]  ;;  %v3526_v42 = vld [vmem:[#allocation7 + $0x60] sm:$0xf]  ;;  %v4077_v43 = vld [vmem:[#allocation7 + $0x68] sm:$0xf0]  ;;  %v3435_v45 = vor.u32 %v4052_v37, %v3432_v39 }
  0x25   :  { %343 = vmatpush.bf16.msra.mxu0 %v3443_v29  ;;  %v3439_v46 = vor.u32 %v4054_v41, %v3438_v40  ;;  %v3418_v47 = vld [vmem:[#allocation5 + $0x48] sm:$0xf]  ;;  %v4050_v48 = vld [vmem:[#allocation5 + $0x50] sm:$0xf0]  ;;  %v4049_v49 = vld [vmem:[#allocation5 + $0x4c] sm:$0xf]  ;;  %v3527_v50 = vor.u32 %v4077_v43, %v3526_v42 }
  0x26   :  { %372 = vmatpush.bf16.msra.mxu1 %v3447_v33  ;;  %v3420_v51 = vld [vmem:[#allocation5 + $0x54] sm:$0xf0]  ;;  %v3426_v52 = vld [vmem:[#allocation5 + $0x50] sm:$0xf]  ;;  %v4051_v53 = vld [vmem:[#allocation5 + $0x58] sm:$0xf0]  ;;  %v3419_v56 = vor.u32 %v4050_v48, %v3418_v47 }
  0x27   :  { %401 = vmatpush.bf16.msra.mxu2 %v3451_v34  ;;  %614 = vmatpush.bf16.msra.mxu3 %v3539_v38  ;;  %v3514_v54 = vld [vmem:[#allocation7 + $0x48] sm:$0xf]  ;;  %v4074_v55 = vld [vmem:[#allocation7 + $0x50] sm:$0xf0]  ;;  %v3423_v57 = vor.u32 %v4049_v49, %v3420_v51  ;;  %v3427_v58 = vor.u32 %v4051_v53, %v3426_v52  ;;  %v3406_v59 = vld [vmem:[#allocation5 + $0x30] sm:$0xf] }
  0x28   :  { %v4047_v60 = vld [vmem:[#allocation5 + $0x38] sm:$0xf0]  ;;  %v4046_v61 = vld [vmem:[#allocation5 + $0x34] sm:$0xf]  ;;  %v3515_v62 = vor.u32 %v4074_v55, %v3514_v54  ;;  %v3408_v63 = vld [vmem:[#allocation5 + $0x3c] sm:$0xf0] }
  0x29   :  { %344 = vmatpush.bf16.msra.mxu0 %v3431_v44  ;;  %v3414_v0 = vld [vmem:[#allocation5 + $0x38] sm:$0xf]  ;;  %v4048_v1 = vld [vmem:[#allocation5 + $0x40] sm:$0xf0]  ;;  %v3502_v2 = vld [vmem:[#allocation7 + $0x30] sm:$0xf]  ;;  %v3407_v4 = vor.u32 %v4047_v60, %v3406_v59  ;;  %v3411_v5 = vor.u32 %v4046_v61, %v3408_v63 }
  0x2a   :  { %373 = vmatpush.bf16.msra.mxu1 %v3435_v45  ;;  %v4071_v3 = vld [vmem:[#allocation7 + $0x38] sm:$0xf0]  ;;  %v3415_v6 = vor.u32 %v4048_v1, %v3414_v0  ;;  %v3394_v7 = vld [vmem:[#allocation5 + $0x18] sm:$0xf]  ;;  %v4044_v8 = vld [vmem:[#allocation5 + $0x20] sm:$0xf0] }
  0x2b   :  { %402 = vmatpush.bf16.msra.mxu2 %v3439_v46  ;;  %615 = vmatpush.bf16.msra.mxu3 %v3527_v50  ;;  %v4043_v9 = vld [vmem:[#allocation5 + $0x1c] sm:$0xf]  ;;  %v3503_v10 = vor.u32 %v4071_v3, %v3502_v2  ;;  %v3396_v11 = vld [vmem:[#allocation5 + $0x24] sm:$0xf0]  ;;  %v3402_v12 = vld [vmem:[#allocation5 + $0x20] sm:$0xf]  ;;  %v3395_v16 = vor.u32 %v4044_v8, %v3394_v7 }
  0x2c   :  { %v4045_v13 = vld [vmem:[#allocation5 + $0x28] sm:$0xf0]  ;;  %v3490_v14 = vld [vmem:[#allocation7 + $0x18] sm:$0xf]  ;;  %v4068_v15 = vld [vmem:[#allocation7 + $0x20] sm:$0xf0]  ;;  %v3399_v20 = vor.u32 %v4043_v9, %v3396_v11 }
  0x2d   :  { %345 = vmatpush.bf16.msra.mxu0 %v3419_v56  ;;  %v3382_v17 = vld [vmem:[#allocation5] sm:$0xf]  ;;  %v4041_v18 = vld [vmem:[#allocation5 + $0x8] sm:$0xf0]  ;;  %v4040_v19 = vld [vmem:[#allocation5 + $0x4] sm:$0xf]  ;;  %v3403_v21 = vor.u32 %v4045_v13, %v3402_v12  ;;  %v3491_v25 = vor.u32 %v4068_v15, %v3490_v14 }
  0x2e   :  { %374 = vmatpush.bf16.msra.mxu1 %v3423_v57  ;;  %v3384_v22 = vld [vmem:[#allocation5 + $0xc] sm:$0xf0]  ;;  %v3390_v23 = vld [vmem:[#allocation5 + $0x8] sm:$0xf]  ;;  %v4042_v24 = vld [vmem:[#allocation5 + $0x10] sm:$0xf0]  ;;  %v3383_v30 = vor.u32 %v4041_v18, %v3382_v17 }
  0x2f   :  { %403 = vmatpush.bf16.msra.mxu2 %v3427_v58  ;;  %616 = vmatpush.bf16.msra.mxu3 %v3515_v62  ;;  %v3478_v26 = vld [vmem:[#allocation7] sm:$0xf]  ;;  %v4065_v27 = vld [vmem:[#allocation7 + $0x8] sm:$0xf0]  ;;  %v3564_v29 = vld [vmem:[#allocation7 + $0xb4] sm:$0xf0]  ;;  %v3387_v33 = vor.u32 %v4040_v19, %v3384_v22  ;;  %v3391_v34 = vor.u32 %v4042_v24, %v3390_v23 }
  0x30   :  { %v4085_v28 = vld [vmem:[#allocation7 + $0xac] sm:$0xf]  ;;  %v3570_v31 = vld [vmem:[#allocation7 + $0xb0] sm:$0xf]  ;;  %v4087_v32 = vld [vmem:[#allocation7 + $0xb8] sm:$0xf0]  ;;  %v3479_v35 = vor.u32 %v4065_v27, %v3478_v26 }
  0x31   :  { %346 = vmatpush.bf16.msra.mxu0 %v3407_v4  ;;  %v3567_v36 = vor.u32 %v4085_v28, %v3564_v29  ;;  %v4645_v37 = vld [vmem:[%s5698_s0] sm:$0xff]  ;;  %v4082_v38 = vld [vmem:[#allocation7 + $0x94] sm:$0xf]  ;;  %v3571_v40 = vor.u32 %v4087_v32, %v3570_v31  ;;  %v3558_v41 = vld [vmem:[#allocation7 + $0x98] sm:$0xf] }
  0x32   :  { %375 = vmatpush.bf16.msra.mxu1 %v3411_v5  ;;  %v3552_v39 = vld [vmem:[#allocation7 + $0x9c] sm:$0xf0]  ;;  %v4084_v42 = vld [vmem:[#allocation7 + $0xa0] sm:$0xf0]  ;;  %v3658_v44 = vld [vmem:[#allocation9 + $0xa8] sm:$0xf] }
  0x33   :  { %404 = vmatpush.bf16.msra.mxu2 %v3415_v6  ;;  %617 = vmatpush.bf16.msra.mxu3 %v3503_v10  ;;  %v3555_v43 = vor.u32 %v4082_v38, %v3552_v39  ;;  %v4110_v45 = vld [vmem:[#allocation9 + $0xb0] sm:$0xf0]  ;;  %v4079_v46 = vld [vmem:[#allocation7 + $0x7c] sm:$0xf]  ;;  %v3540_v47 = vld [vmem:[#allocation7 + $0x84] sm:$0xf0]  ;;  %v3559_v48 = vor.u32 %v4084_v42, %v3558_v41 }
  0x34   :  { %v4648_v49 = vor.u32 %v4110_v45, %v3658_v44  ;;  %v3646_v50 = vld [vmem:[#allocation9 + $0x90] sm:$0xf]  ;;  %v3543_v51 = vor.u32 %v4079_v46, %v3540_v47  ;;  %v4107_v52 = vld [vmem:[#allocation9 + $0x98] sm:$0xf0]  ;;  %v3546_v53 = vld [vmem:[#allocation7 + $0x80] sm:$0xf] }
  0x35   :  { %347 = vmatpush.bf16.msra.mxu0 %v3395_v16  ;;  %v4081_v54 = vld [vmem:[#allocation7 + $0x88] sm:$0xf0]  ;;  %v4076_v55 = vld [vmem:[#allocation7 + $0x64] sm:$0xf]  ;;  %v3528_v56 = vld [vmem:[#allocation7 + $0x6c] sm:$0xf0]  ;;  %v4654_v57 = vor.u32 %v4107_v52, %v3646_v50 }
  0x36   :  { %376 = vmatpush.bf16.msra.mxu1 %v3399_v20  ;;  %v3547_v58 = vor.u32 %v4081_v54, %v3546_v53  ;;  %v3634_v59 = vld [vmem:[#allocation9 + $0x78] sm:$0xf]  ;;  %v4104_v60 = vld [vmem:[#allocation9 + $0x80] sm:$0xf0]  ;;  %v3534_v62 = vld [vmem:[#allocation7 + $0x68] sm:$0xf]  ;;  %v3531_v0 = vor.u32 %v4076_v55, %v3528_v56 }
  0x37   :  { %405 = vmatpush.bf16.msra.mxu2 %v3403_v21  ;;  %618 = vmatpush.bf16.msra.mxu3 %v3491_v25  ;;  %v4657_v61 = vor.u32 %v4104_v60, %v3634_v59  ;;  %v4078_v63 = vld [vmem:[#allocation7 + $0x70] sm:$0xf0]  ;;  %v3622_v1 = vld [vmem:[#allocation9 + $0x60] sm:$0xf]  ;;  %v4101_v2 = vld [vmem:[#allocation9 + $0x68] sm:$0xf0] }
  0x38   :  { %v4073_v3 = vld [vmem:[#allocation7 + $0x4c] sm:$0xf]  ;;  %v3516_v4 = vld [vmem:[#allocation7 + $0x54] sm:$0xf0]  ;;  %v3535_v5 = vor.u32 %v4078_v63, %v3534_v62  ;;  %v4660_v6 = vor.u32 %v4101_v2, %v3622_v1  ;;  %v4070_v9 = vld [vmem:[#allocation7 + $0x34] sm:$0xf] }
  0x39   :  { %348 = vmatpush.bf16.msra.mxu0 %v3383_v30  ;;  %v3519_v7 = vor.u32 %v4073_v3, %v3516_v4  ;;  %v4665_v8 = vld [vmem:[%s5698_s0 + $0x8] sm:$0xff]  ;;  %v3504_v10 = vld [vmem:[#allocation7 + $0x3c] sm:$0xf0]  ;;  %v4098_v13 = vld [vmem:[#allocation9 + $0x50] sm:$0xf0] }
  0x3a   :  { %377 = vmatpush.bf16.msra.mxu1 %v3387_v33  ;;  %v3507_v11 = vor.u32 %v4070_v9, %v3504_v10  ;;  %v3610_v12 = vld [vmem:[#allocation9 + $0x48] sm:$0xf]  ;;  %v3522_v15 = vld [vmem:[#allocation7 + $0x50] sm:$0xf]  ;;  %v4075_v16 = vld [vmem:[#allocation7 + $0x58] sm:$0xf0] }
  0x3b   :  { %406 = vmatpush.bf16.msra.mxu2 %v3391_v34  ;;  %619 = vmatpush.bf16.msra.mxu3 %v3479_v35  ;;  %v4669_v14 = vor.u32 %v4098_v13, %v3610_v12  ;;  %v3523_v17 = vor.u32 %v4075_v16, %v3522_v15  ;;  %v4067_v18 = vld [vmem:[#allocation7 + $0x1c] sm:$0xf]  ;;  %v3492_v19 = vld [vmem:[#allocation7 + $0x24] sm:$0xf0]  ;;  %v3598_v20 = vld [vmem:[#allocation9 + $0x30] sm:$0xf] }
  0x3c   :  { %349 = vmatmul.bf16.vlgmr.msra.gmra.mxu0 %v4645_v37  ;;  %v3495_v21 = vor.u32 %v4067_v18, %v3492_v19  ;;  %v4095_v22 = vld [vmem:[#allocation9 + $0x38] sm:$0xf0]  ;;  %v4109_v23 = vld [vmem:[#allocation9 + $0xac] sm:$0xf]  ;;  %v3660_v24 = vld [vmem:[#allocation9 + $0xb4] sm:$0xf0] }
  0x3d   :  { %641 = vmatpush.bf16.msrb.mxu0 %v3567_v36  ;;  %378 = vmatmul.bf16.vlgmr.msra.gmra.mxu1 %v4645_v37  ;;  %v4675_v25 = vor.u32 %v4095_v22, %v3598_v20  ;;  %v4677_v26 = vor.u32 %v4109_v23, %v3660_v24  ;;  %v3510_v27 = vld [vmem:[#allocation7 + $0x38] sm:$0xf]  ;;  %v4072_v28 = vld [vmem:[#allocation7 + $0x40] sm:$0xf0]  ;;  %v3480_v31 = vld [vmem:[#allocation7 + $0xc] sm:$0xf0] }
  0x3e   :  { %670 = vmatpush.bf16.msrb.mxu1 %v3571_v40  ;;  %407 = vmatmul.bf16.vlgmr.msra.gmra.mxu2 %v4645_v37  ;;  %v4064_v29 = vld [vmem:[#allocation7 + $0x4] sm:$0xf]  ;;  %v3511_v30 = vor.u32 %v4072_v28, %v3510_v27  ;;  %v3586_v32 = vld [vmem:[#allocation9 + $0x18] sm:$0xf]  ;;  %v3498_v35 = vld [vmem:[#allocation7 + $0x20] sm:$0xf] }
  0x3f   :  { %620 = vmatmul.bf16.vlgmr.msra.gmra.mxu3 %v4645_v37  ;;  %899 = vmatpush.bf16.msrb.mxu2 %v4648_v49  ;;  %v4092_v33 = vld [vmem:[#allocation9 + $0x20] sm:$0xf0]  ;;  %v4069_v36 = vld [vmem:[#allocation7 + $0x28] sm:$0xf0]  ;;  %v3574_v38 = vld [vmem:[#allocation9] sm:$0xf]  ;;  %v3483_v39 = vor.u32 %v4064_v29, %v3480_v31 }
  0x40   :  { %912 = vmatpush.bf16.msrb.mxu3 %v4677_v26  ;;  %v4681_v34 = vor.u32 %v4092_v33, %v3586_v32  ;;  %v3499_v40 = vor.u32 %v4069_v36, %v3498_v35  ;;  %v4089_v41 = vld [vmem:[#allocation9 + $0x8] sm:$0xf0]  ;;  %v4106_v42 = vld [vmem:[#allocation9 + $0x94] sm:$0xf]  ;;  %v3486_v45 = vld [vmem:[#allocation7 + $0x8] sm:$0xf] }
  0x41   :  { %642 = vmatpush.bf16.msrb.mxu0 %v3555_v43  ;;  %v3648_v43 = vld [vmem:[#allocation9 + $0x9c] sm:$0xf0]  ;;  %v4066_v46 = vld [vmem:[#allocation7 + $0x10] sm:$0xf0]  ;;  %v3666_v47 = vld [vmem:[#allocation9 + $0xb0] sm:$0xf]  ;;  %v4686_v50 = vor.u32 %v4089_v41, %v3574_v38 }
  0x42   :  { %671 = vmatpush.bf16.msrb.mxu1 %v3559_v48  ;;  %v4683_v44 = vor.u32 %v4106_v42, %v3648_v43  ;;  %v4111_v48 = vld [vmem:[#allocation9 + $0xb8] sm:$0xf0]  ;;  %v4694_v53 = vld [vmem:[%s5698_s0 + $0x10] sm:$0xff]  ;;  %v3654_v54 = vld [vmem:[#allocation9 + $0x98] sm:$0xf]  ;;  %v5713_v31 = vmov 0  }
  0x43   :  { %900 = vmatpush.bf16.msrb.mxu2 %v4654_v57  ;;  %v4689_v52 = vor.u32 %v4111_v48, %v3666_v47  ;;  %v4108_v55 = vld [vmem:[#allocation9 + $0xa0] sm:$0xf0]  ;;  %v3636_v59 = vld [vmem:[#allocation9 + $0x84] sm:$0xf0]  ;;  %v3642_v62 = vld [vmem:[#allocation9 + $0x80] sm:$0xf] }
  0x44   :  { %913 = vmatpush.bf16.msrb.mxu3 %v4683_v44  ;;  %v4703_v56 = vor.u32 %v4108_v55, %v3654_v54  ;;  %v4105_v63 = vld [vmem:[#allocation9 + $0x88] sm:$0xf0]  ;;  %v4100_v1 = vld [vmem:[#allocation9 + $0x64] sm:$0xf]  ;;  %v3624_v2 = vld [vmem:[#allocation9 + $0x6c] sm:$0xf0] }
  0x45   :  { %643 = vmatpush.bf16.msrb.mxu0 %v3543_v51  ;;  %v3487_v51 = vor.u32 %v4066_v46, %v3486_v45  ;;  %v3630_v3 = vld [vmem:[#allocation9 + $0x68] sm:$0xf]  ;;  %v4102_v4 = vld [vmem:[#allocation9 + $0x70] sm:$0xf0]  ;;  %v3618_v9 = vld [vmem:[#allocation9 + $0x50] sm:$0xf] }
  0x46   :  { %672 = vmatpush.bf16.msrb.mxu1 %v3547_v58  ;;  %v4103_v58 = vld [vmem:[#allocation9 + $0x7c] sm:$0xf]  ;;  %v3606_v13 = vld [vmem:[#allocation9 + $0x38] sm:$0xf]  ;;  %v4096_v15 = vld [vmem:[#allocation9 + $0x40] sm:$0xf0] }
  0x47   :  { %901 = vmatpush.bf16.msrb.mxu2 %v4657_v61  ;;  %v4706_v60 = vor.u32 %v4103_v58, %v3636_v59  ;;  %v4099_v10 = vld [vmem:[#allocation9 + $0x58] sm:$0xf0]  ;;  %v4737_v16 = vor.u32 %v4096_v15, %v3606_v13  ;;  %v3612_v18 = vld [vmem:[#allocation9 + $0x54] sm:$0xf0]  ;;  %v3594_v19 = vld [vmem:[#allocation9 + $0x20] sm:$0xf] }
  0x48   :  { %v4729_v12 = vld [vmem:[%s5698_s0 + $0x18] sm:$0xff]  ;;  %v4094_v23 = vld [vmem:[#allocation9 + $0x34] sm:$0xf]  ;;  %v3600_v24 = vld [vmem:[#allocation9 + $0x3c] sm:$0xf0] }
  0x49   :  { %644 = vmatpush.bf16.msrb.mxu0 %v3531_v0  ;;  %v4710_v0 = vor.u32 %v4105_v63, %v3642_v62  ;;  %914 = vmatpush.bf16.msrb.mxu3 %v4706_v60  ;;  %v3582_v27 = vld [vmem:[#allocation9 + $0x8] sm:$0xf]  ;;  %v4090_v28 = vld [vmem:[#allocation9 + $0x10] sm:$0xf0]  ;;  %v4746_v29 = vor.u32 %v4094_v23, %v3600_v24  ;;  %v4091_v32 = vld [vmem:[#allocation9 + $0x1c] sm:$0xf] }
  0x4a   :  { %673 = vmatpush.bf16.msrb.mxu1 %v3535_v5  ;;  %v4713_v5 = vor.u32 %v4100_v1, %v3624_v2  ;;  %v3588_v33 = vld [vmem:[#allocation9 + $0x24] sm:$0xf0]  ;;  %v4088_v35 = vld [vmem:[#allocation9 + $0x4] sm:$0xf]  ;;  %v3576_v38 = vld [vmem:[#allocation9 + $0xc] sm:$0xf0] }
  0x4b   :  { %902 = vmatpush.bf16.msrb.mxu2 %v4660_v6  ;;  %v4761_v36 = vor.u32 %v4091_v32, %v3588_v33  ;;  %v181_v45 = vld [vmem:[%s5701_s3] sm:$0x7] }
  0x4c   :  { %354 = vmatmul.bf16.gmra.mxu0 %v4665_v8  ;;  %v183_v46 = vperm.slane %v181_v45, 0  ;;  %v4836_v48 = vperm.slane %v181_v45, 1  ;;  %v4845_v59 = vperm.slane %v181_v45, 2 }
  0x4d   :  { %645 = vmatpush.bf16.msrb.mxu0 %v3519_v7  ;;  %383 = vmatmul.bf16.gmra.mxu1 %v4665_v8  ;;  %v4718_v7 = vor.u32 %v4102_v4, %v3630_v3 }
  0x4e   :  { %412 = vmatmul.bf16.gmra.mxu2 %v4665_v8  ;;  %674 = vmatpush.bf16.msrb.mxu1 %v3523_v17  ;;  %v4097_v17 = vld [vmem:[#allocation9 + $0x4c] sm:$0xf] }
  0x4f   :  { %625 = vmatmul.bf16.gmra.mxu3 %v4665_v8  ;;  %903 = vmatpush.bf16.msrb.mxu2 %v4669_v14  ;;  %v4740_v20 = vor.u32 %v4097_v17, %v3612_v18 }
  0x50   :  { %915 = vmatpush.bf16.msrb.mxu3 %v4713_v5 }
  0x51   :  { %646 = vmatpush.bf16.msrb.mxu0 %v3507_v11  ;;  %v4724_v11 = vor.u32 %v4099_v10, %v3618_v9 }
  0x52   :  { %675 = vmatpush.bf16.msrb.mxu1 %v3511_v30  ;;  %v4751_v30 = vor.u32 %v4090_v28, %v3582_v27 }
  0x53   :  { %904 = vmatpush.bf16.msrb.mxu2 %v4675_v25 }
  0x54   :  { %916 = vmatpush.bf16.msrb.mxu3 %v4740_v20 }
  0x55   :  { %647 = vmatpush.bf16.msrb.mxu0 %v3495_v21  ;;  %v4093_v21 = vld [vmem:[#allocation9 + $0x28] sm:$0xf0] }
  0x56   :  { %676 = vmatpush.bf16.msrb.mxu1 %v3499_v40  ;;  %v4743_v22 = vor.u32 %v4093_v21, %v3594_v19 }
  0x57   :  { %905 = vmatpush.bf16.msrb.mxu2 %v4681_v34 }
  0x58   :  { %917 = vmatpush.bf16.msrb.mxu3 %v4746_v29 }
  0x59   :  { %648 = vmatpush.bf16.msrb.mxu0 %v3483_v39  ;;  %v4766_v39 = vor.u32 %v4088_v35, %v3576_v38 }
  0x5a   :  { %677 = vmatpush.bf16.msrb.mxu1 %v3487_v51 }
  0x5b   :  { %906 = vmatpush.bf16.msrb.mxu2 %v4686_v50 }
  0x5c   :  { %359 = vmatmul.bf16.gmra.mxu0 %v4694_v53  ;;  %918 = vmatpush.bf16.msrb.mxu3 %v4761_v36 }
  0x5d   :  { %1019 = vmatpush.bf16.msra.mxu0 %v4677_v26  ;;  %388 = vmatmul.bf16.gmra.mxu1 %v4694_v53 }
  0x5e   :  { %1032 = vmatpush.bf16.msra.mxu1 %v4689_v52  ;;  %417 = vmatmul.bf16.gmra.mxu2 %v4694_v53 }
  0x5f   :  { %925 = vmatpush.bf16.msra.mxu2 %v4689_v52  ;;  %630 = vmatmul.bf16.gmra.mxu3 %v4694_v53 }
  0x60   :  { %919 = vmatpush.bf16.msrb.mxu3 %v4766_v39 }
  0x61   :  { %1020 = vmatpush.bf16.msra.mxu0 %v4683_v44 }
  0x62   :  { %1033 = vmatpush.bf16.msra.mxu1 %v4703_v56 }
  0x63   :  { %926 = vmatpush.bf16.msra.mxu2 %v4703_v56 }
  0x64   :  { %1006 = vmatpush.bf16.msra.mxu3 %v4648_v49 }
  0x65   :  { %1021 = vmatpush.bf16.msra.mxu0 %v4706_v60 }
  0x66   :  { %1034 = vmatpush.bf16.msra.mxu1 %v4710_v0 }
  0x67   :  { %927 = vmatpush.bf16.msra.mxu2 %v4710_v0 }
  0x68   :  { %1007 = vmatpush.bf16.msra.mxu3 %v4654_v57 }
  0x69   :  { %1022 = vmatpush.bf16.msra.mxu0 %v4713_v5 }
  0x6a   :  { %1035 = vmatpush.bf16.msra.mxu1 %v4718_v7 }
  0x6b   :  { %928 = vmatpush.bf16.msra.mxu2 %v4718_v7 }
  0x6c   :  { %364 = vmatmul.bf16.gmra.mxu0 %v4729_v12  ;;  %1008 = vmatpush.bf16.msra.mxu3 %v4657_v61 }
  0x6d   :  { %393 = vmatmul.bf16.gmra.mxu1 %v4729_v12  ;;  %1023 = vmatpush.bf16.msra.mxu0 %v4740_v20 }
  0x6e   :  { %1036 = vmatpush.bf16.msra.mxu1 %v4724_v11  ;;  %422 = vmatmul.bf16.gmra.mxu2 %v4729_v12 }
  0x6f   :  { %929 = vmatpush.bf16.msra.mxu2 %v4724_v11  ;;  %635 = vmatmul.bf16.gmra.mxu3 %v4729_v12 }
  0x70   :  { %1009 = vmatpush.bf16.msra.mxu3 %v4660_v6 }
  0x71   :  { %1024 = vmatpush.bf16.msra.mxu0 %v4746_v29 }
  0x72   :  { %1037 = vmatpush.bf16.msra.mxu1 %v4737_v16 }
  0x73   :  { %930 = vmatpush.bf16.msra.mxu2 %v4737_v16 }
  0x74   :  { %1010 = vmatpush.bf16.msra.mxu3 %v4669_v14 }
  0x75   :  { %1025 = vmatpush.bf16.msra.mxu0 %v4761_v36 }
  0x76   :  { %1038 = vmatpush.bf16.msra.mxu1 %v4743_v22 }
  0x77   :  { %931 = vmatpush.bf16.msra.mxu2 %v4743_v22 }
  0x78   :  { %1011 = vmatpush.bf16.msra.mxu3 %v4675_v25 }
  0x79   :  { %1026 = vmatpush.bf16.msra.mxu0 %v4766_v39 }
  0x7a   :  { %1039 = vmatpush.bf16.msra.mxu1 %v4751_v30 }
  0x7b   :  { %932 = vmatpush.bf16.msra.mxu2 %v4751_v30 }
  0x7c   :  { %649 = vmatmul.bf16.vlgmr.msrb.gmra.mxu0 %v4645_v37  ;;  %1012 = vmatpush.bf16.msra.mxu3 %v4681_v34 }
  0x7d   :  { %678 = vmatmul.bf16.vlgmr.msrb.gmra.mxu1 %v4645_v37  ;;  %1138 = vmatpush.bf16.msrb.mxu0 %v4689_v52 }
  0x7e   :  { %907 = vmatmul.bf16.vlgmr.msrb.gmra.mxu2 %v5713_v31  ;;  %1218 = vmatpush.bf16.msrb.mxu1 %v4648_v49 }
  0x7f   :  { %1112 = vmatpush.bf16.msrb.mxu2 %v4648_v49  ;;  %920 = vmatmul.bf16.vlgmr.msrb.gmra.mxu3 %v5713_v31 }
  0x80   :  { %1013 = vmatpush.bf16.msra.mxu3 %v4686_v50 }
  0x81   :  { %1139 = vmatpush.bf16.msrb.mxu0 %v4703_v56 }
  0x82   :  { %1219 = vmatpush.bf16.msrb.mxu1 %v4654_v57 }
  0x83   :  { %1113 = vmatpush.bf16.msrb.mxu2 %v4654_v57 }
  0x84   :  { %1125 = vmatpush.bf16.msrb.mxu3 %v4677_v26 }
  0x85   :  { %1140 = vmatpush.bf16.msrb.mxu0 %v4710_v0 }
  0x86   :  { %1220 = vmatpush.bf16.msrb.mxu1 %v4657_v61 }
  0x87   :  { %1114 = vmatpush.bf16.msrb.mxu2 %v4657_v61 }
  0x88   :  { %1126 = vmatpush.bf16.msrb.mxu3 %v4683_v44 }
  0x89   :  { %1141 = vmatpush.bf16.msrb.mxu0 %v4718_v7 }
  0x8a   :  { %1221 = vmatpush.bf16.msrb.mxu1 %v4660_v6 }
  0x8b   :  { %1115 = vmatpush.bf16.msrb.mxu2 %v4660_v6 }
  0x8c   :  { %654 = vmatmul.bf16.gmra.mxu0 %v4665_v8  ;;  %1127 = vmatpush.bf16.msrb.mxu3 %v4706_v60 }
  0x8d   :  { %683 = vmatmul.bf16.gmra.mxu1 %v4665_v8  ;;  %1142 = vmatpush.bf16.msrb.mxu0 %v4724_v11 }
  0x8e   :  { %933 = vmatmul.bf16.vlgmr.msra.gmra.mxu2 %v5713_v31  ;;  %1222 = vmatpush.bf16.msrb.mxu1 %v4669_v14 }
  0x8f   :  { %1116 = vmatpush.bf16.msrb.mxu2 %v4669_v14 }
  0x90   :  { %1128 = vmatpush.bf16.msrb.mxu3 %v4713_v5 }
  0x91   :  { %1143 = vmatpush.bf16.msrb.mxu0 %v4737_v16 }
  0x92   :  { %1223 = vmatpush.bf16.msrb.mxu1 %v4675_v25 }
  0x93   :  { %1117 = vmatpush.bf16.msrb.mxu2 %v4675_v25 }
  0x94   :  { %1129 = vmatpush.bf16.msrb.mxu3 %v4740_v20 }
  0x95   :  { %1144 = vmatpush.bf16.msrb.mxu0 %v4743_v22 }
  0x96   :  { %1224 = vmatpush.bf16.msrb.mxu1 %v4681_v34 }
  0x97   :  { %1118 = vmatpush.bf16.msrb.mxu2 %v4681_v34 }
  0x98   :  { %1130 = vmatpush.bf16.msrb.mxu3 %v4746_v29 }
  0x99   :  { %1145 = vmatpush.bf16.msrb.mxu0 %v4751_v30 }
  0x9a   :  { %1225 = vmatpush.bf16.msrb.mxu1 %v4686_v50 }
  0x9b   :  { %1119 = vmatpush.bf16.msrb.mxu2 %v4686_v50 }
  0x9c   :  { %659 = vmatmul.bf16.gmra.mxu0 %v4694_v53  ;;  %1131 = vmatpush.bf16.msrb.mxu3 %v4761_v36 }
  0x9d   :  { %688 = vmatmul.bf16.gmra.mxu1 %v4694_v53 }
  0x9f   :  { %1231 = vmatpush.bf16.msra.mxu2 %v4677_v26 }
  0xa0   :  { %1132 = vmatpush.bf16.msrb.mxu3 %v4766_v39 }
  0xa3   :  { %1232 = vmatpush.bf16.msra.mxu2 %v4683_v44 }
  0xa7   :  { %1233 = vmatpush.bf16.msra.mxu2 %v4706_v60 }
  0xab   :  { %1234 = vmatpush.bf16.msra.mxu2 %v4713_v5 }
  0xac   :  { %664 = vmatmul.bf16.gmra.mxu0 %v4729_v12 }
  0xad   :  { %693 = vmatmul.bf16.gmra.mxu1 %v4729_v12 }
  0xaf   :  { %1235 = vmatpush.bf16.msra.mxu2 %v4740_v20 }
  0xb3   :  { %1236 = vmatpush.bf16.msra.mxu2 %v4746_v29 }
  0xb7   :  { %1237 = vmatpush.bf16.msra.mxu2 %v4761_v36 }
  0xb9   :  { %v350_v37 = vpop.f32.mrf.mxu0 }
  0xba   :  { %v4823_v8 = vpop.f32.mrf.mxu1 }
  0xbb   :  { %1238 = vmatpush.bf16.msra.mxu2 %v4766_v39 }
  0xc1   :  { %v4827_v40 = vpop.f32.mrf.mxu2  ;;  %v352_v42 = vpop.f32.mrf.mxu0 }
  0xc2   :  { %v621_v41 = vpop.f32.mrf.mxu3  ;;  %v4829_v43 = vpop.f32.mrf.mxu1 }
  0xc9   :  { %v4834_v47 = vpop.f32.mrf.mxu2  ;;  %v355_v53 = vpop.f32.mrf.mxu0 }
  0xca   :  { %v4838_v51 = vpop.f32.mrf.mxu3  ;;  %v4840_v54 = vadd.f32 %v355_v53, %v183_v46  ;;  %v384_v55 = vpop.f32.mrf.mxu1 }
  0xcb   :  { %5715 = vst [vmem:[#allocation19_spill] sm:$0xff] %v4838_v51  ;;  %v4843_v58 = vadd.f32 %v384_v55, %v4836_v48 }
  0xd1   :  { %v413_v62 = vpop.f32.mrf.mxu2  ;;  %v357_v2 = vpop.f32.mrf.mxu0 }
  0xd2   :  { %v4848_v63 = vadd.f32 %v413_v62, %v4845_v59  ;;  %v626_v1 = vpop.f32.mrf.mxu3  ;;  %v386_v3 = vpop.f32.mrf.mxu1  ;;  %v358_v17 = vadd.f32 %v357_v2, %v183_v46  ;;  %v353_v62 = vadd.f32 %v352_v42, %v183_v46 }
  0xd9   :  { %v4850_v4 = vpop.f32.mrf.mxu2  ;;  %v360_v10 = vpop.f32.mrf.mxu0 }
  0xda   :  { %v4852_v9 = vpop.f32.mrf.mxu3  ;;  %v4854_v12 = vadd.f32 %v360_v10, %v183_v46  ;;  %v389_v13 = vpop.f32.mrf.mxu1 }
  0xdb   :  { %5716 = vst [vmem:[#allocation20_spill] sm:$0xff] %v4852_v9  ;;  %v4857_v15 = vadd.f32 %v389_v13, %v4836_v48 }
  0xe1   :  { %v418_v18 = vpop.f32.mrf.mxu2  ;;  %v362_v23 = vpop.f32.mrf.mxu0 }
  0xe2   :  { %v4860_v19 = vadd.f32 %v418_v18, %v4845_v59  ;;  %v631_v21 = vpop.f32.mrf.mxu3  ;;  %v363_v27 = vadd.f32 %v362_v23, %v183_v46  ;;  %v391_v28 = vpop.f32.mrf.mxu1 }
  0xe3   :  { %v4862_v24 = vadd.f32 %v631_v21, %v358_v17 }
  0xe4   :  { %5717 = vst [vmem:[#allocation21_spill] sm:$0xff] %v4860_v19  ;;  %v4864_v32 = vadd.f32 %v626_v1, %v363_v27 }
  0xe6   :  { %5718 = vst [vmem:[#allocation22_spill] sm:$0xff] %v4864_v32 }
  0xe9   :  { %v420_v33 = vpop.f32.mrf.mxu2  ;;  %v365_v38 = vpop.f32.mrf.mxu0 }
  0xea   :  { %v4866_v35 = vpop.f32.mrf.mxu3  ;;  %v4868_v45 = vadd.f32 %v365_v38, %v183_v46  ;;  %v394_v53 = vpop.f32.mrf.mxu1 }
  0xeb   :  { %v4871_v55 = vadd.f32 %v394_v53, %v4836_v48 }
  0xec   :  { %5719 = vst [vmem:[#allocation23_spill] sm:$0xff] %v4868_v45 }
  0xed   :  { %5720 = vst [vmem:[#allocation24_spill] sm:$0xff] %v4871_v55 }
  0xf1   :  { %v423_v2 = vpop.f32.mrf.mxu2  ;;  %v367_v17 = vpop.f32.mrf.mxu0 }
  0xf2   :  { %v4874_v10 = vadd.f32 %v423_v2, %v4845_v59  ;;  %v636_v13 = vpop.f32.mrf.mxu3  ;;  %v368_v1 = vadd.f32 %v367_v17, %v183_v46  ;;  %v396_v21 = vpop.f32.mrf.mxu1 }
  0xf3   :  { %v4876_v18 = vadd.f32 %v636_v13, %v353_v62  ;;  %v397_v27 = vadd.f32 %v396_v21, %v4836_v48  ;;  %v421_v21 = vadd.f32 %v420_v33, %v4845_v59  ;;  %v387_v33 = vadd.f32 %v386_v3, %v4836_v48 }
  0xf4   :  { %5721 = vst [vmem:[#allocation25_spill] sm:$0xff] %v4874_v10  ;;  %v4878_v23 = vadd.f32 %v621_v41, %v368_v1  ;;  %v351_v10 = vadd.f32 %v350_v37, %v183_v46  ;;  %v382_v3 = vadd.f32 %v4829_v43, %v4836_v48 }
  0xf6   :  { %5722 = vst [vmem:[#allocation26_spill] sm:$0xff] %v4878_v23 }
  0xf9   :  { %v425_v38 = vpop.f32.mrf.mxu2  ;;  %v650_v53 = vpop.f32.mrf.mxu0 }
  0xfa   :  { %v426_v31 = vadd.f32 %v425_v38, %v4845_v59  ;;  %v4882_v51 = vadd.f32 %v650_v53, %v397_v27  ;;  %v679_v42 = vpop.f32.mrf.mxu1  ;;  %v638_v2 = vpop.f32.mrf.mxu3  ;;  %v392_v38 = vadd.f32 %v391_v28, %v4836_v48 }
  0xfb   :  { %v768_v55 = vadd.f32 %v638_v2, %v351_v10 }
  0xfc   :  { %5723 = vst [vmem:[#allocation27_spill] sm:$0xff] %v4882_v51  ;;  %v4884_v45 = vadd.f32 %v679_v42, %v426_v31 }
  0xfe   :  { %5724 = vst [vmem:[#allocation28_spill] sm:$0xff] %v4884_v45 }
 0x101   :  { %v908_v62 = vpop.f32.mrf.mxu2  ;;  %v4886_v17 = vpop.f32.mrf.mxu0 }
 0x102   :  { %v938_v13 = vadd.f32 %v908_v62, %v768_v55  ;;  %5725 = vst [vmem:[#allocation29_spill] sm:$0xff] %v4886_v17  ;;  %v4888_v41 = vpop.f32.mrf.mxu1  ;;  %v921_v37 = vpop.f32.mrf.mxu3 }
 0x103   :  { %5726 = vst [vmem:[#allocation30_spill] sm:$0xff] %v4888_v41 }
 0x104   :  { %v3668_v1 = vmul.f32 -1.442695, %v938_v13 }
 0x106   :  { %4208 = vpow2.f32 %v3668_v1  ;;  %v416_v1 = vadd.f32 %v4850_v4, %v4845_v59  ;;  %v411_v4 = vadd.f32 %v4834_v47, %v4845_v59 }
 0x109   :  { %v910_v27 = vpop.f32.mrf.mxu2  ;;  %v655_v53 = vpop.f32.mrf.mxu0 }
 0x10a   :  { %v4892_v51 = vadd.f32 %v655_v53, %v392_v38  ;;  %v684_v31 = vpop.f32.mrf.mxu1  ;;  %v923_v13 = vpop.f32.mrf.mxu3 }
 0x10b   :  { %v4894_v42 = vadd.f32 %v684_v31, %v421_v21 }
 0x10c   :  { %5727 = vst [vmem:[#allocation31_spill] sm:$0xff] %v4892_v51  ;;  %v4209_v46 = vpop.eup %4208 }
 0x10d   :  { %5728 = vst [vmem:[#allocation32_spill] sm:$0xff] %v4894_v42  ;;  %v942_v55 = vadd.f32 1.0, %v4209_v46 }
 0x10f   :  { %4210 = vrcp.f32 %v942_v55  ;;  %vm948_vm1 = vweird.f32 %v942_v55 }
 0x111   :  { %v934_v10 = vpop.f32.mrf.mxu2  ;;  %v4896_v2 = vpop.f32.mrf.mxu0 }
 0x112   :  { %v4898_v62 = vpop.f32.mrf.mxu1 }
 0x113   :  { %5729 = vst [vmem:[#allocation33_spill] sm:$0xff] %v4898_v62 }
 0x115   :  { %v4211_v27 = vpop.eup %4210 }
 0x116   :  { %v944_v46 = vmul.f32 %v4211_v27, %v942_v55  ;;  %vm949_vm0 = vweird.f32 %v4211_v27 }
 0x117   :  { %vm950_vm2 = vmor %vm948_vm1, %vm949_vm0 }
 0x118   :  { %v945_v45 = vsub.f32 1.0, %v944_v46  ;;  %v4920_v46 = vld [vmem:[%s5702_s4] ss:$0 sm:$0xff] }
 0x119   :  { %v936_v28 = vpop.f32.mrf.mxu2  ;;  %v660_v38 = vpop.f32.mrf.mxu0  ;;  %v981_v47 = vadd.f32 %v4920_v46, %v934_v10 }
 0x11a   :  { %v4903_v21 = vadd.f32 %v660_v38, %v387_v33  ;;  %v689_v53 = vpop.f32.mrf.mxu1  ;;  %v946_v13 = vmul.f32 %v4211_v27, %v945_v45  ;;  %v954_v38 = vand.u32 2147483648, %v942_v55 }
 0x11b   :  { %v4905_v31 = vadd.f32 %v689_v53, %v416_v1  ;;  %v952_v53 = vand.u32 2147483647, %v942_v55  ;;  %v409_v55 = vadd.f32 %v4827_v40, %v4845_v59 }
 0x11c   :  { %v947_v28 = vadd.f32 %v4211_v27, %v946_v13  ;;  %v955_v42 = vor.u32 1.1754944e-38, %v954_v38  ;;  %v380_v13 = vadd.f32 %v4823_v8, %v4836_v48 }
 0x11d   :  { %vm953_vm3 = vcmp.eq.f32.partialorder %v952_v53, 8.507059e+37 }
 0x11e   :  { %v951_v43 = vsel %vm950_vm2, %v4211_v27, %v947_v28 }
 0x121   :  { %v4907_v23 = vpop.f32.mrf.mxu0 }
 0x122   :  { %v4909_v41 = vpop.f32.mrf.mxu1 }
 0x129   :  { %v665_v33 = vpop.f32.mrf.mxu0 }
 0x12a   :  { %v4915_v17 = vadd.f32 %v665_v33, %v382_v3  ;;  %v694_v1 = vpop.f32.mrf.mxu1  ;;  %v956_v3 = vsel %vm953_vm3, %v955_v42, %v951_v43 }
 0x12b   :  { %v4922_v45 = vadd.f32 %v694_v1, %v411_v4  ;;  %v982_v62 = vmul.f32 %v981_v47, %v956_v3 }
 0x131   :  { %v667_v33 = vpop.f32.mrf.mxu0 }
 0x132   :  { %v769_v32 = vadd.f32 %v667_v33, %v380_v13  ;;  %v696_v51 = vpop.f32.mrf.mxu1 }
 0x133   :  { %v770_v19 = vadd.f32 %v696_v51, %v409_v55 }
 0x134   :  { %v958_v4 = vadd.f32 %v921_v37, %v769_v32 }
 0x135   :  { %v983_v1 = vadd.f32 %v982_v62, %v770_v19 }
 0x136   :  { %v3669_v9 = vmul.f32 -1.442695, %v958_v4 }
 0x138   :  { %4212 = vpow2.f32 %v3669_v9 }
 0x13e   :  { %v4213_v27 = vpop.eup %4212 }
 0x13f   :  { %v962_v28 = vadd.f32 1.0, %v4213_v27 }
 0x141   :  { %4214 = vrcp.f32 %v962_v28  ;;  %v974_v8 = vand.u32 2147483648, %v962_v28  ;;  %v972_v42 = vand.u32 2147483647, %v962_v28  ;;  %vm968_vm5 = vweird.f32 %v962_v28 }
 0x142   :  { %4216 = vtanh.f32 %v983_v1 }
 0x143   :  { %v975_v59 = vor.u32 1.1754944e-38, %v974_v8  ;;  %vm973_vm7 = vcmp.eq.f32.partialorder %v972_v42, 8.507059e+37 }
 0x147   :  { %v4215_v10 = vpop.eup %4214 }
 0x148   :  { %v964_v38 = vmul.f32 %v4215_v10, %v962_v28  ;;  %vm969_vm4 = vweird.f32 %v4215_v10  ;;  %v4217_v9 = vpop.eup %4216 }
 0x149   :  { %vm970_vm6 = vmor %vm968_vm5, %vm969_vm4 }
 0x14a   :  { %v965_v53 = vsub.f32 1.0, %v964_v38 }
 0x14c   :  { %v966_v48 = vmul.f32 %v4215_v10, %v965_v53 }
 0x14e   :  { %v967_v40 = vadd.f32 %v4215_v10, %v966_v48 }
 0x150   :  { %v971_v51 = vsel %vm970_vm6, %v4215_v10, %v967_v40 }
 0x151   :  { %v976_v19 = vsel %vm973_vm7, %v975_v59, %v971_v51 }
 0x152   :  { %v985_v32 = vsub.f32 1.0, %v976_v19  ;;  %v987_v62 = vmul.f32 0.0, %v976_v19 }
 0x154   :  { %v986_v37 = vmul.f32 %v4217_v9, %v985_v32 }
 0x156   :  { %v988_v43 = vadd.f32 %v987_v62, %v986_v37 }
 0x158   :  { %v4929_v47 = vpack.c.bf16 %v988_v43, %v988_v43 }
 0x15a   :  { %990 = vst [vmem:[#allocation4] sm:$0xf] %v4929_v47  ;;  %1014 = vmatmul.bf16.vlgmr.msra.gmra.mxu3 %v4929_v47  ;;  %1027 = vmatmul.bf16.vlgmr.msra.gmra.mxu0 %v4929_v47 }
 0x15b   :  { %1040 = vmatmul.bf16.vlgmr.msra.gmra.mxu1 %v4929_v47  ;;  %1244 = vmatpush.bf16.msra.mxu3 %v4689_v52 }
 0x15c   :  { %1322 = vmatpush.bf16.msra.mxu0 %v4648_v49  ;;  %1335 = vmatpush.bf16.msra.mxu1 %v4677_v26 }
 0x15f   :  { %1245 = vmatpush.bf16.msra.mxu3 %v4703_v56 }
 0x160   :  { %1323 = vmatpush.bf16.msra.mxu0 %v4654_v57  ;;  %1336 = vmatpush.bf16.msra.mxu1 %v4683_v44 }
 0x163   :  { %1246 = vmatpush.bf16.msra.mxu3 %v4710_v0 }
 0x164   :  { %1324 = vmatpush.bf16.msra.mxu0 %v4657_v61  ;;  %1337 = vmatpush.bf16.msra.mxu1 %v4706_v60 }
 0x167   :  { %1247 = vmatpush.bf16.msra.mxu3 %v4718_v7 }
 0x168   :  { %1325 = vmatpush.bf16.msra.mxu0 %v4660_v6  ;;  %1338 = vmatpush.bf16.msra.mxu1 %v4713_v5 }
 0x16b   :  { %1248 = vmatpush.bf16.msra.mxu3 %v4724_v11 }
 0x16c   :  { %1326 = vmatpush.bf16.msra.mxu0 %v4669_v14  ;;  %1339 = vmatpush.bf16.msra.mxu1 %v4740_v20 }
 0x16f   :  { %1249 = vmatpush.bf16.msra.mxu3 %v4737_v16 }
 0x170   :  { %1327 = vmatpush.bf16.msra.mxu0 %v4675_v25  ;;  %1340 = vmatpush.bf16.msra.mxu1 %v4746_v29 }
 0x173   :  { %1250 = vmatpush.bf16.msra.mxu3 %v4743_v22 }
 0x174   :  { %1328 = vmatpush.bf16.msra.mxu0 %v4681_v34  ;;  %1341 = vmatpush.bf16.msra.mxu1 %v4761_v36 }
 0x177   :  { %1251 = vmatpush.bf16.msra.mxu3 %v4751_v30 }
 0x178   :  { %1329 = vmatpush.bf16.msra.mxu0 %v4686_v50  ;;  %1342 = vmatpush.bf16.msra.mxu1 %v4766_v39 }
 0x1d7   :  { %v1028_v13 = vpop.f32.mrf.mxu0 }
 0x1d8   :  { %v1065_v3 = vadd.f32 %v1028_v13, %v4915_v17  ;;  %v1041_v55 = vpop.f32.mrf.mxu1 }
 0x1da   :  { %v3671_v33 = vmul.f32 -1.442695, %v1065_v3  ;;  %v1091_v3 = vunpack.c.l.bf16 %v4929_v47 }
 0x1dc   :  { %4218 = vpow2.f32 %v3671_v33 }
 0x1dd   :  { %v1015_v4 = vpop.f32.mrf.mxu3 }
 0x1de   :  { %v1045_v1 = vadd.f32 %v1015_v4, %v4876_v18 }
 0x1df   :  { %v1030_v27 = vpop.f32.mrf.mxu0 }
 0x1e0   :  { %v3670_v28 = vmul.f32 -1.442695, %v1045_v1  ;;  %v1043_v10 = vpop.f32.mrf.mxu1 }
 0x1e2   :  { %v4219_v38 = vpop.eup %4218  ;;  %4220 = vpow2.f32 %v3670_v28 }
 0x1e3   :  { %v1069_v53 = vadd.f32 1.0, %v4219_v38 }
 0x1e5   :  { %4222 = vrcp.f32 %v1069_v53  ;;  %v1017_v8 = vpop.f32.mrf.mxu3  ;;  %v1081_v51 = vand.u32 2147483648, %v1069_v53  ;;  %v1079_v32 = vand.u32 2147483647, %v1069_v53  ;;  %vm1075_vm9 = vweird.f32 %v1069_v53 }
 0x1e7   :  { %v1082_v62 = vor.u32 1.1754944e-38, %v1081_v51  ;;  %vm1080_vm11 = vcmp.eq.f32.partialorder %v1079_v32, 8.507059e+37 }
 0x1e8   :  { %v4221_v48 = vpop.eup %4220 }
 0x1e9   :  { %v1049_v42 = vadd.f32 1.0, %v4221_v48 }
 0x1eb   :  { %v4223_v40 = vpop.eup %4222  ;;  %4224 = vrcp.f32 %v1049_v42  ;;  %v1061_v33 = vand.u32 2147483648, %v1049_v42  ;;  %v1059_v27 = vand.u32 2147483647, %v1049_v42  ;;  %vm1055_vm13 = vweird.f32 %v1049_v42 }
 0x1ec   :  { %v1071_v59 = vmul.f32 %v4223_v40, %v1069_v53  ;;  %vm1076_vm8 = vweird.f32 %v4223_v40  ;;  %v1085_v53 = vadd.f32 %v4920_v46, %v1041_v55  ;;  %v1109_v55 = vadd.f32 %v4866_v35, %v4840_v54 }
 0x1ed   :  { %vm1077_vm10 = vmor %vm1075_vm9, %vm1076_vm8  ;;  %v1062_v38 = vor.u32 1.1754944e-38, %v1061_v33  ;;  %vm1060_vm15 = vcmp.eq.f32.partialorder %v1059_v27, 8.507059e+37 }
 0x1ee   :  { %v1072_v17 = vsub.f32 1.0, %v1071_v59 }
 0x1f0   :  { %v1073_v19 = vmul.f32 %v4223_v40, %v1072_v17 }
 0x1f1   :  { %v4225_v9 = vpop.eup %4224 }
 0x1f2   :  { %v1074_v18 = vadd.f32 %v4223_v40, %v1073_v19  ;;  %v1051_v37 = vmul.f32 %v4225_v9, %v1049_v42  ;;  %vm1056_vm12 = vweird.f32 %v4225_v9  ;;  %v1110_v42 = vadd.f32 %v4907_v23, %v4843_v58 }
 0x1f3   :  { %vm1057_vm14 = vmor %vm1055_vm13, %vm1056_vm12 }
 0x1f4   :  { %v1052_v43 = vsub.f32 1.0, %v1051_v37  ;;  %v1078_v13 = vsel %vm1077_vm10, %v4223_v40, %v1074_v18 }
 0x1f5   :  { %v1083_v4 = vsel %vm1080_vm11, %v1082_v62, %v1078_v13 }
 0x1f6   :  { %v1053_v1 = vmul.f32 %v4225_v9, %v1052_v43  ;;  %v1092_v28 = vmul.f32 %v1091_v3, %v1083_v4  ;;  %v1089_v47 = vsub.f32 1.0, %v1083_v4 }
 0x1f8   :  { %v1054_v10 = vadd.f32 %v4225_v9, %v1053_v1 }
 0x1fa   :  { %v1058_v8 = vsel %vm1057_vm14, %v4225_v9, %v1054_v10 }
 0x1fb   :  { %v1063_v48 = vsel %vm1060_vm15, %v1062_v38, %v1058_v8 }
 0x1fc   :  { %v1086_v59 = vmul.f32 %v1085_v53, %v1063_v48 }
 0x1fe   :  { %v1087_v40 = vadd.f32 %v1086_v59, %v4922_v45 }
 0x200   :  { %4226 = vtanh.f32 %v1087_v40 }
 0x206   :  { %v4227_v17 = vpop.eup %4226 }
 0x207   :  { %v1090_v51 = vmul.f32 %v4227_v17, %v1089_v47 }
 0x209   :  { %v1093_v19 = vadd.f32 %v1092_v28, %v1090_v51 }
 0x20b   :  { %v4964_v32 = vpack.c.bf16 %v1093_v19, %v1093_v19 }
 0x20d   :  { %1096 = vst [vmem:[#allocation4 + $0x4] sm:$0xf] %v4964_v32  ;;  %1120 = vmatmul.bf16.vlgmr.msrb.gmra.mxu2 %v4964_v32  ;;  %1133 = vmatmul.bf16.vlgmr.msrb.gmra.mxu3 %v4964_v32 }
 0x20e   :  { %1146 = vmatmul.bf16.vlgmr.msrb.gmra.mxu0 %v4964_v32  ;;  %1348 = vmatpush.bf16.msrb.mxu2 %v4689_v52 }
 0x20f   :  { %1426 = vmatpush.bf16.msrb.mxu3 %v4648_v49  ;;  %1439 = vmatpush.bf16.msrb.mxu0 %v4677_v26 }
 0x212   :  { %1349 = vmatpush.bf16.msrb.mxu2 %v4703_v56 }
 0x213   :  { %1427 = vmatpush.bf16.msrb.mxu3 %v4654_v57  ;;  %1440 = vmatpush.bf16.msrb.mxu0 %v4683_v44 }
 0x216   :  { %1350 = vmatpush.bf16.msrb.mxu2 %v4710_v0 }
 0x217   :  { %1428 = vmatpush.bf16.msrb.mxu3 %v4657_v61  ;;  %1441 = vmatpush.bf16.msrb.mxu0 %v4706_v60 }
 0x21a   :  { %1351 = vmatpush.bf16.msrb.mxu2 %v4718_v7 }
 0x21b   :  { %1429 = vmatpush.bf16.msrb.mxu3 %v4660_v6  ;;  %1442 = vmatpush.bf16.msrb.mxu0 %v4713_v5 }
 0x21e   :  { %1352 = vmatpush.bf16.msrb.mxu2 %v4724_v11 }
 0x21f   :  { %1430 = vmatpush.bf16.msrb.mxu3 %v4669_v14  ;;  %1443 = vmatpush.bf16.msrb.mxu0 %v4740_v20 }
 0x222   :  { %1353 = vmatpush.bf16.msrb.mxu2 %v4737_v16 }
 0x223   :  { %1431 = vmatpush.bf16.msrb.mxu3 %v4675_v25  ;;  %1444 = vmatpush.bf16.msrb.mxu0 %v4746_v29 }
 0x226   :  { %1354 = vmatpush.bf16.msrb.mxu2 %v4743_v22 }
 0x227   :  { %1432 = vmatpush.bf16.msrb.mxu3 %v4681_v34  ;;  %1445 = vmatpush.bf16.msrb.mxu0 %v4761_v36 }
 0x22a   :  { %1355 = vmatpush.bf16.msrb.mxu2 %v4751_v30 }
 0x22b   :  { %1433 = vmatpush.bf16.msrb.mxu3 %v4686_v50  ;;  %1446 = vmatpush.bf16.msrb.mxu0 %v4766_v39 }
 0x28b   :  { %v1147_v45 = vpop.f32.mrf.mxu0 }
 0x290   :  { %v1121_v9 = vpop.f32.mrf.mxu2  ;;  %v1134_v18 = vpop.f32.mrf.mxu3 }
 0x291   :  { %v1151_v37 = vadd.f32 %v1121_v9, %v1109_v55  ;;  %v1171_v62 = vadd.f32 %v1134_v18, %v1110_v42  ;;  %v1191_v42 = vadd.f32 %v4920_v46, %v1147_v45 }
 0x293   :  { %v3672_v43 = vmul.f32 -1.442695, %v1151_v37  ;;  %v3673_v13 = vmul.f32 -1.442695, %v1171_v62  ;;  %v1149_v3 = vpop.f32.mrf.mxu0 }
 0x295   :  { %4228 = vpow2.f32 %v3672_v43  ;;  %v1197_v43 = vunpack.c.l.bf16 %v4964_v32 }
 0x296   :  { %4230 = vpow2.f32 %v3673_v13  ;;  %v1111_v13 = vadd.f32 %v4909_v41, %v4848_v63 }
 0x298   :  { %v1123_v33 = vpop.f32.mrf.mxu2  ;;  %v1136_v4 = vpop.f32.mrf.mxu3 }
 0x29b   :  { %v4229_v1 = vpop.eup %4228 }
 0x29c   :  { %v4231_v27 = vpop.eup %4230  ;;  %v1155_v28 = vadd.f32 1.0, %v4229_v1 }
 0x29d   :  { %v1175_v10 = vadd.f32 1.0, %v4231_v27 }
 0x29e   :  { %4232 = vrcp.f32 %v1155_v28  ;;  %v1167_v53 = vand.u32 2147483648, %v1155_v28  ;;  %v1165_v59 = vand.u32 2147483647, %v1155_v28  ;;  %vm1161_vm2 = vweird.f32 %v1155_v28 }
 0x29f   :  { %4234 = vrcp.f32 %v1175_v10  ;;  %v1187_v40 = vand.u32 2147483648, %v1175_v10  ;;  %v1185_v17 = vand.u32 2147483647, %v1175_v10  ;;  %vm1181_vm4 = vweird.f32 %v1175_v10 }
 0x2a0   :  { %v1168_v19 = vor.u32 1.1754944e-38, %v1167_v53  ;;  %vm1166_vm5 = vcmp.eq.f32.partialorder %v1165_v59, 8.507059e+37 }
 0x2a1   :  { %v1188_v18 = vor.u32 1.1754944e-38, %v1187_v40  ;;  %vm1186_vm7 = vcmp.eq.f32.partialorder %v1185_v17, 8.507059e+37 }
 0x2a4   :  { %v4233_v54 = vpop.eup %4232 }
 0x2a5   :  { %v4235_v35 = vpop.eup %4234  ;;  %v1157_v58 = vmul.f32 %v4233_v54, %v1155_v28  ;;  %vm1162_vm0 = vweird.f32 %v4233_v54 }
 0x2a6   :  { %v1177_v23 = vmul.f32 %v4235_v35, %v1175_v10  ;;  %vm1182_vm1 = vweird.f32 %v4235_v35  ;;  %vm1163_vm3 = vmor %vm1161_vm2, %vm1162_vm0 }
 0x2a7   :  { %v1158_v38 = vsub.f32 1.0, %v1157_v58  ;;  %vm1183_vm6 = vmor %vm1181_vm4, %vm1182_vm1 }
 0x2a8   :  { %v1178_v8 = vsub.f32 1.0, %v1177_v23 }
 0x2a9   :  { %v1159_v48 = vmul.f32 %v4233_v54, %v1158_v38 }
 0x2aa   :  { %v1179_v47 = vmul.f32 %v4235_v35, %v1178_v8 }
 0x2ab   :  { %v1160_v51 = vadd.f32 %v4233_v54, %v1159_v48 }
 0x2ac   :  { %v1180_v55 = vadd.f32 %v4235_v35, %v1179_v47 }
 0x2ad   :  { %v1164_v9 = vsel %vm1163_vm3, %v4233_v54, %v1160_v51 }
 0x2ae   :  { %v1169_v37 = vsel %vm1166_vm5, %v1168_v19, %v1164_v9  ;;  %v1184_v62 = vsel %vm1183_vm6, %v4235_v35, %v1180_v55 }
 0x2af   :  { %v1192_v3 = vmul.f32 %v1191_v42, %v1169_v37  ;;  %v1189_v33 = vsel %vm1186_vm7, %v1188_v18, %v1184_v62 }
 0x2b0   :  { %v1198_v4 = vmul.f32 %v1197_v43, %v1189_v33  ;;  %v1195_v27 = vsub.f32 1.0, %v1189_v33 }
 0x2b1   :  { %v1193_v1 = vadd.f32 %v1192_v3, %v1111_v13 }
 0x2b3   :  { %4236 = vtanh.f32 %v1193_v1 }
 0x2b9   :  { %v4237_v28 = vpop.eup %4236 }
 0x2ba   :  { %v1196_v45 = vmul.f32 %v4237_v28, %v1195_v27 }
 0x2bc   :  { %v1199_v10 = vadd.f32 %v1198_v4, %v1196_v45 }
 0x2be   :  { %v5002_v54 = vpack.c.bf16 %v1199_v10, %v1199_v10 }
 0x2c0   :  { %1202 = vst [vmem:[#allocation4 + $0x8] sm:$0xf] %v5002_v54  ;;  %1226 = vmatmul.bf16.vlgmr.msrb.gmra.mxu1 %v5002_v54  ;;  %1239 = vmatmul.bf16.vlgmr.msra.gmra.mxu2 %v5002_v54 }
 0x2c1   :  { %1252 = vmatmul.bf16.vlgmr.msra.gmra.mxu3 %v5002_v54  ;;  %1452 = vmatpush.bf16.msrb.mxu1 %v4689_v52 }
 0x2c2   :  { %1530 = vmatpush.bf16.msra.mxu2 %v4648_v49  ;;  %1543 = vmatpush.bf16.msra.mxu3 %v4677_v26 }
 0x2c5   :  { %1453 = vmatpush.bf16.msrb.mxu1 %v4703_v56 }
 0x2c6   :  { %1531 = vmatpush.bf16.msra.mxu2 %v4654_v57  ;;  %1544 = vmatpush.bf16.msra.mxu3 %v4683_v44 }
 0x2c9   :  { %1454 = vmatpush.bf16.msrb.mxu1 %v4710_v0 }
 0x2ca   :  { %1532 = vmatpush.bf16.msra.mxu2 %v4657_v61  ;;  %1545 = vmatpush.bf16.msra.mxu3 %v4706_v60 }
 0x2cd   :  { %1455 = vmatpush.bf16.msrb.mxu1 %v4718_v7 }
 0x2ce   :  { %1533 = vmatpush.bf16.msra.mxu2 %v4660_v6  ;;  %1546 = vmatpush.bf16.msra.mxu3 %v4713_v5 }
 0x2d1   :  { %1456 = vmatpush.bf16.msrb.mxu1 %v4724_v11 }
 0x2d2   :  { %1534 = vmatpush.bf16.msra.mxu2 %v4669_v14  ;;  %1547 = vmatpush.bf16.msra.mxu3 %v4740_v20 }
 0x2d5   :  { %1457 = vmatpush.bf16.msrb.mxu1 %v4737_v16 }
 0x2d6   :  { %1535 = vmatpush.bf16.msra.mxu2 %v4675_v25  ;;  %1548 = vmatpush.bf16.msra.mxu3 %v4746_v29 }
 0x2d9   :  { %1458 = vmatpush.bf16.msrb.mxu1 %v4743_v22 }
 0x2da   :  { %1536 = vmatpush.bf16.msra.mxu2 %v4681_v34  ;;  %1549 = vmatpush.bf16.msra.mxu3 %v4761_v36 }
 0x2dd   :  { %1459 = vmatpush.bf16.msrb.mxu1 %v4751_v30 }
 0x2de   :  { %1537 = vmatpush.bf16.msra.mxu2 %v4686_v50  ;;  %1550 = vmatpush.bf16.msra.mxu3 %v4766_v39 }
 0x33d   :  { %v1227_v63 = vpop.f32.mrf.mxu1 }
 0x33e   :  { %v1257_v41 = vadd.f32 %v1227_v63, %v4862_v24 }
 0x340   :  { %v3674_v32 = vmul.f32 -1.442695, %v1257_v41 }
 0x342   :  { %4238 = vpow2.f32 %v3674_v32  ;;  %v1303_v32 = vunpack.c.l.bf16 %v5002_v54 }
 0x343   :  { %v1240_v35 = vpop.f32.mrf.mxu2 }
 0x344   :  { %v1277_v58 = vadd.f32 %v1240_v35, %v4903_v21  ;;  %v1253_v23 = vpop.f32.mrf.mxu3 }
 0x345   :  { %v1229_v38 = vpop.f32.mrf.mxu1  ;;  %v1297_v3 = vadd.f32 %v4920_v46, %v1253_v23 }
 0x346   :  { %v3675_v53 = vmul.f32 -1.442695, %v1277_v58 }
 0x348   :  { %v4239_v8 = vpop.eup %4238  ;;  %4240 = vpow2.f32 %v3675_v53 }
 0x349   :  { %v1261_v48 = vadd.f32 1.0, %v4239_v8 }
 0x34b   :  { %4242 = vrcp.f32 %v1261_v48  ;;  %v1242_v59 = vpop.f32.mrf.mxu2  ;;  %v1273_v55 = vand.u32 2147483648, %v1261_v48  ;;  %v1271_v9 = vand.u32 2147483647, %v1261_v48  ;;  %vm1267_vm9 = vweird.f32 %v1261_v48 }
 0x34c   :  { %v1255_v40 = vpop.f32.mrf.mxu3 }
 0x34d   :  { %v1274_v62 = vor.u32 1.1754944e-38, %v1273_v55  ;;  %vm1272_vm11 = vcmp.eq.f32.partialorder %v1271_v9, 8.507059e+37 }
 0x34e   :  { %v4241_v47 = vpop.eup %4240 }
 0x34f   :  { %v1281_v17 = vadd.f32 1.0, %v4241_v47 }
 0x351   :  { %v4243_v51 = vpop.eup %4242  ;;  %4244 = vrcp.f32 %v1281_v17  ;;  %v1293_v33 = vand.u32 2147483648, %v1281_v17  ;;  %v1291_v27 = vand.u32 2147483647, %v1281_v17  ;;  %vm1287_vm13 = vweird.f32 %v1281_v17 }
 0x352   :  { %v1263_v19 = vmul.f32 %v4243_v51, %v1261_v48  ;;  %vm1268_vm8 = vweird.f32 %v4243_v51 }
 0x353   :  { %vm1269_vm10 = vmor %vm1267_vm9, %vm1268_vm8  ;;  %v1294_v63 = vor.u32 1.1754944e-38, %v1293_v33  ;;  %vm1292_vm15 = vcmp.eq.f32.partialorder %v1291_v27, 8.507059e+37  ;;  %v5731_v33 = vld [vmem:[#allocation21_spill] sm:$0xff] }
 0x354   :  { %v1264_v24 = vsub.f32 1.0, %v1263_v19 }
 0x356   :  { %v1265_v42 = vmul.f32 %v4243_v51, %v1264_v24 }
 0x357   :  { %v4245_v21 = vpop.eup %4244 }
 0x358   :  { %v1283_v18 = vmul.f32 %v4245_v21, %v1281_v17  ;;  %v1266_v37 = vadd.f32 %v4243_v51, %v1265_v42  ;;  %vm1288_vm12 = vweird.f32 %v4245_v21 }
 0x359   :  { %vm1289_vm14 = vmor %vm1287_vm13, %vm1288_vm12 }
 0x35a   :  { %v1284_v43 = vsub.f32 1.0, %v1283_v18  ;;  %v1270_v13 = vsel %vm1269_vm10, %v4243_v51, %v1266_v37 }
 0x35b   :  { %v1275_v4 = vsel %vm1272_vm11, %v1274_v62, %v1270_v13 }
 0x35c   :  { %v1285_v1 = vmul.f32 %v4245_v21, %v1284_v43  ;;  %v1298_v28 = vmul.f32 %v1297_v3, %v1275_v4  ;;  %v5732_v4 = vld [vmem:[#allocation33_spill] sm:$0xff] }
 0x35e   :  { %v1286_v45 = vadd.f32 %v4245_v21, %v1285_v1  ;;  %v1299_v10 = vadd.f32 %v1298_v28, %v4905_v31  ;;  %v1321_v1 = vadd.f32 %v5732_v4, %v5731_v33  ;;  %v3702_v4 = vld [vmem:[#allocation10] sm:$0xf] }
 0x360   :  { %v1290_v41 = vsel %vm1289_vm14, %v4245_v21, %v1286_v45  ;;  %4246 = vtanh.f32 %v1299_v10 }
 0x361   :  { %v1295_v35 = vsel %vm1292_vm15, %v1294_v63, %v1290_v41 }
 0x362   :  { %v1304_v58 = vmul.f32 %v1303_v32, %v1295_v35  ;;  %v1301_v23 = vsub.f32 1.0, %v1295_v35 }
 0x366   :  { %v4247_v38 = vpop.eup %4246 }
 0x367   :  { %v1302_v53 = vmul.f32 %v4247_v38, %v1301_v23  ;;  %v5733_v38 = vld [vmem:[#allocation31_spill] sm:$0xff] }
 0x369   :  { %v1305_v8 = vadd.f32 %v1304_v58, %v1302_v53 }
 0x36b   :  { %v5037_v48 = vpack.c.bf16 %v1305_v8, %v1305_v8 }
 0x36d   :  { %1308 = vst [vmem:[#allocation4 + $0xc] sm:$0xf] %v5037_v48  ;;  %1330 = vmatmul.bf16.vlgmr.msra.gmra.mxu0 %v5037_v48  ;;  %1343 = vmatmul.bf16.vlgmr.msra.gmra.mxu1 %v5037_v48  ;;  %v1407_v3 = vunpack.c.l.bf16 %v5037_v48 }
 0x36e   :  { %1356 = vmatmul.bf16.vlgmr.msrb.gmra.mxu2 %v5037_v48  ;;  %1556 = vmatpush.bf16.msra.mxu0 %v4689_v52  ;;  %v3786_v48 = vld [vmem:[#allocation10 + $0xa8] sm:$0xf] }
 0x36f   :  { %1634 = vmatpush.bf16.msra.mxu1 %v4648_v49  ;;  %1647 = vmatpush.bf16.msrb.mxu2 %v4677_v26  ;;  %v1320_v49 = vadd.f32 %v4896_v2, %v4857_v15 }
 0x372   :  { %1557 = vmatpush.bf16.msra.mxu0 %v4703_v56 }
 0x373   :  { %1635 = vmatpush.bf16.msra.mxu1 %v4654_v57  ;;  %1648 = vmatpush.bf16.msrb.mxu2 %v4683_v44  ;;  %v5730_v57 = vld [vmem:[#allocation20_spill] sm:$0xff] }
 0x376   :  { %1558 = vmatpush.bf16.msra.mxu0 %v4710_v0 }
 0x377   :  { %1636 = vmatpush.bf16.msra.mxu1 %v4657_v61  ;;  %1649 = vmatpush.bf16.msrb.mxu2 %v4706_v60  ;;  %v1319_v61 = vadd.f32 %v5730_v57, %v4854_v12 }
 0x37a   :  { %1559 = vmatpush.bf16.msra.mxu0 %v4718_v7 }
 0x37b   :  { %1637 = vmatpush.bf16.msra.mxu1 %v4660_v6  ;;  %1650 = vmatpush.bf16.msrb.mxu2 %v4713_v5 }
 0x37e   :  { %1560 = vmatpush.bf16.msra.mxu0 %v4724_v11 }
 0x37f   :  { %1638 = vmatpush.bf16.msra.mxu1 %v4669_v14  ;;  %1651 = vmatpush.bf16.msrb.mxu2 %v4740_v20 }
 0x382   :  { %1561 = vmatpush.bf16.msra.mxu0 %v4737_v16 }
 0x383   :  { %1639 = vmatpush.bf16.msra.mxu1 %v4675_v25  ;;  %1652 = vmatpush.bf16.msrb.mxu2 %v4746_v29 }
 0x386   :  { %1562 = vmatpush.bf16.msra.mxu0 %v4743_v22 }
 0x387   :  { %1640 = vmatpush.bf16.msra.mxu1 %v4681_v34  ;;  %1653 = vmatpush.bf16.msrb.mxu2 %v4761_v36 }
 0x38a   :  { %1563 = vmatpush.bf16.msra.mxu0 %v4751_v30 }
 0x38b   :  { %1641 = vmatpush.bf16.msra.mxu1 %v4686_v50  ;;  %1654 = vmatpush.bf16.msrb.mxu2 %v4766_v39 }
 0x3ea   :  { %v1331_v6 = vpop.f32.mrf.mxu0  ;;  %v1344_v14 = vpop.f32.mrf.mxu1 }
 0x3eb   :  { %v1361_v25 = vadd.f32 %v1331_v6, %v1319_v61  ;;  %v1381_v26 = vadd.f32 %v1344_v14, %v1320_v49  ;;  %v5734_v49 = vld [vmem:[#allocation22_spill] sm:$0xff] }
 0x3ec   :  { %v4135_v61 = vld [vmem:[#allocation10 + $0x98] sm:$0xf0]  ;;  %v3762_v14 = vld [vmem:[#allocation10 + $0x78] sm:$0xf] }
 0x3ed   :  { %v3676_v44 = vmul.f32 -1.442695, %v1361_v25  ;;  %v3677_v34 = vmul.f32 -1.442695, %v1381_v26  ;;  %v4132_v25 = vld [vmem:[#allocation10 + $0x80] sm:$0xf0] }
 0x3ef   :  { %4248 = vpow2.f32 %v3676_v44 }
 0x3f0   :  { %4250 = vpow2.f32 %v3677_v34  ;;  %v3763_v34 = vor.u32 %v4132_v25, %v3762_v14 }
 0x3f1   :  { %v1357_v60 = vpop.f32.mrf.mxu2 }
 0x3f2   :  { %v1333_v5 = vpop.f32.mrf.mxu0  ;;  %v1346_v20 = vpop.f32.mrf.mxu1  ;;  %v1401_v62 = vadd.f32 %v4920_v46, %v1357_v60 }
 0x3f3   :  { %v3750_v5 = vld [vmem:[#allocation10 + $0x60] sm:$0xf]  ;;  %v4129_v20 = vld [vmem:[#allocation10 + $0x68] sm:$0xf0] }
 0x3f5   :  { %v4249_v50 = vpop.eup %4248 }
 0x3f6   :  { %v4251_v29 = vpop.eup %4250  ;;  %v1365_v36 = vadd.f32 1.0, %v4249_v50 }
 0x3f7   :  { %v1385_v39 = vadd.f32 1.0, %v4251_v29  ;;  %v3751_v29 = vor.u32 %v4129_v20, %v3750_v5 }
 0x3f8   :  { %4252 = vrcp.f32 %v1365_v36  ;;  %v1377_v47 = vand.u32 2147483648, %v1365_v36  ;;  %v1375_v19 = vand.u32 2147483647, %v1365_v36  ;;  %vm1371_vm2 = vweird.f32 %v1365_v36 }
 0x3f9   :  { %4254 = vrcp.f32 %v1385_v39  ;;  %v1359_v15 = vpop.f32.mrf.mxu2  ;;  %v1397_v17 = vand.u32 2147483648, %v1385_v39  ;;  %v1395_v55 = vand.u32 2147483647, %v1385_v39  ;;  %vm1391_vm3 = vweird.f32 %v1385_v39 }
 0x3fa   :  { %v1378_v21 = vor.u32 1.1754944e-38, %v1377_v47  ;;  %vm1376_vm6 = vcmp.eq.f32.partialorder %v1375_v19, 8.507059e+37 }
 0x3fb   :  { %v1398_v18 = vor.u32 1.1754944e-38, %v1397_v17  ;;  %vm1396_vm7 = vcmp.eq.f32.partialorder %v1395_v55, 8.507059e+37  ;;  %v3714_v55 = vld [vmem:[#allocation10 + $0x18] sm:$0xf] }
 0x3fe   :  { %v4253_v2 = vpop.eup %4252 }
 0x3ff   :  { %v4255_v12 = vpop.eup %4254  ;;  %v1367_v31 = vmul.f32 %v4253_v2, %v1365_v36  ;;  %vm1372_vm0 = vweird.f32 %v4253_v2 }
 0x400   :  { %v1387_v54 = vmul.f32 %v4255_v12, %v1385_v39  ;;  %vm1392_vm1 = vweird.f32 %v4255_v12  ;;  %vm1373_vm4 = vmor %vm1371_vm2, %vm1372_vm0 }
 0x401   :  { %v1368_v59 = vsub.f32 1.0, %v1367_v31  ;;  %vm1393_vm5 = vmor %vm1391_vm3, %vm1392_vm1 }
 0x402   :  { %v1388_v40 = vsub.f32 1.0, %v1387_v54 }
 0x403   :  { %v1369_v51 = vmul.f32 %v4253_v2, %v1368_v59  ;;  %v3726_v59 = vld [vmem:[#allocation10 + $0x30] sm:$0xf] }
 0x404   :  { %v1389_v24 = vmul.f32 %v4255_v12, %v1388_v40  ;;  %v4123_v40 = vld [vmem:[#allocation10 + $0x38] sm:$0xf0] }
 0x405   :  { %v1370_v42 = vadd.f32 %v4253_v2, %v1369_v51  ;;  %v3727_v19 = vor.u32 %v4123_v40, %v3726_v59  ;;  %v3776_v59 = vld [vmem:[#allocation10 + $0x9c] sm:$0xf0]  ;;  %v3782_v40 = vld [vmem:[#allocation10 + $0x98] sm:$0xf] }
 0x406   :  { %v1390_v9 = vadd.f32 %v4255_v12, %v1389_v24 }
 0x407   :  { %v1374_v37 = vsel %vm1373_vm4, %v4253_v2, %v1370_v42  ;;  %v3738_v2 = vld [vmem:[#allocation10 + $0x48] sm:$0xf]  ;;  %v4120_v42 = vld [vmem:[#allocation10 + $0x20] sm:$0xf0] }
 0x408   :  { %v1379_v43 = vsel %vm1376_vm6, %v1378_v21, %v1374_v37  ;;  %v1394_v13 = vsel %vm1393_vm5, %v4255_v12, %v1390_v9  ;;  %v4126_v12 = vld [vmem:[#allocation10 + $0x50] sm:$0xf0] }
 0x409   :  { %v1399_v27 = vsel %vm1396_vm7, %v1398_v18, %v1394_v13  ;;  %v1402_v28 = vmul.f32 %v1401_v62, %v1379_v43  ;;  %v3739_v54 = vor.u32 %v4126_v12, %v3738_v2  ;;  %v3715_v13 = vor.u32 %v4120_v42, %v3714_v55  ;;  %v4131_v42 = vld [vmem:[#allocation10 + $0x7c] sm:$0xf] }
 0x40a   :  { %v1408_v45 = vmul.f32 %v1407_v3, %v1399_v27  ;;  %v1405_v63 = vsub.f32 1.0, %v1399_v27 }
 0x40b   :  { %v1403_v10 = vadd.f32 %v1402_v28, %v1321_v1  ;;  %v4117_v1 = vld [vmem:[#allocation10 + $0x8] sm:$0xf0] }
 0x40d   :  { %4256 = vtanh.f32 %v1403_v10 }
 0x413   :  { %v4257_v41 = vpop.eup %4256 }
 0x414   :  { %v1406_v32 = vmul.f32 %v4257_v41, %v1405_v63  ;;  %v3703_v63 = vor.u32 %v4117_v1, %v3702_v4 }
 0x416   :  { %v1409_v35 = vadd.f32 %v1408_v45, %v1406_v32 }
 0x418   :  { %v5075_v58 = vpack.c.bf16 %v1409_v35, %v1409_v35 }
 0x41a   :  { %1412 = vst [vmem:[#allocation4 + $0x10] sm:$0xf] %v5075_v58  ;;  %1434 = vmatmul.bf16.vlgmr.msrb.gmra.mxu3 %v5075_v58  ;;  %1447 = vmatmul.bf16.vlgmr.msrb.gmra.mxu0 %v5075_v58  ;;  %v1511_v37 = vunpack.c.l.bf16 %v5075_v58 }
 0x41b   :  { %1460 = vmatmul.bf16.vlgmr.msrb.gmra.mxu1 %v5075_v58  ;;  %1660 = vmatpush.bf16.msrb.mxu3 %v4689_v52 }
 0x41f   :  { %1661 = vmatpush.bf16.msrb.mxu3 %v4703_v56 }
 0x423   :  { %1662 = vmatpush.bf16.msrb.mxu3 %v4710_v0  ;;  %v4138_v0 = vld [vmem:[#allocation10 + $0xb0] sm:$0xf0] }
 0x424   :  { %v3787_v57 = vor.u32 %v4138_v0, %v3786_v48 }
 0x426   :  { %1925 = vmatpush.bf16.msrb.mxu0 %v3787_v57 }
 0x427   :  { %1663 = vmatpush.bf16.msrb.mxu3 %v4718_v7 }
 0x42b   :  { %1664 = vmatpush.bf16.msrb.mxu3 %v4724_v11  ;;  %v3774_v11 = vld [vmem:[#allocation10 + $0x90] sm:$0xf] }
 0x42f   :  { %1665 = vmatpush.bf16.msrb.mxu3 %v4737_v16 }
 0x433   :  { %1666 = vmatpush.bf16.msrb.mxu3 %v4743_v22 }
 0x437   :  { %1667 = vmatpush.bf16.msrb.mxu3 %v4751_v30  ;;  %v3775_v30 = vor.u32 %v4135_v61, %v3774_v11  ;;  %v5736_v11 = vld [vmem:[#allocation24_spill] sm:$0xff]  ;;  %v5737_v61 = vld [vmem:[#allocation29_spill] sm:$0xff] }
 0x439   :  { %1926 = vmatpush.bf16.msrb.mxu0 %v3775_v30 }
 0x43d   :  { %1927 = vmatpush.bf16.msrb.mxu0 %v3763_v34  ;;  %v3794_v34 = vld [vmem:[#allocation10 + $0xb0] sm:$0xf] }
 0x441   :  { %1928 = vmatpush.bf16.msrb.mxu0 %v3751_v29  ;;  %v3882_v29 = vld [vmem:[#allocation12 + $0xa8] sm:$0xf] }
 0x445   :  { %1929 = vmatpush.bf16.msrb.mxu0 %v3739_v54  ;;  %v4134_v54 = vld [vmem:[#allocation10 + $0x94] sm:$0xf] }
 0x449   :  { %1930 = vmatpush.bf16.msrb.mxu0 %v3727_v19  ;;  %v4159_v19 = vld [vmem:[#allocation12 + $0x98] sm:$0xf0] }
 0x44d   :  { %1931 = vmatpush.bf16.msrb.mxu0 %v3715_v13 }
 0x451   :  { %1932 = vmatpush.bf16.msrb.mxu0 %v3703_v63 }
 0x497   :  { %v1448_v23 = vpop.f32.mrf.mxu0 }
 0x498   :  { %v1485_v53 = vadd.f32 %v1448_v23, %v5733_v38  ;;  %v5090_v8 = vpop.f32.mrf.mxu1  ;;  %v5735_v38 = vld [vmem:[#allocation32_spill] sm:$0xff] }
 0x499   :  { %v1505_v32 = vadd.f32 %v4920_v46, %v5090_v8  ;;  %v5103_v46 = vld [vmem:[#allocation4] sm:$0xff]  ;;  %v5106_v8 = vld [vmem:[#allocation4 + $0x8] sm:$0xff] }
 0x49a   :  { %v3679_v52 = vmul.f32 -1.442695, %v1485_v53 }
 0x49c   :  { %4258 = vpow2.f32 %v3679_v52 }
 0x49d   :  { %v1435_v56 = vpop.f32.mrf.mxu3 }
 0x49e   :  { %v1465_v7 = vadd.f32 %v1435_v56, %v5734_v49 }
 0x49f   :  { %v1450_v16 = vpop.f32.mrf.mxu0 }
 0x4a0   :  { %v3678_v6 = vmul.f32 -1.442695, %v1465_v7  ;;  %v1463_v22 = vpop.f32.mrf.mxu1  ;;  %v1528_v16 = vadd.f32 %v5737_v61, %v5736_v11  ;;  %v4127_v11 = vld [vmem:[#allocation10 + $0x58] sm:$0xf0] }
 0x4a1   :  { %v5739_v22 = vld [vmem:[#allocation19_spill] sm:$0xff] }
 0x4a2   :  { %v4259_v26 = vpop.eup %4258  ;;  %4260 = vpow2.f32 %v3678_v6  ;;  %v5738_v6 = vld [vmem:[#allocation23_spill] sm:$0xff] }
 0x4a3   :  { %v1489_v44 = vadd.f32 1.0, %v4259_v26  ;;  %v1527_v30 = vadd.f32 %v5739_v22, %v5738_v6  ;;  %v4137_v26 = vld [vmem:[#allocation10 + $0xac] sm:$0xf]  ;;  %v4150_v6 = vld [vmem:[#allocation12 + $0x50] sm:$0xf0] }
 0x4a5   :  { %4262 = vrcp.f32 %v1489_v44  ;;  %v1437_v60 = vpop.f32.mrf.mxu3  ;;  %v1501_v47 = vand.u32 2147483648, %v1489_v44  ;;  %v1499_v51 = vand.u32 2147483647, %v1489_v44  ;;  %vm1495_vm9 = vweird.f32 %v1489_v44 }
 0x4a7   :  { %v1502_v18 = vor.u32 1.1754944e-38, %v1501_v47  ;;  %vm1500_vm11 = vcmp.eq.f32.partialorder %v1499_v51, 8.507059e+37  ;;  %v3779_v47 = vor.u32 %v4134_v54, %v3776_v59  ;;  %v3870_v51 = vld [vmem:[#allocation12 + $0x90] sm:$0xf] }
 0x4a8   :  { %v4261_v50 = vpop.eup %4260  ;;  %v3871_v55 = vor.u32 %v4159_v19, %v3870_v51  ;;  %v3810_v19 = vld [vmem:[#allocation12 + $0x18] sm:$0xf] }
 0x4a9   :  { %v1469_v36 = vadd.f32 1.0, %v4261_v50  ;;  %v4139_v50 = vld [vmem:[#allocation10 + $0xb8] sm:$0xf0] }
 0x4ab   :  { %v4263_v39 = vpop.eup %4262  ;;  %4264 = vrcp.f32 %v1469_v36  ;;  %v1481_v3 = vand.u32 2147483648, %v1469_v36  ;;  %v1479_v28 = vand.u32 2147483647, %v1469_v36  ;;  %vm1475_vm13 = vweird.f32 %v1469_v36 }
 0x4ac   :  { %v1491_v15 = vmul.f32 %v4263_v39, %v1489_v44  ;;  %vm1496_vm8 = vweird.f32 %v4263_v39  ;;  %v3788_v44 = vld [vmem:[#allocation10 + $0xb4] sm:$0xf0] }
 0x4ad   :  { %vm1497_vm10 = vmor %vm1495_vm9, %vm1496_vm8  ;;  %v1482_v41 = vor.u32 1.1754944e-38, %v1481_v3  ;;  %vm1480_vm15 = vcmp.eq.f32.partialorder %v1479_v28, 8.507059e+37  ;;  %v3791_v20 = vor.u32 %v4137_v26, %v3788_v44  ;;  %v3728_v26 = vld [vmem:[#allocation10 + $0x3c] sm:$0xf0]  ;;  %v3734_v44 = vld [vmem:[#allocation10 + $0x38] sm:$0xf] }
 0x4ae   :  { %v1492_v31 = vsub.f32 1.0, %v1491_v15 }
 0x4af   :  { %1954 = vmatpush.bf16.msrb.mxu1 %v3791_v20  ;;  %v4124_v20 = vld [vmem:[#allocation10 + $0x40] sm:$0xf0] }
 0x4b0   :  { %v1493_v17 = vmul.f32 %v4263_v39, %v1492_v31 }
 0x4b1   :  { %v4265_v24 = vpop.eup %4264 }
 0x4b2   :  { %v1494_v9 = vadd.f32 %v4263_v39, %v1493_v17  ;;  %v1471_v21 = vmul.f32 %v4265_v24, %v1469_v36  ;;  %vm1476_vm12 = vweird.f32 %v4265_v24  ;;  %v4162_v36 = vld [vmem:[#allocation12 + $0xb0] sm:$0xf0]  ;;  %v4136_v17 = vld [vmem:[#allocation10 + $0xa0] sm:$0xf0] }
 0x4b3   :  { %vm1477_vm14 = vmor %vm1475_vm13, %vm1476_vm12  ;;  %v3883_v15 = vor.u32 %v4162_v36, %v3882_v29  ;;  %1955 = vmatpush.bf16.msrb.mxu1 %v3779_v47  ;;  %v4147_v29 = vld [vmem:[#allocation12 + $0x38] sm:$0xf0]  ;;  %v4121_v47 = vld [vmem:[#allocation10 + $0x28] sm:$0xf0] }
 0x4b4   :  { %v1472_v62 = vsub.f32 1.0, %v1471_v21  ;;  %v1498_v43 = vsel %vm1497_vm10, %v4263_v39, %v1494_v9  ;;  %v3795_v39 = vor.u32 %v4139_v50, %v3794_v34  ;;  %v3764_v9 = vld [vmem:[#allocation10 + $0x84] sm:$0xf0]  ;;  %v3770_v21 = vld [vmem:[#allocation10 + $0x80] sm:$0xf] }
 0x4b5   :  { %v1503_v33 = vsel %vm1500_vm11, %v1502_v18, %v1498_v43  ;;  %v3767_v18 = vor.u32 %v4131_v42, %v3764_v9  ;;  %v4156_v43 = vld [vmem:[#allocation12 + $0x80] sm:$0xf0]  ;;  %v3822_v50 = vld [vmem:[#allocation12 + $0x30] sm:$0xf] }
 0x4b6   :  { %v1473_v27 = vmul.f32 %v4265_v24, %v1472_v62  ;;  %v1512_v45 = vmul.f32 %v1511_v37, %v1503_v33  ;;  %v1509_v52 = vsub.f32 1.0, %v1503_v33  ;;  %v4133_v37 = vld [vmem:[#allocation10 + $0x88] sm:$0xf0]  ;;  %v3858_v62 = vld [vmem:[#allocation12 + $0x78] sm:$0xf] }
 0x4b7   :  { %v3771_v33 = vor.u32 %v4133_v37, %v3770_v21  ;;  %v3859_v4 = vor.u32 %v4156_v43, %v3858_v62  ;;  %1956 = vmatpush.bf16.msrb.mxu1 %v3767_v18  ;;  %v4116_v9 = vld [vmem:[#allocation10 + $0x4] sm:$0xf]  ;;  %v3704_v21 = vld [vmem:[#allocation10 + $0xc] sm:$0xf0]  ;;  %v3710_v43 = vld [vmem:[#allocation10 + $0x8] sm:$0xf] }
 0x4b8   :  { %v1474_v10 = vadd.f32 %v4265_v24, %v1473_v27 }
 0x4ba   :  { %v1478_v35 = vsel %vm1477_vm14, %v4265_v24, %v1474_v10  ;;  %v3783_v24 = vor.u32 %v4136_v17, %v3782_v40  ;;  %v3752_v10 = vld [vmem:[#allocation10 + $0x6c] sm:$0xf0]  ;;  %v3722_v40 = vld [vmem:[#allocation10 + $0x20] sm:$0xf] }
 0x4bb   :  { %v1483_v58 = vsel %vm1480_vm15, %v1482_v41, %v1478_v35  ;;  %v4130_v35 = vld [vmem:[#allocation10 + $0x70] sm:$0xf0]  ;;  %v3723_v37 = vor.u32 %v4121_v47, %v3722_v40 }
 0x4bc   :  { %v1506_v23 = vmul.f32 %v1505_v32, %v1483_v58  ;;  %v3758_v32 = vld [vmem:[#allocation10 + $0x68] sm:$0xf]  ;;  %v3846_v58 = vld [vmem:[#allocation12 + $0x60] sm:$0xf] }
 0x4be   :  { %v1507_v53 = vadd.f32 %v1506_v23, %v5735_v38  ;;  %v4153_v23 = vld [vmem:[#allocation12 + $0x68] sm:$0xf0]  ;;  %v3759_v38 = vor.u32 %v4130_v35, %v3758_v32 }
 0x4c0   :  { %4266 = vtanh.f32 %v1507_v53  ;;  %v3847_v53 = vor.u32 %v4153_v23, %v3846_v58 }
 0x4c6   :  { %v4267_v56 = vpop.eup %4266 }
 0x4c7   :  { %v1510_v48 = vmul.f32 %v4267_v56, %v1509_v52  ;;  %v4125_v52 = vld [vmem:[#allocation10 + $0x4c] sm:$0xf]  ;;  %v3740_v56 = vld [vmem:[#allocation10 + $0x54] sm:$0xf0] }
 0x4c9   :  { %v1513_v0 = vadd.f32 %v1512_v45, %v1510_v48  ;;  %v4128_v45 = vld [vmem:[#allocation10 + $0x64] sm:$0xf]  ;;  %v3743_v48 = vor.u32 %v4125_v52, %v3740_v56 }
 0x4ca   :  { %v3755_v41 = vor.u32 %v4128_v45, %v3752_v10  ;;  %v5140_v45 = vld [vmem:[%s5702_s4] ss:$0 sm:$0xff] }
 0x4cb   :  { %v5097_v49 = vpack.c.bf16 %v1513_v0, %v1513_v0  ;;  %v3746_v0 = vld [vmem:[#allocation10 + $0x50] sm:$0xf] }
 0x4cc   :  { %1957 = vmatpush.bf16.msrb.mxu1 %v3755_v41  ;;  %v3747_v61 = vor.u32 %v4127_v11, %v3746_v0 }
 0x4cd   :  { %1516 = vst [vmem:[#allocation4 + $0x14] sm:$0xf] %v5097_v49  ;;  %1538 = vmatmul.bf16.vlgmr.msra.gmra.mxu2 %v5097_v49  ;;  %1551 = vmatmul.bf16.vlgmr.msra.gmra.mxu3 %v5097_v49 }
 0x4ce   :  { %1564 = vmatmul.bf16.vlgmr.msra.gmra.mxu0 %v5097_v49  ;;  %1983 = vmatpush.bf16.msra.mxu2 %v3795_v39 }
 0x4cf   :  { %2196 = vmatpush.bf16.msra.mxu3 %v3883_v15  ;;  %v3735_v15 = vor.u32 %v4124_v20, %v3734_v44 }
 0x4d0   :  { %1958 = vmatpush.bf16.msrb.mxu1 %v3743_v48 }
 0x4d2   :  { %1984 = vmatpush.bf16.msra.mxu2 %v3783_v24  ;;  %v4144_v24 = vld [vmem:[#allocation12 + $0x20] sm:$0xf0] }
 0x4d3   :  { %2197 = vmatpush.bf16.msra.mxu3 %v3871_v55  ;;  %v3811_v62 = vor.u32 %v4144_v24, %v3810_v19  ;;  %v4183_v19 = vld [vmem:[#allocation13 + $0x98] sm:$0xf0] }
 0x4d4   :  { %v5109_v7 = vld [vmem:[#allocation4 + $0x10] sm:$0xff] }
 0x4d6   :  { %1985 = vmatpush.bf16.msra.mxu2 %v3771_v33  ;;  %v1615_v33 = vunpack.c.l.bf16 %v5097_v49 }
 0x4d7   :  { %2198 = vmatpush.bf16.msra.mxu3 %v3859_v4  ;;  %v3707_v4 = vor.u32 %v4116_v9, %v3704_v21  ;;  %v3878_v9 = vld [vmem:[#allocation12 + $0x98] sm:$0xf] }
 0x4da   :  { %1986 = vmatpush.bf16.msra.mxu2 %v3759_v38  ;;  %v5740_v38 = vld [vmem:[#allocation25_spill] sm:$0xff] }
 0x4db   :  { %2199 = vmatpush.bf16.msra.mxu3 %v3847_v53  ;;  %v5741_v53 = vld [vmem:[#allocation30_spill] sm:$0xff] }
 0x4dc   :  { %v1529_v52 = vadd.f32 %v5741_v53, %v5740_v38  ;;  %v4180_v53 = vld [vmem:[#allocation13 + $0x80] sm:$0xf0] }
 0x4de   :  { %1933 = vmatmul.bf16.vlgmr.msrb.gmra.mxu0 %v5103_v46  ;;  %1987 = vmatpush.bf16.msra.mxu2 %v3747_v61 }
 0x4e2   :  { %1988 = vmatpush.bf16.msra.mxu2 %v3735_v15  ;;  %v4161_v15 = vld [vmem:[#allocation12 + $0xac] sm:$0xf] }
 0x4e6   :  { %1989 = vmatpush.bf16.msra.mxu2 %v3723_v37  ;;  %v4160_v37 = vld [vmem:[#allocation12 + $0xa0] sm:$0xf0] }
 0x4ee   :  { %1938 = vmatmul.bf16.gmra.mxu0 %v5106_v8 }
 0x4fe   :  { %1943 = vmatmul.bf16.gmra.mxu0 %v5109_v7 }
 0x54b   :  { %v5112_v57 = vpop.f32.mrf.mxu0 }
 0x54c   :  { %v1609_v10 = vadd.f32 %v5140_v45, %v5112_v57 }
 0x550   :  { %v1539_v14 = vpop.f32.mrf.mxu2  ;;  %v1552_v25 = vpop.f32.mrf.mxu3 }
 0x551   :  { %v1569_v60 = vadd.f32 %v1539_v14, %v1527_v30  ;;  %v1589_v5 = vadd.f32 %v1552_v25, %v1528_v16  ;;  %v3834_v16 = vld [vmem:[#allocation12 + $0x48] sm:$0xf]  ;;  %v4122_v25 = vld [vmem:[#allocation10 + $0x34] sm:$0xf] }
 0x552   :  { %v3835_v30 = vor.u32 %v4150_v6, %v3834_v16 }
 0x553   :  { %v3680_v2 = vmul.f32 -1.442695, %v1569_v60  ;;  %v3681_v12 = vmul.f32 -1.442695, %v1589_v5  ;;  %v1567_v31 = vpop.f32.mrf.mxu0  ;;  %v3731_v5 = vor.u32 %v4122_v25, %v3728_v26 }
 0x554   :  { %2200 = vmatpush.bf16.msra.mxu3 %v3835_v30  ;;  %v3716_v31 = vld [vmem:[#allocation10 + $0x24] sm:$0xf0] }
 0x555   :  { %4268 = vpow2.f32 %v3680_v2  ;;  %v3823_v2 = vor.u32 %v4147_v29, %v3822_v50  ;;  %1959 = vmatpush.bf16.msrb.mxu1 %v3731_v5  ;;  %v3978_v29 = vld [vmem:[#allocation13 + $0xa8] sm:$0xf] }
 0x556   :  { %4270 = vpow2.f32 %v3681_v12  ;;  %v4119_v12 = vld [vmem:[#allocation10 + $0x1c] sm:$0xf] }
 0x557   :  { %v3719_v59 = vor.u32 %v4119_v12, %v3716_v31 }
 0x558   :  { %v1541_v13 = vpop.f32.mrf.mxu2  ;;  %v1554_v3 = vpop.f32.mrf.mxu3  ;;  %2201 = vmatpush.bf16.msra.mxu3 %v3823_v2  ;;  %v3884_v2 = vld [vmem:[#allocation12 + $0xb4] sm:$0xf0] }
 0x559   :  { %v4118_v13 = vld [vmem:[#allocation10 + $0x10] sm:$0xf0]  ;;  %1960 = vmatpush.bf16.msrb.mxu1 %v3719_v59  ;;  %v3887_v31 = vor.u32 %v4161_v15, %v3884_v2  ;;  %v4163_v59 = vld [vmem:[#allocation12 + $0xb8] sm:$0xf0]  ;;  %v3824_v2 = vld [vmem:[#allocation12 + $0x3c] sm:$0xf0] }
 0x55a   :  { %v3711_v35 = vor.u32 %v4118_v13, %v3710_v43  ;;  %v3879_v13 = vor.u32 %v4160_v37, %v3878_v9  ;;  %v4146_v15 = vld [vmem:[#allocation12 + $0x34] sm:$0xf]  ;;  %v4171_v9 = vld [vmem:[#allocation13 + $0x38] sm:$0xf0] }
 0x55b   :  { %v4269_v1 = vpop.eup %4268  ;;  %v5168_v26 = vpop.f32.mrf.mxu0  ;;  %2225 = vmatpush.bf16.msra.mxu0 %v3887_v31 }
 0x55c   :  { %v4271_v27 = vpop.eup %4270  ;;  %v5118_v28 = vadd.f32 1.0, %v4269_v1  ;;  %v3798_v1 = vld [vmem:[#allocation12] sm:$0xf]  ;;  %2202 = vmatpush.bf16.msra.mxu3 %v3811_v62  ;;  %1990 = vmatpush.bf16.msra.mxu2 %v3711_v35  ;;  %v4149_v35 = vld [vmem:[#allocation12 + $0x4c] sm:$0xf] }
 0x55d   :  { %v5120_v63 = vadd.f32 1.0, %v4271_v27  ;;  %v4141_v27 = vld [vmem:[#allocation12 + $0x8] sm:$0xf0]  ;;  %1961 = vmatpush.bf16.msrb.mxu1 %v3707_v4 }
 0x55e   :  { %4272 = vrcp.f32 %v5118_v28  ;;  %v1583_v22 = vand.u32 2147483647, %v5118_v28  ;;  %v1585_v17 = vand.u32 2147483648, %v5118_v28  ;;  %vm1579_vm2 = vweird.f32 %v5118_v28 }
 0x55f   :  { %4274 = vrcp.f32 %v5120_v63  ;;  %v1603_v39 = vand.u32 2147483647, %v5120_v63  ;;  %v1605_v42 = vand.u32 2147483648, %v5120_v63  ;;  %vm1599_vm4 = vweird.f32 %v5120_v63 }
 0x560   :  { %v1586_v41 = vor.u32 1.1754944e-38, %v1585_v17  ;;  %vm1584_vm5 = vcmp.eq.f32.partialorder %v1583_v22, 8.507059e+37  ;;  %v3799_v57 = vor.u32 %v4141_v27, %v3798_v1  ;;  %v4152_v27 = vld [vmem:[#allocation12 + $0x64] sm:$0xf] }
 0x561   :  { %vm1604_vm7 = vcmp.eq.f32.partialorder %v1603_v39, 8.507059e+37 }
 0x562   :  { %2203 = vmatpush.bf16.msra.mxu3 %v3799_v57 }
 0x563   :  { %v5178_v24 = vpop.f32.mrf.mxu0 }
 0x564   :  { %v4273_v14 = vpop.eup %4272 }
 0x565   :  { %v5125_v34 = vpop.eup %4274  ;;  %v1575_v60 = vmul.f32 %v4273_v14, %v5118_v28  ;;  %vm1580_vm0 = vweird.f32 %v4273_v14  ;;  %v1606_v28 = vor.u32 1.1754944e-38, %v1605_v42  ;;  %v3872_v42 = vld [vmem:[#allocation12 + $0x9c] sm:$0xf0] }
 0x566   :  { %v1595_v36 = vmul.f32 %v5125_v34, %v5120_v63  ;;  %vm1600_vm1 = vweird.f32 %v5125_v34  ;;  %vm1581_vm3 = vmor %vm1579_vm2, %vm1580_vm0 }
 0x567   :  { %v1576_v54 = vsub.f32 1.0, %v1575_v60  ;;  %vm1601_vm6 = vmor %vm1599_vm4, %vm1600_vm1  ;;  %v5743_v60 = vld [vmem:[#allocation27_spill] sm:$0xff] }
 0x568   :  { %v1596_v51 = vsub.f32 1.0, %v1595_v36  ;;  %v4186_v36 = vld [vmem:[#allocation13 + $0xb0] sm:$0xf0] }
 0x569   :  { %v1577_v55 = vmul.f32 %v4273_v14, %v1576_v54  ;;  %v5173_v12 = vor.u32 %v4186_v36, %v3978_v29  ;;  %v3890_v54 = vld [vmem:[#allocation12 + $0xb0] sm:$0xf]  ;;  %v4151_v36 = vld [vmem:[#allocation12 + $0x58] sm:$0xf0] }
 0x56a   :  { %v1597_v18 = vmul.f32 %v5125_v34, %v1596_v51  ;;  %v3891_v47 = vor.u32 %v4163_v59, %v3890_v54  ;;  %v3966_v51 = vld [vmem:[#allocation13 + $0x90] sm:$0xf] }
 0x56b   :  { %v1578_v3 = vadd.f32 %v4273_v14, %v1577_v55  ;;  %v4158_v55 = vld [vmem:[#allocation12 + $0x94] sm:$0xf]  ;;  %v5180_v21 = vor.u32 %v4183_v19, %v3966_v51  ;;  %v3842_v29 = vld [vmem:[#allocation12 + $0x50] sm:$0xf] }
 0x56c   :  { %v1598_v32 = vadd.f32 %v5125_v34, %v1597_v18  ;;  %v3875_v43 = vor.u32 %v4158_v55, %v3872_v42  ;;  %v3918_v42 = vld [vmem:[#allocation13 + $0x30] sm:$0xf] }
 0x56d   :  { %v1582_v49 = vsel %vm1581_vm3, %v4273_v14, %v1578_v3  ;;  %v5742_v14 = vld [vmem:[#allocation26_spill] sm:$0xff]  ;;  %v3986_v59 = vld [vmem:[#allocation13 + $0xb0] sm:$0xf] }
 0x56e   :  { %v1587_v58 = vsel %vm1584_vm5, %v1586_v41, %v1582_v49  ;;  %v1602_v23 = vsel %vm1601_vm6, %v5125_v34, %v1598_v32  ;;  %v4155_v3 = vld [vmem:[#allocation12 + $0x7c] sm:$0xf]  ;;  %2226 = vmatpush.bf16.msra.mxu0 %v3875_v43  ;;  %v3848_v41 = vld [vmem:[#allocation12 + $0x6c] sm:$0xf0]  ;;  %v3866_v32 = vld [vmem:[#allocation12 + $0x80] sm:$0xf] }
 0x56f   :  { %v1610_v56 = vmul.f32 %v1609_v10, %v1587_v58  ;;  %v1607_v48 = vsel %vm1604_vm7, %v1606_v28, %v1602_v23  ;;  %v4157_v49 = vld [vmem:[#allocation12 + $0x88] sm:$0xf0]  ;;  %v3954_v58 = vld [vmem:[#allocation13 + $0x78] sm:$0xf]  ;;  %v3851_v57 = vor.u32 %v4152_v27, %v3848_v41 }
 0x570   :  { %v1616_v63 = vmul.f32 %v1615_v33, %v1607_v48  ;;  %v1613_v11 = vsub.f32 1.0, %v1607_v48  ;;  %v3860_v33 = vld [vmem:[#allocation12 + $0x84] sm:$0xf0]  ;;  %v3867_v38 = vor.u32 %v4157_v49, %v3866_v32  ;;  %v3836_v48 = vld [vmem:[#allocation12 + $0x54] sm:$0xf0] }
 0x571   :  { %v1611_v0 = vadd.f32 %v1610_v56, %v1529_v52  ;;  %v3863_v1 = vor.u32 %v4155_v3, %v3860_v33  ;;  %v3942_v52 = vld [vmem:[#allocation13 + $0x60] sm:$0xf]  ;;  %v4177_v56 = vld [vmem:[#allocation13 + $0x68] sm:$0xf0]  ;;  %v3830_v43 = vld [vmem:[#allocation12 + $0x38] sm:$0xf] }
 0x572   :  { %v3812_v3 = vld [vmem:[#allocation12 + $0x24] sm:$0xf0] }
 0x573   :  { %4276 = vtanh.f32 %v1611_v0  ;;  %2227 = vmatpush.bf16.msra.mxu0 %v3863_v1  ;;  %v3854_v0 = vld [vmem:[#allocation12 + $0x68] sm:$0xf] }
 0x577   :  { %2228 = vmatpush.bf16.msra.mxu0 %v3851_v57  ;;  %v5752_v57 = vld [vmem:[#allocation28_spill] sm:$0xff] }
 0x579   :  { %v4277_v61 = vpop.eup %4276 }
 0x57a   :  { %v1614_v16 = vmul.f32 %v4277_v61, %v1613_v11  ;;  %v4154_v11 = vld [vmem:[#allocation12 + $0x70] sm:$0xf0]  ;;  %v5190_v61 = vpop.f32.mrf.mxu0 }
 0x57c   :  { %v1617_v6 = vadd.f32 %v1616_v63, %v1614_v16  ;;  %v5188_v63 = vor.u32 %v4180_v53, %v3954_v58  ;;  %v3980_v58 = vld [vmem:[#allocation13 + $0xb4] sm:$0xf0] }
 0x57e   :  { %v5152_v22 = vpack.c.bf16 %v1617_v6, %v1617_v6 }
 0x580   :  { %1620 = vst [vmem:[#allocation4 + $0x18] sm:$0xf] %v5152_v22  ;;  %1642 = vmatmul.bf16.vlgmr.msra.gmra.mxu1 %v5152_v22  ;;  %1655 = vmatmul.bf16.vlgmr.msrb.gmra.mxu2 %v5152_v22 }
 0x581   :  { %1668 = vmatmul.bf16.vlgmr.msrb.gmra.mxu3 %v5152_v22  ;;  %2477 = vmatpush.bf16.msrb.mxu2 %v5173_v12 }
 0x582   :  { %2254 = vmatpush.bf16.msra.mxu1 %v3891_v47 }
 0x585   :  { %2478 = vmatpush.bf16.msrb.mxu2 %v5180_v21 }
 0x586   :  { %2255 = vmatpush.bf16.msra.mxu1 %v3879_v13  ;;  %v4148_v13 = vld [vmem:[#allocation12 + $0x40] sm:$0xf0] }
 0x587   :  { %v3831_v41 = vor.u32 %v4148_v13, %v3830_v43  ;;  %v4184_v43 = vld [vmem:[#allocation13 + $0xa0] sm:$0xf0]  ;;  %v4179_v13 = vld [vmem:[#allocation13 + $0x7c] sm:$0xf] }
 0x589   :  { %2479 = vmatpush.bf16.msrb.mxu2 %v5188_v63 }
 0x58a   :  { %2256 = vmatpush.bf16.msra.mxu1 %v3867_v38 }
 0x590   :  { %1962 = vmatmul.bf16.vlgmr.msrb.gmra.mxu1 %v5103_v46  ;;  %1991 = vmatmul.bf16.vlgmr.msra.gmra.mxu2 %v5103_v46 }
 0x591   :  { %2204 = vmatmul.bf16.vlgmr.msra.gmra.mxu3 %v5103_v46 }
 0x5a0   :  { %1967 = vmatmul.bf16.gmra.mxu1 %v5106_v8  ;;  %1996 = vmatmul.bf16.gmra.mxu2 %v5106_v8 }
 0x5a1   :  { %2209 = vmatmul.bf16.gmra.mxu3 %v5106_v8 }
 0x5b0   :  { %1972 = vmatmul.bf16.gmra.mxu1 %v5109_v7  ;;  %2001 = vmatmul.bf16.gmra.mxu2 %v5109_v7 }
 0x5b1   :  { %2214 = vmatmul.bf16.gmra.mxu3 %v5109_v7 }
 0x5fd   :  { %v1643_v30 = vpop.f32.mrf.mxu1 }
 0x5fe   :  { %v1673_v25 = vadd.f32 %v1643_v30, %v5742_v14  ;;  %v3855_v14 = vor.u32 %v4154_v11, %v3854_v0  ;;  %v4168_v0 = vld [vmem:[#allocation13 + $0x20] sm:$0xf0]  ;;  %v1719_v11 = vunpack.c.l.bf16 %v5152_v22 }
 0x600   :  { %v3682_v44 = vmul.f32 -1.442695, %v1673_v25  ;;  %2257 = vmatpush.bf16.msra.mxu1 %v3855_v14  ;;  %v4145_v14 = vld [vmem:[#allocation12 + $0x28] sm:$0xf0] }
 0x602   :  { %4278 = vpow2.f32 %v3682_v44  ;;  %v5197_v44 = vor.u32 %v4177_v56, %v3942_v52  ;;  %v4140_v56 = vld [vmem:[#allocation12 + $0x4] sm:$0xf] }
 0x603   :  { %v1656_v34 = vpop.f32.mrf.mxu2 }
 0x604   :  { %v1693_v5 = vadd.f32 %v1656_v34, %v5743_v60  ;;  %v5171_v20 = vpop.f32.mrf.mxu3  ;;  %v3930_v34 = vld [vmem:[#allocation13 + $0x48] sm:$0xf]  ;;  %2480 = vmatpush.bf16.msrb.mxu2 %v5197_v44 }
 0x605   :  { %v1645_v50 = vpop.f32.mrf.mxu1  ;;  %v1713_v19 = vadd.f32 %v5140_v45, %v5171_v20  ;;  %v4143_v20 = vld [vmem:[#allocation12 + $0x1c] sm:$0xf] }
 0x606   :  { %v3683_v39 = vmul.f32 -1.442695, %v1693_v5  ;;  %v3839_v5 = vor.u32 %v4149_v35, %v3836_v48  ;;  %v4174_v50 = vld [vmem:[#allocation13 + $0x50] sm:$0xf0]  ;;  %v4185_v35 = vld [vmem:[#allocation13 + $0xac] sm:$0xf]  ;;  %v3815_v53 = vor.u32 %v4143_v20, %v3812_v3 }
 0x607   :  { %v5217_v55 = vor.u32 %v4174_v50, %v3930_v34  ;;  %v5242_v52 = vor.u32 %v4185_v35, %v3980_v58  ;;  %v3906_v48 = vld [vmem:[#allocation13 + $0x18] sm:$0xf] }
 0x608   :  { %v4279_v40 = vpop.eup %4278  ;;  %4280 = vpow2.f32 %v3683_v39  ;;  %2229 = vmatpush.bf16.msra.mxu0 %v3839_v5  ;;  %v3968_v5 = vld [vmem:[#allocation13 + $0x9c] sm:$0xf0] }
 0x609   :  { %v5176_v17 = vadd.f32 1.0, %v4279_v40  ;;  %v3843_v40 = vor.u32 %v4151_v36, %v3842_v29  ;;  %2481 = vmatpush.bf16.msrb.mxu2 %v5217_v55  ;;  %2490 = vmatpush.bf16.msrb.mxu3 %v5242_v52  ;;  %v5250_v29 = vor.u32 %v4168_v0, %v3906_v48  ;;  %v3806_v36 = vld [vmem:[#allocation12 + $0x8] sm:$0xf]  ;;  %v4178_v0 = vld [vmem:[#allocation13 + $0x70] sm:$0xf0] }
 0x60a   :  { %v3950_v48 = vld [vmem:[#allocation13 + $0x68] sm:$0xf] }
 0x60b   :  { %4282 = vrcp.f32 %v5176_v17  ;;  %v1658_v18 = vpop.f32.mrf.mxu2  ;;  %v1687_v6 = vand.u32 2147483647, %v5176_v17  ;;  %v1689_v25 = vand.u32 2147483648, %v5176_v17  ;;  %vm1683_vm9 = vweird.f32 %v5176_v17  ;;  %2258 = vmatpush.bf16.msra.mxu1 %v3843_v40  ;;  %v4187_v40 = vld [vmem:[#allocation13 + $0xb8] sm:$0xf0] }
 0x60c   :  { %v1671_v62 = vpop.f32.mrf.mxu3 }
 0x60d   :  { %vm5204_vm10 = vcmp.eq.f32.partialorder %v1687_v6, 8.507059e+37  ;;  %v3827_v62 = vor.u32 %v4146_v15, %v3824_v2  ;;  %v3818_v6 = vld [vmem:[#allocation12 + $0x20] sm:$0xf]  ;;  %v4142_v15 = vld [vmem:[#allocation12 + $0x10] sm:$0xf0] }
 0x60e   :  { %v4281_v4 = vpop.eup %4280  ;;  %v3819_v34 = vor.u32 %v4145_v14, %v3818_v6  ;;  %v3807_v51 = vor.u32 %v4142_v15, %v3806_v36  ;;  %v3938_v6 = vld [vmem:[#allocation13 + $0x50] sm:$0xf]  ;;  %v4175_v14 = vld [vmem:[#allocation13 + $0x58] sm:$0xf0]  ;;  %v4170_v15 = vld [vmem:[#allocation13 + $0x34] sm:$0xf] }
 0x60f   :  { %v5184_v10 = vadd.f32 1.0, %v4281_v4  ;;  %2230 = vmatpush.bf16.msra.mxu0 %v3827_v62  ;;  %2259 = vmatpush.bf16.msra.mxu1 %v3831_v41  ;;  %v3944_v41 = vld [vmem:[#allocation13 + $0x6c] sm:$0xf0] }
 0x611   :  { %v4283_v28 = vpop.eup %4282  ;;  %4284 = vrcp.f32 %v5184_v10  ;;  %v1709_v47 = vand.u32 2147483648, %v5184_v10  ;;  %vm1703_vm13 = vweird.f32 %v5184_v10  ;;  %v1707_v4 = vand.u32 2147483647, %v5184_v10 }
 0x612   :  { %v1679_v23 = vmul.f32 %v4283_v28, %v5176_v17  ;;  %vm1684_vm8 = vweird.f32 %v4283_v28  ;;  %v1690_v17 = vor.u32 1.1754944e-38, %v1689_v25 }
 0x613   :  { %vm5210_vm11 = vmor %vm1683_vm9, %vm1684_vm8  ;;  %v1710_v49 = vor.u32 1.1754944e-38, %v1709_v47  ;;  %vm1708_vm15 = vcmp.eq.f32.partialorder %v1707_v4, 8.507059e+37  ;;  %2231 = vmatpush.bf16.msra.mxu0 %v3815_v53  ;;  %2260 = vmatpush.bf16.msra.mxu1 %v3819_v34  ;;  %v5303_v34 = vor.u32 %v4175_v14, %v3938_v6 }
 0x614   :  { %v1680_v16 = vsub.f32 1.0, %v1679_v23  ;;  %v5193_v30 = vpop.f32.mrf.mxu3  ;;  %v5238_v23 = vpop.f32.mrf.mxu0 }
 0x615   :  { %5744 = vst [vmem:[#allocation20_spill] sm:$0xff] %v5193_v30 }
 0x616   :  { %v1681_v60 = vmul.f32 %v4283_v28, %v1680_v16  ;;  %v3800_v16 = vld [vmem:[#allocation12 + $0xc] sm:$0xf0] }
 0x617   :  { %v5199_v39 = vpop.eup %4284  ;;  %2261 = vmatpush.bf16.msra.mxu1 %v3807_v51  ;;  %v3902_v51 = vld [vmem:[#allocation13 + $0x8] sm:$0xf] }
 0x618   :  { %v1699_v31 = vmul.f32 %v5199_v39, %v5184_v10  ;;  %v1682_v54 = vadd.f32 %v4283_v28, %v1681_v60  ;;  %vm1704_vm12 = vweird.f32 %v5199_v39  ;;  %v4182_v60 = vld [vmem:[#allocation13 + $0x94] sm:$0xf] }
 0x619   :  { %vm5231_vm14 = vmor %vm1703_vm13, %vm1704_vm12  ;;  %v5252_v22 = vor.u32 %v4182_v60, %v3968_v5  ;;  %v3932_v60 = vld [vmem:[#allocation13 + $0x54] sm:$0xf0] }
 0x61a   :  { %v1700_v18 = vsub.f32 1.0, %v1699_v31  ;;  %v1686_v37 = vsel %vm5210_vm11, %v4283_v28, %v1682_v54  ;;  %v5236_v28 = vor.u32 %v4171_v9, %v3918_v42  ;;  %v3803_v31 = vor.u32 %v4140_v56, %v3800_v16  ;;  %v4165_v54 = vld [vmem:[#allocation13 + $0x8] sm:$0xf0]  ;;  %v5263_v9 = vld [vmem:[%s5706_s8] sm:$0x7] }
 0x61b   :  { %v1691_v45 = vsel %vm5204_vm10, %v1690_v17, %v1686_v37  ;;  %2491 = vmatpush.bf16.msrb.mxu3 %v5252_v22  ;;  %v3974_v37 = vld [vmem:[#allocation13 + $0x98] sm:$0xf] }
 0x61c   :  { %v1701_v33 = vmul.f32 %v5199_v39, %v1700_v18  ;;  %v1714_v1 = vmul.f32 %v1713_v19, %v1691_v45  ;;  %v5227_v27 = vpop.f32.mrf.mxu3  ;;  %2482 = vmatpush.bf16.msrb.mxu2 %v5236_v28  ;;  %2232 = vmatpush.bf16.msra.mxu0 %v3803_v31  ;;  %v5265_v18 = vor.u32 %v4187_v40, %v3986_v59  ;;  %v3956_v45 = vld [vmem:[#allocation13 + $0x84] sm:$0xf0]  ;;  %v1944_v20 = vpop.f32.mrf.mxu0  ;;  %v3926_v5 = vld [vmem:[#allocation13 + $0x38] sm:$0xf]  ;;  %v4169_v59 = vld [vmem:[#allocation13 + $0x28] sm:$0xf0] }
 0x61d   :  { %5749 = vst [vmem:[#allocation21_spill] sm:$0xff] %v5227_v27  ;;  %v5268_v3 = vor.u32 %v4179_v13, %v3956_v45  ;;  %v5276_v32 = vor.u32 %v4184_v43, %v3974_v37  ;;  %v4167_v37 = vld [vmem:[#allocation13 + $0x1c] sm:$0xf]  ;;  %v4164_v43 = vld [vmem:[#allocation13 + $0x4] sm:$0xf]  ;;  %v5754_v13 = vmov 0  }
 0x61e   :  { %v1702_v10 = vadd.f32 %v5199_v39, %v1701_v33  ;;  %v1715_v38 = vadd.f32 %v1714_v1, %v5752_v57  ;;  %v5271_v33 = vperm.slane %v5263_v9, 0  ;;  %v4176_v1 = vld [vmem:[#allocation13 + $0x64] sm:$0xf]  ;;  %2603 = vmatpush.bf16.msrb.mxu1 %v5265_v18  ;;  %v4181_v57 = vld [vmem:[#allocation13 + $0x88] sm:$0xf0] }
 0x61f   :  { %2492 = vmatpush.bf16.msrb.mxu3 %v5268_v3 }
 0x620   :  { %v1706_v25 = vsel %vm5231_vm14, %v5199_v39, %v1702_v10  ;;  %4286 = vtanh.f32 %v1715_v38  ;;  %v3894_v39 = vld [vmem:[#allocation13] sm:$0xf]  ;;  %2483 = vmatpush.bf16.msrb.mxu2 %v5250_v29  ;;  %2590 = vmatpush.bf16.msrb.mxu0 %v5242_v52  ;;  %v1945_v35 = vadd.f32 %v1944_v20, %v5271_v33  ;;  %v3896_v20 = vld [vmem:[#allocation13 + $0xc] sm:$0xf0] }
 0x621   :  { %v1711_v50 = vsel %vm1708_vm15, %v1710_v49, %v1706_v25  ;;  %v5258_v19 = vor.u32 %v4165_v54, %v3894_v39  ;;  %v5279_v49 = vor.u32 %v4176_v1, %v3944_v41  ;;  %v3962_v10 = vld [vmem:[#allocation13 + $0x80] sm:$0xf]  ;;  %v4173_v25 = vld [vmem:[#allocation13 + $0x4c] sm:$0xf] }
 0x622   :  { %v1720_v2 = vmul.f32 %v1719_v11, %v1711_v50  ;;  %v1717_v17 = vsub.f32 1.0, %v1711_v50  ;;  %2604 = vmatpush.bf16.msrb.mxu1 %v5276_v32  ;;  %v5287_v56 = vor.u32 %v4181_v57, %v3962_v10  ;;  %v5293_v11 = vor.u32 %v4178_v0, %v3950_v48  ;;  %v4172_v50 = vld [vmem:[#allocation13 + $0x40] sm:$0xf0]  ;;  %v3914_v54 = vld [vmem:[#allocation13 + $0x20] sm:$0xf] }
 0x623   :  { %2493 = vmatpush.bf16.msrb.mxu3 %v5279_v49  ;;  %v5306_v36 = vor.u32 %v4173_v25, %v3932_v60  ;;  %v5313_v39 = vor.u32 %v4172_v50, %v3926_v5  ;;  %v5319_v40 = vor.u32 %v4169_v59, %v3914_v54  ;;  %v5424_v54 = vperm.slane %v5263_v9, 1 }
 0x624   :  { %v5254_v47 = vpop.f32.mrf.mxu3  ;;  %2484 = vmatpush.bf16.msrb.mxu2 %v5258_v19  ;;  %2591 = vmatpush.bf16.msrb.mxu0 %v5252_v22  ;;  %v5409_v0 = vpop.f32.mrf.mxu0  ;;  %v5427_v59 = vperm.slane %v5263_v9, 2 }
 0x625   :  { %5753 = vst [vmem:[#allocation33_spill] sm:$0xff] %v5254_v47 }
 0x626   :  { %v4287_v42 = vpop.eup %4286  ;;  %2605 = vmatpush.bf16.msrb.mxu1 %v5287_v56  ;;  %5755 = vst [vmem:[#allocation31_spill] sm:$0xff] %v5409_v0 }
 0x627   :  { %v1718_v62 = vmul.f32 %v4287_v42, %v1717_v17  ;;  %2494 = vmatpush.bf16.msrb.mxu3 %v5306_v36  ;;  %v4166_v17 = vld [vmem:[#allocation13 + $0x10] sm:$0xf0] }
 0x628   :  { %2503 = vmatpush.bf16.msra.mxu2 %v5265_v18  ;;  %2592 = vmatpush.bf16.msrb.mxu0 %v5268_v3  ;;  %v5323_v42 = vor.u32 %v4166_v17, %v3902_v51 }
 0x629   :  { %v1721_v4 = vadd.f32 %v1720_v2, %v1718_v62  ;;  %v3920_v2 = vld [vmem:[#allocation13 + $0x3c] sm:$0xf0]  ;;  %v3908_v62 = vld [vmem:[#allocation13 + $0x24] sm:$0xf0] }
 0x62a   :  { %2606 = vmatpush.bf16.msrb.mxu1 %v5293_v11  ;;  %v5310_v31 = vor.u32 %v4170_v15, %v3920_v2  ;;  %v5330_v45 = vor.u32 %v4167_v37, %v3908_v62 }
 0x62b   :  { %v1722_v58 = vpack.c.bf16 %v1721_v4, %v1721_v4  ;;  %v5335_v4 = vor.u32 %v4164_v43, %v3896_v20 }
 0x62c   :  { %v2212_v38 = vpop.f32.mrf.mxu3  ;;  %2504 = vmatpush.bf16.msra.mxu2 %v5276_v32  ;;  %2593 = vmatpush.bf16.msrb.mxu0 %v5279_v49 }
 0x62d   :  { %1724 = vst [vmem:[#allocation4 + $0x1c] sm:$0xf] %v1722_v58  ;;  %v5283_v53 = vadd.f32 %v2212_v38, %v1945_v35  ;;  %2495 = vmatpush.bf16.msrb.mxu3 %v5310_v31 }
 0x62e   :  { %2607 = vmatpush.bf16.msrb.mxu1 %v5303_v34 }
 0x630   :  { %2505 = vmatpush.bf16.msra.mxu2 %v5287_v56  ;;  %2594 = vmatpush.bf16.msrb.mxu0 %v5306_v36 }
 0x631   :  { %2496 = vmatpush.bf16.msrb.mxu3 %v5330_v45 }
 0x632   :  { %2608 = vmatpush.bf16.msrb.mxu1 %v5313_v39 }
 0x634   :  { %v5296_v16 = vld [vmem:[#allocation4 + $0x18] sm:$0xff]  ;;  %2506 = vmatpush.bf16.msra.mxu2 %v5293_v11  ;;  %2595 = vmatpush.bf16.msrb.mxu0 %v5310_v31  ;;  %v5407_v48 = vpop.f32.mrf.mxu3 }
 0x635   :  { %1948 = vmatmul.bf16.gmra.mxu0 %v5296_v16  ;;  %1977 = vmatmul.bf16.gmra.mxu1 %v5296_v16 }
 0x636   :  { %2006 = vmatmul.bf16.gmra.mxu2 %v5296_v16  ;;  %2219 = vmatmul.bf16.gmra.mxu3 %v5296_v16 }
 0x637   :  { %2609 = vmatpush.bf16.msrb.mxu1 %v5319_v40  ;;  %2497 = vmatpush.bf16.msrb.mxu3 %v5335_v4 }
 0x638   :  { %2507 = vmatpush.bf16.msra.mxu2 %v5303_v34  ;;  %2596 = vmatpush.bf16.msrb.mxu0 %v5330_v45 }
 0x63b   :  { %2610 = vmatpush.bf16.msrb.mxu1 %v5323_v42  ;;  %2577 = vmatpush.bf16.msra.mxu3 %v5173_v12 }
 0x63c   :  { %2508 = vmatpush.bf16.msra.mxu2 %v5313_v39  ;;  %2597 = vmatpush.bf16.msrb.mxu0 %v5335_v4  ;;  %v5417_v60 = vpop.f32.mrf.mxu3 }
 0x63f   :  { %2578 = vmatpush.bf16.msra.mxu3 %v5180_v21 }
 0x640   :  { %2509 = vmatpush.bf16.msra.mxu2 %v5319_v40 }
 0x643   :  { %2579 = vmatpush.bf16.msra.mxu3 %v5188_v63 }
 0x644   :  { %2510 = vmatpush.bf16.msra.mxu2 %v5323_v42 }
 0x645   :  { %2233 = vmatmul.bf16.vlgmr.msra.gmra.mxu0 %v5103_v46  ;;  %2262 = vmatmul.bf16.vlgmr.msra.gmra.mxu1 %v5103_v46  ;;  %v5387_v46 = vpop.f32.mrf.mxu1 }
 0x646   :  { %2485 = vmatmul.bf16.vlgmr.msrb.gmra.mxu2 %v5754_v13  ;;  %2773 = vmatpush.bf16.msra.mxu1 %v5173_v12 }
 0x647   :  { %2701 = vmatpush.bf16.msra.mxu0 %v5265_v18  ;;  %2498 = vmatmul.bf16.vlgmr.msrb.gmra.mxu3 %v5754_v13 }
 0x648   :  { %2675 = vmatpush.bf16.msrb.mxu2 %v5173_v12  ;;  %2580 = vmatpush.bf16.msra.mxu3 %v5197_v44 }
 0x64a   :  { %2774 = vmatpush.bf16.msra.mxu1 %v5180_v21 }
 0x64b   :  { %2702 = vmatpush.bf16.msra.mxu0 %v5276_v32 }
 0x64c   :  { %2676 = vmatpush.bf16.msrb.mxu2 %v5180_v21  ;;  %2581 = vmatpush.bf16.msra.mxu3 %v5217_v55 }
 0x64e   :  { %2775 = vmatpush.bf16.msra.mxu1 %v5188_v63 }
 0x64f   :  { %2703 = vmatpush.bf16.msra.mxu0 %v5287_v56 }
 0x650   :  { %2677 = vmatpush.bf16.msrb.mxu2 %v5188_v63  ;;  %2582 = vmatpush.bf16.msra.mxu3 %v5236_v28 }
 0x652   :  { %2776 = vmatpush.bf16.msra.mxu1 %v5197_v44 }
 0x653   :  { %2704 = vmatpush.bf16.msra.mxu0 %v5293_v11 }
 0x654   :  { %2678 = vmatpush.bf16.msrb.mxu2 %v5197_v44  ;;  %2583 = vmatpush.bf16.msra.mxu3 %v5250_v29 }
 0x655   :  { %2238 = vmatmul.bf16.gmra.mxu0 %v5106_v8  ;;  %2267 = vmatmul.bf16.gmra.mxu1 %v5106_v8  ;;  %v5392_v8 = vpop.f32.mrf.mxu2 }
 0x656   :  { %2511 = vmatmul.bf16.vlgmr.msra.gmra.mxu2 %v5754_v13  ;;  %2777 = vmatpush.bf16.msra.mxu1 %v5217_v55 }
 0x657   :  { %2705 = vmatpush.bf16.msra.mxu0 %v5303_v34 }
 0x658   :  { %2679 = vmatpush.bf16.msrb.mxu2 %v5217_v55  ;;  %2584 = vmatpush.bf16.msra.mxu3 %v5258_v19 }
 0x65a   :  { %2778 = vmatpush.bf16.msra.mxu1 %v5236_v28 }
 0x65b   :  { %2706 = vmatpush.bf16.msra.mxu0 %v5313_v39 }
 0x65c   :  { %2680 = vmatpush.bf16.msrb.mxu2 %v5236_v28  ;;  %2688 = vmatpush.bf16.msrb.mxu3 %v5242_v52 }
 0x65d   :  { %v5401_v1 = vpop.f32.mrf.mxu2 }
 0x65e   :  { %2779 = vmatpush.bf16.msra.mxu1 %v5250_v29 }
 0x65f   :  { %2707 = vmatpush.bf16.msra.mxu0 %v5319_v40 }
 0x660   :  { %2681 = vmatpush.bf16.msrb.mxu2 %v5250_v29  ;;  %2689 = vmatpush.bf16.msrb.mxu3 %v5252_v22 }
 0x662   :  { %2780 = vmatpush.bf16.msra.mxu1 %v5258_v19 }
 0x663   :  { %2708 = vmatpush.bf16.msra.mxu0 %v5323_v42 }
 0x664   :  { %2682 = vmatpush.bf16.msrb.mxu2 %v5258_v19  ;;  %2690 = vmatpush.bf16.msrb.mxu3 %v5268_v3 }
 0x665   :  { %2243 = vmatmul.bf16.gmra.mxu0 %v5109_v7  ;;  %2272 = vmatmul.bf16.gmra.mxu1 %v5109_v7  ;;  %v5396_v7 = vpop.f32.mrf.mxu1  ;;  %v5405_v35 = vpop.f32.mrf.mxu2 }
 0x668   :  { %2786 = vmatpush.bf16.msra.mxu2 %v5242_v52  ;;  %2691 = vmatpush.bf16.msrb.mxu3 %v5279_v49 }
 0x66c   :  { %2787 = vmatpush.bf16.msra.mxu2 %v5252_v22  ;;  %2692 = vmatpush.bf16.msrb.mxu3 %v5306_v36 }
 0x66d   :  { %v5403_v41 = vpop.f32.mrf.mxu1  ;;  %v1999_v10 = vpop.f32.mrf.mxu2 }
 0x670   :  { %2788 = vmatpush.bf16.msra.mxu2 %v5268_v3  ;;  %2693 = vmatpush.bf16.msrb.mxu3 %v5310_v31 }
 0x674   :  { %2789 = vmatpush.bf16.msra.mxu2 %v5279_v49  ;;  %2694 = vmatpush.bf16.msrb.mxu3 %v5330_v45 }
 0x675   :  { %2248 = vmatmul.bf16.gmra.mxu0 %v5296_v16  ;;  %2277 = vmatmul.bf16.gmra.mxu1 %v5296_v16  ;;  %v1970_v58 = vpop.f32.mrf.mxu1  ;;  %v2002_v38 = vpop.f32.mrf.mxu2 }
 0x678   :  { %2790 = vmatpush.bf16.msra.mxu2 %v5306_v36  ;;  %2695 = vmatpush.bf16.msrb.mxu3 %v5335_v4 }
 0x67c   :  { %2791 = vmatpush.bf16.msra.mxu2 %v5310_v31 }
 0x67d   :  { %v1973_v57 = vpop.f32.mrf.mxu1  ;;  %v5413_v6 = vpop.f32.mrf.mxu2 }
 0x67e   :  { %5757 = vst [vmem:[#allocation32_spill] sm:$0xff] %v5413_v6 }
 0x680   :  { %2792 = vmatpush.bf16.msra.mxu2 %v5330_v45 }
 0x684   :  { %2793 = vmatpush.bf16.msra.mxu2 %v5335_v4 }
 0x685   :  { %v5411_v16 = vpop.f32.mrf.mxu1 }
 0x686   :  { %5756 = vst [vmem:[#allocation22_spill] sm:$0xff] %v5411_v16 }
 0x6b2   :  { %v5415_v14 = vpop.f32.mrf.mxu0  ;;  %v1978_v25 = vpop.f32.mrf.mxu1 }
 0x6b3   :  { %5758 = vst [vmem:[#allocation24_spill] sm:$0xff] %v5415_v14  ;;  %v1979_v14 = vadd.f32 %v1978_v25, %v5424_v54 }
 0x6b9   :  { %v2007_v5 = vpop.f32.mrf.mxu2  ;;  %v5421_v2 = vpop.f32.mrf.mxu3 }
 0x6ba   :  { %v5419_v50 = vpop.f32.mrf.mxu0  ;;  %v1980_v15 = vpop.f32.mrf.mxu1  ;;  %v2008_v9 = vadd.f32 %v2007_v5, %v5427_v59  ;;  %v1974_v5 = vadd.f32 %v1973_v57, %v5424_v54 }
 0x6bb   :  { %5759 = vst [vmem:[#allocation29_spill] sm:$0xff] %v5419_v50  ;;  %v1981_v51 = vadd.f32 %v1980_v15, %v5424_v54  ;;  %v1935_v50 = vadd.f32 %v5168_v26, %v5271_v33 }
 0x6c1   :  { %v2009_v17 = vpop.f32.mrf.mxu2  ;;  %v2222_v30 = vpop.f32.mrf.mxu3 }
 0x6c2   :  { %v2010_v37 = vadd.f32 %v2009_v17, %v5427_v59  ;;  %v2234_v62 = vpop.f32.mrf.mxu0  ;;  %v2263_v43 = vpop.f32.mrf.mxu1  ;;  %v2346_v27 = vadd.f32 %v2222_v30, %v1935_v50 }
 0x6c3   :  { %v5431_v13 = vadd.f32 %v2234_v62, %v1981_v51 }
 0x6c4   :  { %v5433_v20 = vadd.f32 %v2263_v43, %v2010_v37 }
 0x6c5   :  { %5760 = vst [vmem:[#allocation23_spill] sm:$0xff] %v5431_v13 }
 0x6c6   :  { %5761 = vst [vmem:[#allocation19_spill] sm:$0xff] %v5433_v20 }
 0x6c9   :  { %v2486_v6 = vpop.f32.mrf.mxu2 }
 0x6ca   :  { %v2516_v15 = vadd.f32 %v2486_v6, %v2346_v27  ;;  %v2236_v47 = vpop.f32.mrf.mxu0  ;;  %v2265_v0 = vpop.f32.mrf.mxu1  ;;  %v2003_v27 = vadd.f32 %v2002_v38, %v5427_v59 }
 0x6cb   :  { %v5439_v17 = vadd.f32 %v2236_v47, %v1979_v14  ;;  %v5441_v16 = vadd.f32 %v2265_v0, %v2008_v9  ;;  %v2499_v26 = vpop.f32.mrf.mxu3 }
 0x6cc   :  { %v3988_v51 = vmul.f32 -1.442695, %v2516_v15  ;;  %v1971_v15 = vadd.f32 %v1970_v58, %v5424_v54 }
 0x6cd   :  { %5762 = vst [vmem:[#allocation25_spill] sm:$0xff] %v5439_v17 }
 0x6ce   :  { %5763 = vst [vmem:[#allocation30_spill] sm:$0xff] %v5441_v16  ;;  %4288 = vpow2.f32 %v3988_v51  ;;  %v2000_v51 = vadd.f32 %v1999_v10, %v5427_v59 }
 0x6d1   :  { %v2488_v37 = vpop.f32.mrf.mxu2 }
 0x6d2   :  { %v5443_v62 = vpop.f32.mrf.mxu0  ;;  %v5445_v43 = vpop.f32.mrf.mxu1 }
 0x6d3   :  { %5764 = vst [vmem:[#allocation26_spill] sm:$0xff] %v5443_v62  ;;  %v2501_v9 = vpop.f32.mrf.mxu3 }
 0x6d4   :  { %5765 = vst [vmem:[#allocation27_spill] sm:$0xff] %v5445_v43  ;;  %v4289_v30 = vpop.eup %4288 }
 0x6d5   :  { %v2520_v25 = vadd.f32 1.0, %v4289_v30 }
 0x6d7   :  { %4290 = vrcp.f32 %v2520_v25  ;;  %vm2526_vm1 = vweird.f32 %v2520_v25  ;;  %v2530_v17 = vand.u32 2147483647, %v2520_v25 }
 0x6d9   :  { %v2512_v6 = vpop.f32.mrf.mxu2  ;;  %vm2531_vm3 = vcmp.eq.f32.partialorder %v2530_v17, 8.507059e+37 }
 0x6da   :  { %v2241_v50 = vpop.f32.mrf.mxu0  ;;  %v2270_v47 = vpop.f32.mrf.mxu1 }
 0x6db   :  { %v5449_v14 = vadd.f32 %v2241_v50, %v1974_v5  ;;  %v5451_v0 = vadd.f32 %v2270_v47, %v2003_v27  ;;  %v1969_v5 = vadd.f32 %v5403_v41, %v5424_v54  ;;  %v1998_v27 = vadd.f32 %v5405_v35, %v5427_v59  ;;  %v5474_v35 = vld [vmem:[%s5707_s9] ss:$0 sm:$0xff] }
 0x6dd   :  { %5766 = vst [vmem:[#allocation28_spill] sm:$0xff] %v5449_v14  ;;  %v4291_v20 = vpop.eup %4290 }
 0x6de   :  { %5767 = vst [vmem:[#allocation34_spill] sm:$0xff] %v5451_v0  ;;  %v2522_v16 = vmul.f32 %v4291_v20, %v2520_v25  ;;  %vm2527_vm0 = vweird.f32 %v4291_v20 }
 0x6df   :  { %vm2528_vm2 = vmor %vm2526_vm1, %vm2527_vm0 }
 0x6e0   :  { %v2523_v50 = vsub.f32 1.0, %v2522_v16 }
 0x6e1   :  { %v2514_v37 = vpop.f32.mrf.mxu2 }
 0x6e2   :  { %v2244_v30 = vpop.f32.mrf.mxu0  ;;  %v2273_v13 = vpop.f32.mrf.mxu1  ;;  %v2524_v37 = vmul.f32 %v4291_v20, %v2523_v50 }
 0x6e3   :  { %v5455_v57 = vadd.f32 %v2244_v30, %v1971_v15  ;;  %v5457_v38 = vadd.f32 %v2273_v13, %v2000_v51  ;;  %v1995_v15 = vadd.f32 %v5401_v1, %v5427_v59  ;;  %v2532_v51 = vand.u32 2147483648, %v2520_v25 }
 0x6e4   :  { %v2525_v13 = vadd.f32 %v4291_v20, %v2524_v37  ;;  %v2559_v1 = vadd.f32 %v5474_v35, %v2512_v6  ;;  %v1993_v25 = vadd.f32 %v5392_v8, %v5427_v59 }
 0x6ea   :  { %v2246_v47 = vpop.f32.mrf.mxu0  ;;  %v2275_v58 = vpop.f32.mrf.mxu1 }
 0x6eb   :  { %v5463_v9 = vadd.f32 %v2246_v47, %v1969_v5  ;;  %v5465_v10 = vadd.f32 %v2275_v58, %v1998_v27  ;;  %v2529_v5 = vsel %vm2528_vm2, %v4291_v20, %v2525_v13  ;;  %v2533_v27 = vor.u32 1.1754944e-38, %v2532_v51 }
 0x6ec   :  { %v1964_v47 = vadd.f32 %v5387_v46, %v5424_v54 }
 0x6ed   :  { %v2534_v50 = vsel %vm2531_vm3, %v2533_v27, %v2529_v5 }
 0x6ee   :  { %v2560_v43 = vmul.f32 %v2559_v1, %v2534_v50 }
 0x6f2   :  { %v5469_v30 = vpop.f32.mrf.mxu0  ;;  %v2278_v41 = vpop.f32.mrf.mxu1 }
 0x6f3   :  { %v5476_v16 = vadd.f32 %v2278_v41, %v1995_v15 }
 0x6fa   :  { %v2251_v58 = vpop.f32.mrf.mxu0  ;;  %v2280_v37 = vpop.f32.mrf.mxu1 }
 0x6fb   :  { %v2347_v62 = vadd.f32 %v2251_v58, %v1964_v47  ;;  %v2348_v0 = vadd.f32 %v2280_v37, %v1993_v25  ;;  %v1966_v58 = vadd.f32 %v5396_v7, %v5424_v54 }
 0x6fd   :  { %v2536_v15 = vadd.f32 %v2499_v26, %v2347_v62  ;;  %v2561_v41 = vadd.f32 %v2560_v43, %v2348_v0  ;;  %v2575_v37 = vadd.f32 %v5469_v30, %v1966_v58 }
 0x6ff   :  { %v3989_v14 = vmul.f32 -1.442695, %v2536_v15 }
 0x701   :  { %4292 = vpow2.f32 %v3989_v14 }
 0x707   :  { %v4293_v20 = vpop.eup %4292 }
 0x708   :  { %v2540_v17 = vadd.f32 1.0, %v4293_v20 }
 0x70a   :  { %4294 = vrcp.f32 %v2540_v17  ;;  %v2552_v5 = vand.u32 2147483648, %v2540_v17  ;;  %v2550_v27 = vand.u32 2147483647, %v2540_v17  ;;  %vm2546_vm5 = vweird.f32 %v2540_v17 }
 0x70b   :  { %4296 = vtanh.f32 %v2561_v41 }
 0x70c   :  { %v2553_v1 = vor.u32 1.1754944e-38, %v2552_v5  ;;  %vm2551_vm7 = vcmp.eq.f32.partialorder %v2550_v27, 8.507059e+37 }
 0x710   :  { %v4295_v6 = vpop.eup %4294 }
 0x711   :  { %v2542_v13 = vmul.f32 %v4295_v6, %v2540_v17  ;;  %vm2547_vm4 = vweird.f32 %v4295_v6  ;;  %v4297_v26 = vpop.eup %4296  ;;  %v1937_v17 = vadd.f32 %v5178_v24, %v5271_v33 }
 0x712   :  { %vm2548_vm6 = vmor %vm2546_vm5, %vm2547_vm4 }
 0x713   :  { %v2543_v51 = vsub.f32 1.0, %v2542_v13  ;;  %v2574_v13 = vadd.f32 %v5421_v2, %v1937_v17 }
 0x715   :  { %v2544_v46 = vmul.f32 %v4295_v6, %v2543_v51 }
 0x717   :  { %v2545_v8 = vadd.f32 %v4295_v6, %v2544_v46 }
 0x719   :  { %v2549_v50 = vsel %vm2548_vm6, %v4295_v6, %v2545_v8 }
 0x71a   :  { %v2554_v62 = vsel %vm2551_vm7, %v2553_v1, %v2549_v50 }
 0x71b   :  { %v2563_v43 = vsub.f32 1.0, %v2554_v62  ;;  %v2565_v0 = vmul.f32 0.0, %v2554_v62 }
 0x71d   :  { %v2564_v14 = vmul.f32 %v4297_v26, %v2563_v43 }
 0x71f   :  { %v2566_v47 = vadd.f32 %v2565_v0, %v2564_v14 }
 0x721   :  { %v5483_v25 = vpack.c.bf16 %v2566_v47, %v2566_v47 }
 0x723   :  { %2585 = vmatmul.bf16.vlgmr.msra.gmra.mxu3 %v5483_v25  ;;  %2598 = vmatmul.bf16.vlgmr.msrb.gmra.mxu0 %v5483_v25 }
 0x724   :  { %2611 = vmatmul.bf16.vlgmr.msrb.gmra.mxu1 %v5483_v25  ;;  %2799 = vmatpush.bf16.msra.mxu3 %v5265_v18 }
 0x725   :  { %2871 = vmatpush.bf16.msrb.mxu0 %v5173_v12  ;;  %2884 = vmatpush.bf16.msrb.mxu1 %v5242_v52 }
 0x728   :  { %2800 = vmatpush.bf16.msra.mxu3 %v5276_v32 }
 0x729   :  { %2872 = vmatpush.bf16.msrb.mxu0 %v5180_v21  ;;  %2885 = vmatpush.bf16.msrb.mxu1 %v5252_v22 }
 0x72c   :  { %2801 = vmatpush.bf16.msra.mxu3 %v5287_v56 }
 0x72d   :  { %2873 = vmatpush.bf16.msrb.mxu0 %v5188_v63  ;;  %2886 = vmatpush.bf16.msrb.mxu1 %v5268_v3 }
 0x730   :  { %2802 = vmatpush.bf16.msra.mxu3 %v5293_v11 }
 0x731   :  { %2874 = vmatpush.bf16.msrb.mxu0 %v5197_v44  ;;  %2887 = vmatpush.bf16.msrb.mxu1 %v5279_v49 }
 0x734   :  { %2803 = vmatpush.bf16.msra.mxu3 %v5303_v34 }
 0x735   :  { %2875 = vmatpush.bf16.msrb.mxu0 %v5217_v55  ;;  %2888 = vmatpush.bf16.msrb.mxu1 %v5306_v36 }
 0x738   :  { %2804 = vmatpush.bf16.msra.mxu3 %v5313_v39 }
 0x739   :  { %2876 = vmatpush.bf16.msrb.mxu0 %v5236_v28  ;;  %2889 = vmatpush.bf16.msrb.mxu1 %v5310_v31 }
 0x73c   :  { %2805 = vmatpush.bf16.msra.mxu3 %v5319_v40 }
 0x73d   :  { %2877 = vmatpush.bf16.msrb.mxu0 %v5250_v29  ;;  %2890 = vmatpush.bf16.msrb.mxu1 %v5330_v45 }
 0x740   :  { %2806 = vmatpush.bf16.msra.mxu3 %v5323_v42 }
 0x741   :  { %2878 = vmatpush.bf16.msrb.mxu0 %v5258_v19  ;;  %2891 = vmatpush.bf16.msrb.mxu1 %v5335_v4 }
 0x7a0   :  { %v2599_v15 = vpop.f32.mrf.mxu0 }
 0x7a1   :  { %v2636_v41 = vadd.f32 %v2599_v15, %v2575_v37  ;;  %v2612_v20 = vpop.f32.mrf.mxu1 }
 0x7a3   :  { %v3991_v6 = vmul.f32 -1.442695, %v2636_v41 }
 0x7a5   :  { %4298 = vpow2.f32 %v3991_v6  ;;  %v2662_v6 = vunpack.c.l.bf16 %v5483_v25 }
 0x7a6   :  { %v2586_v51 = vpop.f32.mrf.mxu3 }
 0x7a7   :  { %v2616_v5 = vadd.f32 %v2586_v51, %v2574_v13 }
 0x7a8   :  { %v2601_v46 = vpop.f32.mrf.mxu0 }
 0x7a9   :  { %v3990_v27 = vmul.f32 -1.442695, %v2616_v5  ;;  %v2614_v8 = vpop.f32.mrf.mxu1 }
 0x7ab   :  { %v4299_v1 = vpop.eup %4298  ;;  %4300 = vpow2.f32 %v3990_v27 }
 0x7ac   :  { %v2640_v7 = vadd.f32 1.0, %v4299_v1 }
 0x7ae   :  { %4302 = vrcp.f32 %v2640_v7  ;;  %v2588_v30 = vpop.f32.mrf.mxu3  ;;  %v2652_v14 = vand.u32 2147483648, %v2640_v7  ;;  %v2650_v2 = vand.u32 2147483647, %v2640_v7  ;;  %vm2646_vm9 = vweird.f32 %v2640_v7 }
 0x7b0   :  { %v2653_v15 = vor.u32 1.1754944e-38, %v2652_v14  ;;  %vm2651_vm11 = vcmp.eq.f32.partialorder %v2650_v2, 8.507059e+37 }
 0x7b1   :  { %v4301_v50 = vpop.eup %4300 }
 0x7b2   :  { %v2620_v62 = vadd.f32 1.0, %v4301_v50 }
 0x7b4   :  { %v4303_v43 = vpop.eup %4302  ;;  %4304 = vrcp.f32 %v2620_v62  ;;  %v2632_v13 = vand.u32 2147483648, %v2620_v62  ;;  %v2630_v46 = vand.u32 2147483647, %v2620_v62  ;;  %vm2626_vm13 = vweird.f32 %v2620_v62 }
 0x7b5   :  { %v2642_v26 = vmul.f32 %v4303_v43, %v2640_v7  ;;  %vm2647_vm8 = vweird.f32 %v4303_v43  ;;  %v2656_v7 = vadd.f32 %v5474_v35, %v2612_v20  ;;  %v1940_v20 = vadd.f32 %v5190_v61, %v5271_v33 }
 0x7b6   :  { %vm2648_vm10 = vmor %vm2646_vm9, %vm2647_vm8  ;;  %v2633_v1 = vor.u32 1.1754944e-38, %v2632_v13  ;;  %vm2631_vm15 = vcmp.eq.f32.partialorder %v2630_v46, 8.507059e+37 }
 0x7b7   :  { %v2643_v24 = vsub.f32 1.0, %v2642_v26 }
 0x7b9   :  { %v2644_v0 = vmul.f32 %v4303_v43, %v2643_v24 }
 0x7ba   :  { %v4305_v47 = vpop.eup %4304 }
 0x7bb   :  { %v2645_v58 = vadd.f32 %v4303_v43, %v2644_v0  ;;  %v2622_v37 = vmul.f32 %v4305_v47, %v2620_v62  ;;  %vm2627_vm12 = vweird.f32 %v4305_v47  ;;  %v2672_v62 = vadd.f32 %v5417_v60, %v1940_v20 }
 0x7bc   :  { %vm2628_vm14 = vmor %vm2626_vm13, %vm2627_vm12 }
 0x7bd   :  { %v2623_v41 = vsub.f32 1.0, %v2622_v37  ;;  %v2649_v17 = vsel %vm2648_vm10, %v4303_v43, %v2645_v58 }
 0x7be   :  { %v2654_v51 = vsel %vm2651_vm11, %v2653_v15, %v2649_v17 }
 0x7bf   :  { %v2624_v5 = vmul.f32 %v4305_v47, %v2623_v41  ;;  %v2663_v27 = vmul.f32 %v2662_v6, %v2654_v51  ;;  %v2660_v25 = vsub.f32 1.0, %v2654_v51 }
 0x7c1   :  { %v2625_v8 = vadd.f32 %v4305_v47, %v2624_v5 }
 0x7c3   :  { %v2629_v30 = vsel %vm2628_vm14, %v4305_v47, %v2625_v8 }
 0x7c4   :  { %v2634_v50 = vsel %vm2631_vm15, %v2633_v1, %v2629_v30 }
 0x7c5   :  { %v2657_v26 = vmul.f32 %v2656_v7, %v2634_v50 }
 0x7c7   :  { %v2658_v43 = vadd.f32 %v2657_v26, %v5476_v16 }
 0x7c9   :  { %4306 = vtanh.f32 %v2658_v43 }
 0x7cf   :  { %v4307_v24 = vpop.eup %4306 }
 0x7d0   :  { %v2661_v14 = vmul.f32 %v4307_v24, %v2660_v25 }
 0x7d2   :  { %v2664_v0 = vadd.f32 %v2663_v27, %v2661_v14 }
 0x7d4   :  { %v5521_v2 = vpack.c.bf16 %v2664_v0, %v2664_v0 }
 0x7d6   :  { %2683 = vmatmul.bf16.vlgmr.msrb.gmra.mxu2 %v5521_v2  ;;  %2696 = vmatmul.bf16.vlgmr.msrb.gmra.mxu3 %v5521_v2 }
 0x7d7   :  { %2709 = vmatmul.bf16.vlgmr.msra.gmra.mxu0 %v5521_v2  ;;  %2897 = vmatpush.bf16.msrb.mxu2 %v5265_v18 }
 0x7d8   :  { %2969 = vmatpush.bf16.msrb.mxu3 %v5173_v12  ;;  %2982 = vmatpush.bf16.msra.mxu0 %v5242_v52 }
 0x7db   :  { %2898 = vmatpush.bf16.msrb.mxu2 %v5276_v32 }
 0x7dc   :  { %2970 = vmatpush.bf16.msrb.mxu3 %v5180_v21  ;;  %2983 = vmatpush.bf16.msra.mxu0 %v5252_v22 }
 0x7df   :  { %2899 = vmatpush.bf16.msrb.mxu2 %v5287_v56 }
 0x7e0   :  { %2971 = vmatpush.bf16.msrb.mxu3 %v5188_v63  ;;  %2984 = vmatpush.bf16.msra.mxu0 %v5268_v3 }
 0x7e3   :  { %2900 = vmatpush.bf16.msrb.mxu2 %v5293_v11 }
 0x7e4   :  { %2972 = vmatpush.bf16.msrb.mxu3 %v5197_v44  ;;  %2985 = vmatpush.bf16.msra.mxu0 %v5279_v49 }
 0x7e7   :  { %2901 = vmatpush.bf16.msrb.mxu2 %v5303_v34 }
 0x7e8   :  { %2973 = vmatpush.bf16.msrb.mxu3 %v5217_v55  ;;  %2986 = vmatpush.bf16.msra.mxu0 %v5306_v36 }
 0x7eb   :  { %2902 = vmatpush.bf16.msrb.mxu2 %v5313_v39 }
 0x7ec   :  { %2974 = vmatpush.bf16.msrb.mxu3 %v5236_v28  ;;  %2987 = vmatpush.bf16.msra.mxu0 %v5310_v31 }
 0x7ef   :  { %2903 = vmatpush.bf16.msrb.mxu2 %v5319_v40 }
 0x7f0   :  { %2975 = vmatpush.bf16.msrb.mxu3 %v5250_v29  ;;  %2988 = vmatpush.bf16.msra.mxu0 %v5330_v45 }
 0x7f3   :  { %2904 = vmatpush.bf16.msrb.mxu2 %v5323_v42 }
 0x7f4   :  { %2976 = vmatpush.bf16.msrb.mxu3 %v5258_v19  ;;  %2989 = vmatpush.bf16.msra.mxu0 %v5335_v4 }
 0x854   :  { %v2710_v16 = vpop.f32.mrf.mxu0 }
 0x859   :  { %v2684_v47 = vpop.f32.mrf.mxu2  ;;  %v2697_v58 = vpop.f32.mrf.mxu3 }
 0x85a   :  { %v2714_v37 = vadd.f32 %v2684_v47, %v2672_v62  ;;  %v2734_v15 = vadd.f32 %v2697_v58, %v5463_v9  ;;  %v2754_v47 = vadd.f32 %v5474_v35, %v2710_v16 }
 0x85c   :  { %v3992_v41 = vmul.f32 -1.442695, %v2714_v37  ;;  %v3993_v17 = vmul.f32 -1.442695, %v2734_v15  ;;  %v2712_v6 = vpop.f32.mrf.mxu0 }
 0x85e   :  { %4308 = vpow2.f32 %v3992_v41 }
 0x85f   :  { %4310 = vpow2.f32 %v3993_v17  ;;  %v2760_v17 = vunpack.c.l.bf16 %v5521_v2 }
 0x861   :  { %v2686_v13 = vpop.f32.mrf.mxu2  ;;  %v2699_v51 = vpop.f32.mrf.mxu3 }
 0x864   :  { %v4309_v5 = vpop.eup %4308 }
 0x865   :  { %v4311_v46 = vpop.eup %4310  ;;  %v2718_v27 = vadd.f32 1.0, %v4309_v5 }
 0x866   :  { %v2738_v8 = vadd.f32 1.0, %v4311_v46 }
 0x867   :  { %4312 = vrcp.f32 %v2718_v27  ;;  %v2730_v50 = vand.u32 2147483648, %v2718_v27  ;;  %v2728_v43 = vand.u32 2147483647, %v2718_v27  ;;  %vm2724_vm2 = vweird.f32 %v2718_v27 }
 0x868   :  { %4314 = vrcp.f32 %v2738_v8  ;;  %v2750_v25 = vand.u32 2147483648, %v2738_v8  ;;  %v2748_v14 = vand.u32 2147483647, %v2738_v8  ;;  %vm2744_vm4 = vweird.f32 %v2738_v8 }
 0x869   :  { %v2731_v20 = vor.u32 1.1754944e-38, %v2730_v50  ;;  %vm2729_vm5 = vcmp.eq.f32.partialorder %v2728_v43, 8.507059e+37 }
 0x86a   :  { %v2751_v37 = vor.u32 1.1754944e-38, %v2750_v25  ;;  %vm2749_vm7 = vcmp.eq.f32.partialorder %v2748_v14, 8.507059e+37 }
 0x86d   :  { %v4313_v61 = vpop.eup %4312 }
 0x86e   :  { %v4315_v60 = vpop.eup %4314  ;;  %v2720_v1 = vmul.f32 %v4313_v61, %v2718_v27  ;;  %vm2725_vm0 = vweird.f32 %v4313_v61 }
 0x86f   :  { %v2740_v7 = vmul.f32 %v4315_v60, %v2738_v8  ;;  %vm2745_vm1 = vweird.f32 %v4315_v60  ;;  %vm2726_vm3 = vmor %vm2724_vm2, %vm2725_vm0 }
 0x870   :  { %v2721_v30 = vsub.f32 1.0, %v2720_v1  ;;  %vm2746_vm6 = vmor %vm2744_vm4, %vm2745_vm1 }
 0x871   :  { %v2741_v9 = vsub.f32 1.0, %v2740_v7 }
 0x872   :  { %v2722_v26 = vmul.f32 %v4313_v61, %v2721_v30 }
 0x873   :  { %v2742_v24 = vmul.f32 %v4315_v60, %v2741_v9 }
 0x874   :  { %v2723_v0 = vadd.f32 %v4313_v61, %v2722_v26 }
 0x875   :  { %v2743_v62 = vadd.f32 %v4315_v60, %v2742_v24 }
 0x876   :  { %v2727_v58 = vsel %vm2726_vm3, %v4313_v61, %v2723_v0 }
 0x877   :  { %v2732_v15 = vsel %vm2729_vm5, %v2731_v20, %v2727_v58  ;;  %v2747_v41 = vsel %vm2746_vm6, %v4315_v60, %v2743_v62 }
 0x878   :  { %v2755_v6 = vmul.f32 %v2754_v47, %v2732_v15  ;;  %v2752_v13 = vsel %vm2749_vm7, %v2751_v37, %v2747_v41 }
 0x879   :  { %v2761_v51 = vmul.f32 %v2760_v17, %v2752_v13  ;;  %v2758_v46 = vsub.f32 1.0, %v2752_v13 }
 0x87a   :  { %v2756_v5 = vadd.f32 %v2755_v6, %v5465_v10  ;;  %v1942_v10 = vadd.f32 %v5238_v23, %v5271_v33 }
 0x87c   :  { %4316 = vtanh.f32 %v2756_v5  ;;  %v2770_v2 = vadd.f32 %v5407_v48, %v1942_v10 }
 0x882   :  { %v4317_v27 = vpop.eup %4316 }
 0x883   :  { %v2759_v8 = vmul.f32 %v4317_v27, %v2758_v46 }
 0x885   :  { %v2762_v1 = vadd.f32 %v2761_v51, %v2759_v8 }
 0x887   :  { %v5557_v16 = vpack.c.bf16 %v2762_v1, %v2762_v1 }
 0x889   :  { %2781 = vmatmul.bf16.vlgmr.msra.gmra.mxu1 %v5557_v16  ;;  %2794 = vmatmul.bf16.vlgmr.msra.gmra.mxu2 %v5557_v16 }
 0x88a   :  { %2807 = vmatmul.bf16.vlgmr.msra.gmra.mxu3 %v5557_v16  ;;  %2995 = vmatpush.bf16.msra.mxu1 %v5265_v18 }
 0x88b   :  { %3067 = vmatpush.bf16.msra.mxu2 %v5173_v12  ;;  %3080 = vmatpush.bf16.msra.mxu3 %v5242_v52 }
 0x88e   :  { %2996 = vmatpush.bf16.msra.mxu1 %v5276_v32 }
 0x88f   :  { %3068 = vmatpush.bf16.msra.mxu2 %v5180_v21  ;;  %3081 = vmatpush.bf16.msra.mxu3 %v5252_v22 }
 0x892   :  { %2997 = vmatpush.bf16.msra.mxu1 %v5287_v56 }
 0x893   :  { %3069 = vmatpush.bf16.msra.mxu2 %v5188_v63  ;;  %3082 = vmatpush.bf16.msra.mxu3 %v5268_v3 }
 0x896   :  { %2998 = vmatpush.bf16.msra.mxu1 %v5293_v11 }
 0x897   :  { %3070 = vmatpush.bf16.msra.mxu2 %v5197_v44  ;;  %3083 = vmatpush.bf16.msra.mxu3 %v5279_v49 }
 0x89a   :  { %2999 = vmatpush.bf16.msra.mxu1 %v5303_v34 }
 0x89b   :  { %3071 = vmatpush.bf16.msra.mxu2 %v5217_v55  ;;  %3084 = vmatpush.bf16.msra.mxu3 %v5306_v36 }
 0x89e   :  { %3000 = vmatpush.bf16.msra.mxu1 %v5313_v39 }
 0x89f   :  { %3072 = vmatpush.bf16.msra.mxu2 %v5236_v28  ;;  %3085 = vmatpush.bf16.msra.mxu3 %v5310_v31 }
 0x8a2   :  { %3001 = vmatpush.bf16.msra.mxu1 %v5319_v40 }
 0x8a3   :  { %3073 = vmatpush.bf16.msra.mxu2 %v5250_v29  ;;  %3086 = vmatpush.bf16.msra.mxu3 %v5330_v45 }
 0x8a6   :  { %3002 = vmatpush.bf16.msra.mxu1 %v5323_v42 }
 0x8a7   :  { %3074 = vmatpush.bf16.msra.mxu2 %v5258_v19  ;;  %3087 = vmatpush.bf16.msra.mxu3 %v5335_v4 }
 0x906   :  { %v2782_v61 = vpop.f32.mrf.mxu1 }
 0x907   :  { %v2812_v60 = vadd.f32 %v2782_v61, %v2770_v2 }
 0x909   :  { %v3994_v7 = vmul.f32 -1.442695, %v2812_v60 }
 0x90b   :  { %4318 = vpow2.f32 %v3994_v7 }
 0x90c   :  { %v2795_v30 = vpop.f32.mrf.mxu2 }
 0x90d   :  { %v2832_v50 = vadd.f32 %v2795_v30, %v5455_v57  ;;  %v2808_v9 = vpop.f32.mrf.mxu3  ;;  %v2858_v30 = vunpack.c.l.bf16 %v5557_v16 }
 0x90e   :  { %v2784_v26 = vpop.f32.mrf.mxu1  ;;  %v2852_v5 = vadd.f32 %v5474_v35, %v2808_v9 }
 0x90f   :  { %v3995_v43 = vmul.f32 -1.442695, %v2832_v50 }
 0x911   :  { %v4319_v25 = vpop.eup %4318  ;;  %4320 = vpow2.f32 %v3995_v43 }
 0x912   :  { %v2816_v24 = vadd.f32 1.0, %v4319_v25 }
 0x914   :  { %4322 = vrcp.f32 %v2816_v24  ;;  %v2797_v14 = vpop.f32.mrf.mxu2  ;;  %v2828_v58 = vand.u32 2147483648, %v2816_v24  ;;  %v2826_v15 = vand.u32 2147483647, %v2816_v24  ;;  %vm2822_vm9 = vweird.f32 %v2816_v24 }
 0x915   :  { %v2810_v0 = vpop.f32.mrf.mxu3 }
 0x916   :  { %v2829_v6 = vor.u32 1.1754944e-38, %v2828_v58  ;;  %vm2827_vm11 = vcmp.eq.f32.partialorder %v2826_v15, 8.507059e+37 }
 0x917   :  { %v4321_v20 = vpop.eup %4320 }
 0x918   :  { %v2836_v23 = vadd.f32 1.0, %v4321_v20 }
 0x91a   :  { %v4323_v62 = vpop.eup %4322  ;;  %4324 = vrcp.f32 %v2836_v23  ;;  %v2848_v46 = vand.u32 2147483648, %v2836_v23  ;;  %v2846_v1 = vand.u32 2147483647, %v2836_v23  ;;  %vm2842_vm13 = vweird.f32 %v2836_v23 }
 0x91b   :  { %v2818_v48 = vmul.f32 %v4323_v62, %v2816_v24  ;;  %vm2823_vm8 = vweird.f32 %v4323_v62 }
 0x91c   :  { %vm2824_vm10 = vmor %vm2822_vm9, %vm2823_vm8  ;;  %v2849_v60 = vor.u32 1.1754944e-38, %v2848_v46  ;;  %vm2847_vm15 = vcmp.eq.f32.partialorder %v2846_v1, 8.507059e+37 }
 0x91d   :  { %v2819_v47 = vsub.f32 1.0, %v2818_v48 }
 0x91f   :  { %v2820_v37 = vmul.f32 %v4323_v62, %v2819_v47 }
 0x920   :  { %v4325_v57 = vpop.eup %4324 }
 0x921   :  { %v2838_v41 = vmul.f32 %v4325_v57, %v2836_v23  ;;  %v2821_v17 = vadd.f32 %v4323_v62, %v2820_v37  ;;  %vm2843_vm12 = vweird.f32 %v4325_v57 }
 0x922   :  { %vm2844_vm14 = vmor %vm2842_vm13, %vm2843_vm12 }
 0x923   :  { %v2839_v13 = vsub.f32 1.0, %v2838_v41  ;;  %v2825_v51 = vsel %vm2824_vm10, %v4323_v62, %v2821_v17 }
 0x924   :  { %v2830_v27 = vsel %vm2827_vm11, %v2829_v6, %v2825_v51 }
 0x925   :  { %v2840_v8 = vmul.f32 %v4325_v57, %v2839_v13  ;;  %v2853_v10 = vmul.f32 %v2852_v5, %v2830_v27 }
 0x927   :  { %v2841_v2 = vadd.f32 %v4325_v57, %v2840_v8  ;;  %v2854_v61 = vadd.f32 %v2853_v10, %v5457_v38  ;;  %v5769_v10 = vld [vmem:[#allocation34_spill] sm:$0xff] }
 0x929   :  { %v2845_v7 = vsel %vm2844_vm14, %v4325_v57, %v2841_v2  ;;  %4326 = vtanh.f32 %v2854_v61 }
 0x92a   :  { %v2850_v50 = vsel %vm2847_vm15, %v2849_v60, %v2845_v7 }
 0x92b   :  { %v2859_v26 = vmul.f32 %v2858_v30, %v2850_v50  ;;  %v2856_v9 = vsub.f32 1.0, %v2850_v50 }
 0x92f   :  { %v4327_v43 = vpop.eup %4326 }
 0x930   :  { %v2857_v25 = vmul.f32 %v4327_v43, %v2856_v9  ;;  %v5771_v43 = vld [vmem:[#allocation26_spill] sm:$0xff] }
 0x932   :  { %v2860_v24 = vadd.f32 %v2859_v26, %v2857_v25  ;;  %v5770_v26 = vld [vmem:[#allocation22_spill] sm:$0xff] }
 0x933   :  { %v1976_v9 = vadd.f32 %v5770_v26, %v5424_v54 }
 0x934   :  { %v5593_v14 = vpack.c.bf16 %v2860_v24, %v2860_v24 }
 0x935   :  { %v2967_v25 = vadd.f32 %v5771_v43, %v1976_v9  ;;  %v5778_v43 = vld [vmem:[#allocation25_spill] sm:$0xff] }
 0x936   :  { %2879 = vmatmul.bf16.vlgmr.msrb.gmra.mxu0 %v5593_v14  ;;  %2892 = vmatmul.bf16.vlgmr.msrb.gmra.mxu1 %v5593_v14  ;;  %v2956_v46 = vunpack.c.l.bf16 %v5593_v14 }
 0x937   :  { %2905 = vmatmul.bf16.vlgmr.msrb.gmra.mxu2 %v5593_v14  ;;  %3093 = vmatpush.bf16.msrb.mxu0 %v5265_v18 }
 0x938   :  { %3165 = vmatpush.bf16.msrb.mxu1 %v5173_v12  ;;  %3178 = vmatpush.bf16.msrb.mxu2 %v5242_v52 }
 0x93b   :  { %3094 = vmatpush.bf16.msrb.mxu0 %v5276_v32 }
 0x93c   :  { %3166 = vmatpush.bf16.msrb.mxu1 %v5180_v21  ;;  %3179 = vmatpush.bf16.msrb.mxu2 %v5252_v22 }
 0x93f   :  { %3095 = vmatpush.bf16.msrb.mxu0 %v5287_v56 }
 0x940   :  { %3167 = vmatpush.bf16.msrb.mxu1 %v5188_v63  ;;  %3180 = vmatpush.bf16.msrb.mxu2 %v5268_v3 }
 0x943   :  { %3096 = vmatpush.bf16.msrb.mxu0 %v5293_v11 }
 0x944   :  { %3168 = vmatpush.bf16.msrb.mxu1 %v5197_v44  ;;  %3181 = vmatpush.bf16.msrb.mxu2 %v5279_v49  ;;  %v5768_v44 = vld [vmem:[#allocation28_spill] sm:$0xff] }
 0x947   :  { %3097 = vmatpush.bf16.msrb.mxu0 %v5303_v34 }
 0x948   :  { %3169 = vmatpush.bf16.msrb.mxu1 %v5217_v55  ;;  %3182 = vmatpush.bf16.msrb.mxu2 %v5306_v36 }
 0x94b   :  { %3098 = vmatpush.bf16.msrb.mxu0 %v5313_v39 }
 0x94c   :  { %3170 = vmatpush.bf16.msrb.mxu1 %v5236_v28  ;;  %3183 = vmatpush.bf16.msrb.mxu2 %v5310_v31 }
 0x94f   :  { %3099 = vmatpush.bf16.msrb.mxu0 %v5319_v40 }
 0x950   :  { %3171 = vmatpush.bf16.msrb.mxu1 %v5250_v29  ;;  %3184 = vmatpush.bf16.msrb.mxu2 %v5330_v45 }
 0x953   :  { %3100 = vmatpush.bf16.msrb.mxu0 %v5323_v42 }
 0x954   :  { %3172 = vmatpush.bf16.msrb.mxu1 %v5258_v19  ;;  %3185 = vmatpush.bf16.msrb.mxu2 %v5335_v4 }
 0x9b3   :  { %v2880_v12 = vpop.f32.mrf.mxu0  ;;  %v2893_v21 = vpop.f32.mrf.mxu1 }
 0x9b4   :  { %v2910_v63 = vadd.f32 %v2880_v12, %v5283_v53  ;;  %v2930_v55 = vadd.f32 %v2893_v21, %v5768_v44  ;;  %v5773_v12 = vld [vmem:[#allocation33_spill] sm:$0xff] }
 0x9b6   :  { %v3996_v28 = vmul.f32 -1.442695, %v2910_v63  ;;  %v3997_v52 = vmul.f32 -1.442695, %v2930_v55 }
 0x9b8   :  { %4328 = vpow2.f32 %v3996_v28 }
 0x9b9   :  { %4330 = vpow2.f32 %v3997_v52 }
 0x9ba   :  { %v2906_v22 = vpop.f32.mrf.mxu2 }
 0x9bb   :  { %v2882_v29 = vpop.f32.mrf.mxu0  ;;  %v2895_v3 = vpop.f32.mrf.mxu1  ;;  %v2950_v13 = vadd.f32 %v5474_v35, %v2906_v22 }
 0x9be   :  { %v4329_v49 = vpop.eup %4328 }
 0x9bf   :  { %v4331_v36 = vpop.eup %4330  ;;  %v2914_v31 = vadd.f32 1.0, %v4329_v49 }
 0x9c0   :  { %v2934_v45 = vadd.f32 1.0, %v4331_v36 }
 0x9c1   :  { %4332 = vrcp.f32 %v2914_v31  ;;  %v2926_v23 = vand.u32 2147483648, %v2914_v31  ;;  %v2924_v47 = vand.u32 2147483647, %v2914_v31  ;;  %vm2920_vm2 = vweird.f32 %v2914_v31 }
 0x9c2   :  { %4334 = vrcp.f32 %v2934_v45  ;;  %v2908_v19 = vpop.f32.mrf.mxu2  ;;  %v2946_v62 = vand.u32 2147483648, %v2934_v45  ;;  %v2944_v37 = vand.u32 2147483647, %v2934_v45  ;;  %vm2940_vm3 = vweird.f32 %v2934_v45 }
 0x9c3   :  { %v2927_v41 = vor.u32 1.1754944e-38, %v2926_v23  ;;  %vm2925_vm6 = vcmp.eq.f32.partialorder %v2924_v47, 8.507059e+37 }
 0x9c4   :  { %v2947_v17 = vor.u32 1.1754944e-38, %v2946_v62  ;;  %vm2945_vm7 = vcmp.eq.f32.partialorder %v2944_v37, 8.507059e+37 }
 0x9c7   :  { %v4333_v4 = vpop.eup %4332 }
 0x9c8   :  { %v4335_v38 = vpop.eup %4334  ;;  %v2916_v16 = vmul.f32 %v4333_v4, %v2914_v31  ;;  %vm2921_vm0 = vweird.f32 %v4333_v4 }
 0x9c9   :  { %v2936_v53 = vmul.f32 %v4335_v38, %v2934_v45  ;;  %vm2941_vm1 = vweird.f32 %v4335_v38  ;;  %vm2922_vm4 = vmor %vm2920_vm2, %vm2921_vm0 }
 0x9ca   :  { %v2917_v0 = vsub.f32 1.0, %v2916_v16  ;;  %vm2942_vm5 = vmor %vm2940_vm3, %vm2941_vm1 }
 0x9cb   :  { %v2937_v20 = vsub.f32 1.0, %v2936_v53 }
 0x9cc   :  { %v2918_v48 = vmul.f32 %v4333_v4, %v2917_v0 }
 0x9cd   :  { %v2938_v58 = vmul.f32 %v4335_v38, %v2937_v20 }
 0x9ce   :  { %v2919_v15 = vadd.f32 %v4333_v4, %v2918_v48 }
 0x9cf   :  { %v2939_v57 = vadd.f32 %v4335_v38, %v2938_v58 }
 0x9d0   :  { %v2923_v6 = vsel %vm2922_vm4, %v4333_v4, %v2919_v15  ;;  %v5774_v15 = vld [vmem:[#allocation32_spill] sm:$0xff] }
 0x9d1   :  { %v2928_v51 = vsel %vm2925_vm6, %v2927_v41, %v2923_v6  ;;  %v2943_v5 = vsel %vm2942_vm5, %v4335_v38, %v2939_v57  ;;  %v2005_v57 = vadd.f32 %v5774_v15, %v5427_v59  ;;  %v5776_v59 = vld [vmem:[#allocation24_spill] sm:$0xff] }
 0x9d2   :  { %v2948_v27 = vsel %vm2945_vm7, %v2947_v17, %v2943_v5  ;;  %v2951_v8 = vmul.f32 %v2950_v13, %v2928_v51  ;;  %v5775_v13 = vld [vmem:[#allocation27_spill] sm:$0xff] }
 0x9d3   :  { %v2957_v1 = vmul.f32 %v2956_v46, %v2948_v27  ;;  %v2954_v61 = vsub.f32 1.0, %v2948_v27  ;;  %v2968_v51 = vadd.f32 %v5775_v13, %v2005_v57 }
 0x9d4   :  { %v2952_v2 = vadd.f32 %v2951_v8, %v5769_v10 }
 0x9d6   :  { %4336 = vtanh.f32 %v2952_v2 }
 0x9dc   :  { %v4337_v60 = vpop.eup %4336 }
 0x9dd   :  { %v2955_v7 = vmul.f32 %v4337_v60, %v2954_v61  ;;  %v1950_v61 = vadd.f32 %v5776_v59, %v5271_v33  ;;  %v5782_v59 = vld [vmem:[#allocation23_spill] sm:$0xff] }
 0x9df   :  { %v2958_v30 = vadd.f32 %v2957_v1, %v2955_v7  ;;  %v5777_v7 = vld [vmem:[#allocation21_spill] sm:$0xff] }
 0x9e1   :  { %v2959_v50 = vpack.c.bf16 %v2958_v30, %v2958_v30  ;;  %v3064_v30 = vadd.f32 %v5777_v7, %v1950_v61 }
 0x9e3   :  { %2977 = vmatmul.bf16.vlgmr.msrb.gmra.mxu3 %v2959_v50  ;;  %2990 = vmatmul.bf16.vlgmr.msra.gmra.mxu0 %v2959_v50  ;;  %v3054_v0 = vunpack.c.l.bf16 %v2959_v50 }
 0x9e4   :  { %3003 = vmatmul.bf16.vlgmr.msra.gmra.mxu1 %v2959_v50  ;;  %3191 = vmatpush.bf16.msrb.mxu3 %v5265_v18 }
 0x9e8   :  { %3192 = vmatpush.bf16.msrb.mxu3 %v5276_v32 }
 0x9ec   :  { %3193 = vmatpush.bf16.msrb.mxu3 %v5287_v56  ;;  %v5772_v56 = vld [vmem:[#allocation31_spill] sm:$0xff] }
 0x9ed   :  { %v1947_v14 = vadd.f32 %v5772_v56, %v5271_v33 }
 0x9f0   :  { %3194 = vmatpush.bf16.msrb.mxu3 %v5293_v11 }
 0x9f4   :  { %3195 = vmatpush.bf16.msrb.mxu3 %v5303_v34  ;;  %v2966_v34 = vadd.f32 %v5773_v12, %v1947_v14 }
 0x9f8   :  { %3196 = vmatpush.bf16.msrb.mxu3 %v5313_v39 }
 0x9fc   :  { %3197 = vmatpush.bf16.msrb.mxu3 %v5319_v40 }
 0xa00   :  { %3198 = vmatpush.bf16.msrb.mxu3 %v5323_v42 }
 0xa60   :  { %v2991_v18 = vpop.f32.mrf.mxu0 }
 0xa61   :  { %v3028_v24 = vadd.f32 %v2991_v18, %v2967_v25  ;;  %v3004_v32 = vpop.f32.mrf.mxu1 }
 0xa62   :  { %v3048_v41 = vadd.f32 %v5474_v35, %v3004_v32 }
 0xa63   :  { %v3999_v11 = vmul.f32 -1.442695, %v3028_v24 }
 0xa65   :  { %4338 = vpow2.f32 %v3999_v11 }
 0xa66   :  { %v2978_v39 = vpop.f32.mrf.mxu3 }
 0xa67   :  { %v3008_v21 = vadd.f32 %v2978_v39, %v2966_v34 }
 0xa68   :  { %v2993_v40 = vpop.f32.mrf.mxu0 }
 0xa69   :  { %v3998_v63 = vmul.f32 -1.442695, %v3008_v21  ;;  %v3006_v42 = vpop.f32.mrf.mxu1 }
 0xa6b   :  { %v4339_v44 = vpop.eup %4338  ;;  %4340 = vpow2.f32 %v3998_v63 }
 0xa6c   :  { %v3032_v54 = vadd.f32 1.0, %v4339_v44 }
 0xa6e   :  { %4342 = vrcp.f32 %v3032_v54  ;;  %v2980_v55 = vpop.f32.mrf.mxu3  ;;  %v3044_v49 = vand.u32 2147483648, %v3032_v54  ;;  %v3042_v31 = vand.u32 2147483647, %v3032_v54  ;;  %vm3038_vm9 = vweird.f32 %v3032_v54 }
 0xa70   :  { %v3045_v38 = vor.u32 1.1754944e-38, %v3044_v49  ;;  %vm3043_vm11 = vcmp.eq.f32.partialorder %v3042_v31, 8.507059e+37 }
 0xa71   :  { %v4341_v28 = vpop.eup %4340 }
 0xa72   :  { %v3012_v52 = vadd.f32 1.0, %v4341_v28 }
 0xa74   :  { %v4343_v22 = vpop.eup %4342  ;;  %4344 = vrcp.f32 %v3012_v52  ;;  %v3024_v20 = vand.u32 2147483648, %v3012_v52  ;;  %v3022_v48 = vand.u32 2147483647, %v3012_v52  ;;  %vm3018_vm13 = vweird.f32 %v3012_v52 }
 0xa75   :  { %v3034_v29 = vmul.f32 %v4343_v22, %v3032_v54  ;;  %vm3039_vm8 = vweird.f32 %v4343_v22 }
 0xa76   :  { %vm3040_vm10 = vmor %vm3038_vm9, %vm3039_vm8  ;;  %v3025_v37 = vor.u32 1.1754944e-38, %v3024_v20  ;;  %vm3023_vm15 = vcmp.eq.f32.partialorder %v3022_v48, 8.507059e+37 }
 0xa77   :  { %v3035_v3 = vsub.f32 1.0, %v3034_v29 }
 0xa79   :  { %v3036_v36 = vmul.f32 %v4343_v22, %v3035_v3 }
 0xa7a   :  { %v4345_v45 = vpop.eup %4344 }
 0xa7b   :  { %v3037_v19 = vadd.f32 %v4343_v22, %v3036_v36  ;;  %v3014_v4 = vmul.f32 %v4345_v45, %v3012_v52  ;;  %vm3019_vm12 = vweird.f32 %v4345_v45 }
 0xa7c   :  { %vm3020_vm14 = vmor %vm3018_vm13, %vm3019_vm12 }
 0xa7d   :  { %v3015_v16 = vsub.f32 1.0, %v3014_v4  ;;  %v3041_v53 = vsel %vm3040_vm10, %v4343_v22, %v3037_v19 }
 0xa7e   :  { %v3046_v23 = vsel %vm3043_vm11, %v3045_v38, %v3041_v53 }
 0xa7f   :  { %v3016_v62 = vmul.f32 %v4345_v45, %v3015_v16  ;;  %v3055_v47 = vmul.f32 %v3054_v0, %v3046_v23  ;;  %v3052_v27 = vsub.f32 1.0, %v3046_v23 }
 0xa81   :  { %v3017_v58 = vadd.f32 %v4345_v45, %v3016_v62  ;;  %v5779_v62 = vld [vmem:[#allocation30_spill] sm:$0xff] }
 0xa83   :  { %v3021_v17 = vsel %vm3020_vm14, %v4345_v45, %v3017_v58 }
 0xa84   :  { %v3026_v6 = vsel %vm3023_vm15, %v3025_v37, %v3021_v17  ;;  %v4193_v17 = vld [vmem:[%s5709_s11 + $0x28] sm:$0xff] }
 0xa85   :  { %v3049_v5 = vmul.f32 %v3048_v41, %v3026_v6  ;;  %v4194_v41 = vld [vmem:[%s5709_s11 + $0x30] sm:$0xff] }
 0xa86   :  { %v5780_v6 = vld [vmem:[#allocation29_spill] sm:$0xff] }
 0xa87   :  { %v3050_v46 = vadd.f32 %v3049_v5, %v2968_v51  ;;  %v1952_v13 = vadd.f32 %v5780_v6, %v5271_v33  ;;  %v4192_v51 = vld [vmem:[%s5709_s11 + $0x20] sm:$0xff]  ;;  %v5781_v5 = vld [vmem:[#allocation20_spill] sm:$0xff]  ;;  %v4190_v33 = vld [vmem:[%s5709_s11 + $0x10] sm:$0xff] }
 0xa89   :  { %4346 = vtanh.f32 %v3050_v46  ;;  %v3162_v46 = vadd.f32 %v5781_v5, %v1952_v13 }
 0xa8f   :  { %v4347_v8 = vpop.eup %4346 }
 0xa90   :  { %v3053_v1 = vmul.f32 %v4347_v8, %v3052_v27 }
 0xa92   :  { %v3056_v10 = vadd.f32 %v3055_v47, %v3053_v1  ;;  %v4191_v1 = vld [vmem:[%s5709_s11 + $0x18] sm:$0xff] }
 0xa94   :  { %v3057_v2 = vpack.c.bf16 %v3056_v10, %v3056_v10 }
 0xa96   :  { %3075 = vmatmul.bf16.vlgmr.msra.gmra.mxu2 %v3057_v2  ;;  %3088 = vmatmul.bf16.vlgmr.msra.gmra.mxu3 %v3057_v2  ;;  %v3152_v53 = vunpack.c.l.bf16 %v3057_v2 }
 0xa97   :  { %3101 = vmatmul.bf16.vlgmr.msrb.gmra.mxu0 %v3057_v2 }
 0xb14   :  { %v3102_v60 = vpop.f32.mrf.mxu0 }
 0xb15   :  { %v3146_v45 = vadd.f32 %v5474_v35, %v3102_v60  ;;  %v4195_v35 = vld [vmem:[%s5709_s11 + $0x38] sm:$0xff] }
 0xb16   :  { %3324 = vmatpush.bf16.msra.mxu0 %v4195_v35 }
 0xb19   :  { %v3076_v50 = vpop.f32.mrf.mxu2  ;;  %v3089_v26 = vpop.f32.mrf.mxu3 }
 0xb1a   :  { %v3106_v9 = vadd.f32 %v3076_v50, %v3064_v30  ;;  %v3126_v25 = vadd.f32 %v3089_v26, %v5778_v43  ;;  %3325 = vmatpush.bf16.msra.mxu0 %v4194_v41  ;;  %v4189_v50 = vld [vmem:[%s5709_s11 + $0x8] sm:$0xff] }
 0xb1c   :  { %v4000_v18 = vmul.f32 -1.442695, %v3106_v9  ;;  %v4001_v24 = vmul.f32 -1.442695, %v3126_v25  ;;  %v3104_v32 = vpop.f32.mrf.mxu0  ;;  %v4188_v9 = vld [vmem:[%s5709_s11] sm:$0xff] }
 0xb1e   :  { %4348 = vpow2.f32 %v4000_v18  ;;  %3326 = vmatpush.bf16.msra.mxu0 %v4193_v17 }
 0xb1f   :  { %4350 = vpow2.f32 %v4001_v24 }
 0xb21   :  { %v3078_v56 = vpop.f32.mrf.mxu2  ;;  %v3091_v14 = vpop.f32.mrf.mxu3 }
 0xb22   :  { %3327 = vmatpush.bf16.msra.mxu0 %v4192_v51 }
 0xb24   :  { %v4349_v11 = vpop.eup %4348 }
 0xb25   :  { %v4351_v12 = vpop.eup %4350  ;;  %v3110_v34 = vadd.f32 1.0, %v4349_v11 }
 0xb26   :  { %v3130_v39 = vadd.f32 1.0, %v4351_v12  ;;  %3328 = vmatpush.bf16.msra.mxu0 %v4191_v1 }
 0xb27   :  { %4352 = vrcp.f32 %v3110_v34  ;;  %v3122_v54 = vand.u32 2147483648, %v3110_v34  ;;  %v3120_v52 = vand.u32 2147483647, %v3110_v34  ;;  %vm3116_vm2 = vweird.f32 %v3110_v34 }
 0xb28   :  { %4354 = vrcp.f32 %v3130_v39  ;;  %v3142_v22 = vand.u32 2147483648, %v3130_v39  ;;  %v3140_v3 = vand.u32 2147483647, %v3130_v39  ;;  %vm3136_vm4 = vweird.f32 %v3130_v39 }
 0xb29   :  { %v3123_v36 = vor.u32 1.1754944e-38, %v3122_v54  ;;  %vm3121_vm5 = vcmp.eq.f32.partialorder %v3120_v52, 8.507059e+37 }
 0xb2a   :  { %v3143_v4 = vor.u32 1.1754944e-38, %v3142_v22  ;;  %vm3141_vm7 = vcmp.eq.f32.partialorder %v3140_v3, 8.507059e+37  ;;  %3329 = vmatpush.bf16.msra.mxu0 %v4190_v33 }
 0xb2d   :  { %v4353_v21 = vpop.eup %4352 }
 0xb2e   :  { %v4355_v40 = vpop.eup %4354  ;;  %v3112_v63 = vmul.f32 %v4353_v21, %v3110_v34  ;;  %vm3117_vm0 = vweird.f32 %v4353_v21  ;;  %3330 = vmatpush.bf16.msra.mxu0 %v4189_v50 }
 0xb2f   :  { %v3132_v42 = vmul.f32 %v4355_v40, %v3130_v39  ;;  %vm3137_vm1 = vweird.f32 %v4355_v40  ;;  %vm3118_vm3 = vmor %vm3116_vm2, %vm3117_vm0 }
 0xb30   :  { %v3113_v44 = vsub.f32 1.0, %v3112_v63  ;;  %vm3138_vm6 = vmor %vm3136_vm4, %vm3137_vm1 }
 0xb31   :  { %v3133_v55 = vsub.f32 1.0, %v3132_v42 }
 0xb32   :  { %v3114_v28 = vmul.f32 %v4353_v21, %v3113_v44  ;;  %3331 = vmatpush.bf16.msra.mxu0 %v4188_v9 }
 0xb33   :  { %v3134_v29 = vmul.f32 %v4355_v40, %v3133_v55  ;;  %v4369_v55 = vld [vmem:[%s5707_s9] ss:$0 sm:$0xff] }
 0xb34   :  { %v3115_v49 = vadd.f32 %v4353_v21, %v3114_v28 }
 0xb35   :  { %v3135_v31 = vadd.f32 %v4355_v40, %v3134_v29 }
 0xb36   :  { %v3119_v19 = vsel %vm3118_vm3, %v4353_v21, %v3115_v49 }
 0xb37   :  { %v3124_v38 = vsel %vm3121_vm5, %v3123_v36, %v3119_v19  ;;  %v3139_v16 = vsel %vm3138_vm6, %v4355_v40, %v3135_v31  ;;  %v5783_v31 = vld [vmem:[#allocation19_spill] sm:$0xff] }
 0xb38   :  { %v3147_v0 = vmul.f32 %v3146_v45, %v3124_v38  ;;  %v3144_v20 = vsel %vm3141_vm7, %v3143_v4, %v3139_v16 }
 0xb39   :  { %v3153_v23 = vmul.f32 %v3152_v53, %v3144_v20  ;;  %v3150_v47 = vsub.f32 1.0, %v3144_v20 }
 0xb3a   :  { %v3148_v48 = vadd.f32 %v3147_v0, %v5779_v62 }
 0xb3c   :  { %4356 = vtanh.f32 %v3148_v48 }
 0xb42   :  { %v4357_v58 = vpop.eup %4356 }
 0xb43   :  { %v3151_v37 = vmul.f32 %v4357_v58, %v3150_v47  ;;  %v4207_v58 = vld [vmem:[%s5710_s12] ss:$0 sm:$0xff] }
 0xb45   :  { %v3154_v15 = vadd.f32 %v3153_v23, %v3151_v37 }
 0xb47   :  { %v5651_v57 = vpack.c.bf16 %v3154_v15, %v3154_v15 }
 0xb49   :  { %3173 = vmatmul.bf16.vlgmr.msrb.gmra.mxu1 %v5651_v57  ;;  %3186 = vmatmul.bf16.vlgmr.msrb.gmra.mxu2 %v5651_v57  ;;  %v3250_v38 = vunpack.c.l.bf16 %v5651_v57 }
 0xb4a   :  { %3199 = vmatmul.bf16.vlgmr.msrb.gmra.mxu3 %v5651_v57 }
 0xbc6   :  { %v3174_v27 = vpop.f32.mrf.mxu1 }
 0xbc7   :  { %v3204_v8 = vadd.f32 %v3174_v27, %v3162_v46 }
 0xbc9   :  { %v4002_v10 = vmul.f32 -1.442695, %v3204_v8 }
 0xbcb   :  { %4358 = vpow2.f32 %v4002_v10 }
 0xbcc   :  { %v3187_v2 = vpop.f32.mrf.mxu2 }
 0xbcd   :  { %v3224_v61 = vadd.f32 %v3187_v2, %v5782_v59  ;;  %v3200_v60 = vpop.f32.mrf.mxu3 }
 0xbce   :  { %v3176_v7 = vpop.f32.mrf.mxu1  ;;  %v3244_v28 = vadd.f32 %v4369_v55, %v3200_v60 }
 0xbcf   :  { %v4003_v30 = vmul.f32 -1.442695, %v3224_v61 }
 0xbd1   :  { %v4359_v26 = vpop.eup %4358  ;;  %4360 = vpow2.f32 %v4003_v30 }
 0xbd2   :  { %v3208_v43 = vadd.f32 1.0, %v4359_v26 }
 0xbd4   :  { %4362 = vrcp.f32 %v3208_v43  ;;  %v3189_v25 = vpop.f32.mrf.mxu2  ;;  %v3220_v12 = vand.u32 2147483648, %v3208_v43  ;;  %v3218_v39 = vand.u32 2147483647, %v3208_v43  ;;  %vm3214_vm9 = vweird.f32 %v3208_v43 }
 0xbd5   :  { %v3202_v18 = vpop.f32.mrf.mxu3 }
 0xbd6   :  { %v3221_v42 = vor.u32 1.1754944e-38, %v3220_v12  ;;  %vm3219_vm11 = vcmp.eq.f32.partialorder %v3218_v39, 8.507059e+37 }
 0xbd7   :  { %v4361_v24 = vpop.eup %4360 }
 0xbd8   :  { %v3228_v32 = vadd.f32 1.0, %v4361_v24 }
 0xbda   :  { %v4363_v56 = vpop.eup %4362  ;;  %4364 = vrcp.f32 %v3228_v32  ;;  %v3240_v52 = vand.u32 2147483648, %v3228_v32  ;;  %v3238_v3 = vand.u32 2147483647, %v3228_v32  ;;  %vm3234_vm13 = vweird.f32 %v3228_v32 }
 0xbdb   :  { %v3210_v14 = vmul.f32 %v4363_v56, %v3208_v43  ;;  %vm3215_vm8 = vweird.f32 %v4363_v56 }
 0xbdc   :  { %vm3216_vm10 = vmor %vm3214_vm9, %vm3215_vm8  ;;  %v3241_v19 = vor.u32 1.1754944e-38, %v3240_v52  ;;  %vm3239_vm15 = vcmp.eq.f32.partialorder %v3238_v3, 8.507059e+37 }
 0xbdd   :  { %v3211_v11 = vsub.f32 1.0, %v3210_v14 }
 0xbdf   :  { %v3212_v34 = vmul.f32 %v4363_v56, %v3211_v11 }
 0xbe0   :  { %v4365_v21 = vpop.eup %4364 }
 0xbe1   :  { %v3230_v40 = vmul.f32 %v4365_v21, %v3228_v32  ;;  %v3213_v63 = vadd.f32 %v4363_v56, %v3212_v34  ;;  %vm3235_vm12 = vweird.f32 %v4365_v21 }
 0xbe2   :  { %vm3236_vm14 = vmor %vm3234_vm13, %vm3235_vm12 }
 0xbe3   :  { %v3231_v44 = vsub.f32 1.0, %v3230_v40  ;;  %v3217_v54 = vsel %vm3216_vm10, %v4363_v56, %v3213_v63 }
 0xbe4   :  { %v3222_v22 = vsel %vm3219_vm11, %v3221_v42, %v3217_v54 }
 0xbe5   :  { %v3232_v29 = vmul.f32 %v4365_v21, %v3231_v44  ;;  %v3245_v49 = vmul.f32 %v3244_v28, %v3222_v22 }
 0xbe7   :  { %v3233_v36 = vadd.f32 %v4365_v21, %v3232_v29  ;;  %v3246_v45 = vadd.f32 %v3245_v49, %v5783_v31 }
 0xbe9   :  { %v3237_v4 = vsel %vm3236_vm14, %v4365_v21, %v3233_v36  ;;  %4366 = vtanh.f32 %v3246_v45 }
 0xbea   :  { %v3242_v16 = vsel %vm3239_vm15, %v3241_v19, %v3237_v4 }
 0xbeb   :  { %v3251_v53 = vmul.f32 %v3250_v38, %v3242_v16  ;;  %v3248_v0 = vsub.f32 1.0, %v3242_v16 }
 0xbef   :  { %v4367_v20 = vpop.eup %4366 }
 0xbf0   :  { %v3249_v23 = vmul.f32 %v4367_v20, %v3248_v0 }
 0xbf2   :  { %v3252_v62 = vadd.f32 %v3251_v53, %v3249_v23 }
 0xbf4   :  { %v3253_v48 = vpack.c.bf16 %v3252_v62, %v3252_v62 }
 0xbf6   :  { %v3254_v47 = vunpack.c.l.bf16 %v3253_v48  ;;  %3332 = vmatmul.bf16.vlgmr.msra.gmra.mxu0 %v3253_v48 }
 0xbf8   :  { %3255 = vst [vmem:[%s5712_s14] sm:$0xff] %v3254_v47 }
 0xc73   :  { %v3333_v37 = vpop.f32.mrf.mxu0 }
 0xc74   :  { %v3334_v15 = vadd.f32 %v4207_v58, %v3333_v37 }
 0xc76   :  { %3337 = vst [vmem:[%s5711_s13] sm:$0xff] %v3334_v15 }
 0xc7b   :  { %v3335_v57 = vpop.f32.mrf.mxu0 }
 0xc7c   :  { %3346 = vsyncpa [#allocation6], 1 }
 0xc7d   :  { %3347 = vsyncpa [#allocation8], 1 }
 0xc7e   :  { %3348 = vsyncpa [#allocation11], 1 }
 0xc7f   :  { %3349 = vsyncpa [#allocation14], 1 }

</bundles_post_ra>
